<compile_context>
chip_gen: v5e
topology: v5e:2x2
jax: 0.10.0
libtpu: 0.0.40
codegen_flags: <defaults>
</compile_context>

<pallas_src>
import functools
import math

import jax
import jax.numpy as jnp
from jax import lax
from jax.experimental import pallas as pl
from jax.experimental.pallas import tpu as pltpu

LN_EPS = 1e-5          # torch.nn.LayerNorm default
NEG_INF = -1e30


# ----------------------------------------------------------------- helpers --

def _layernorm(x, g, b):
    mu = jnp.mean(x, axis=-1, keepdims=True)
    var = jnp.mean(jnp.square(x - mu), axis=-1, keepdims=True)
    return (x - mu) * lax.rsqrt(var + LN_EPS) * g + b


# ------------------------------------------------------------------ kernel --

def _encoder_block_kernel(x_ref, mask_ref,
                          wq_ref, wk_ref, wv_ref, bq_ref, bk_ref, bv_ref,
                          wo_ref, bo_ref,
                          w1_ref, b1_ref, w2_ref, b2_ref,
                          g1_ref, be1_ref, g2_ref, be2_ref,
                          gf_ref, bf_ref,
                          o_ref, *, n_heads, inv_scale, apply_final_ln):
    """One full encoder layer for the whole batch: MHA + res/LN + FFN + res/LN."""
    B, S, D = x_ref.shape
    Dh = wq_ref.shape[-1]
    BS = B * S

    x = x_ref[...].reshape(BS, D)                  # [BS, D] f32 (merge leading dims)
    x16 = x.astype(jnp.bfloat16)                   # single cast feeds every projection
    maskb = mask_ref[...] != 0                     # [B, 1, S] — broadcasts over queries

    attn = jnp.zeros((BS, D), jnp.float32)
    # TODO(synk): switch to lax.fori_loop over heads (dynamic leading-axis ref
    #             index) once n_heads/S grow enough for vreg pressure to matter.
    for h in range(n_heads):
        # Head-major weights: wq_ref[h] is a free leading-axis index -> [D, Dh].
        q = (jnp.dot(x16, wq_ref[h], preferred_element_type=jnp.float32)
             + bq_ref[h]).reshape(B, S, Dh)
        k = (jnp.dot(x16, wk_ref[h], preferred_element_type=jnp.float32)
             + bk_ref[h]).reshape(B, S, Dh)
        v = (jnp.dot(x16, wv_ref[h], preferred_element_type=jnp.float32)
             + bv_ref[h]).reshape(B, S, Dh)

        # Batched over B; contracts the LAST dim of both q and k -> no .T.
        s = jnp.einsum('bqd,bkd->bqk',
                       q.astype(jnp.bfloat16), k.astype(jnp.bfloat16),
                       preferred_element_type=jnp.float32) * inv_scale     # [B,S,S]
        s = jnp.where(maskb, s, NEG_INF)           # masked_fill(mask == 0, -inf)
        s = s - jnp.max(s, axis=-1, keepdims=True)
        p = jnp.exp(s)
        p = p * pl.reciprocal(jnp.sum(p, axis=-1, keepdims=True), approx=True)

        o = jnp.einsum('bqk,bkd->bqd',
                       p.astype(jnp.bfloat16), v.astype(jnp.bfloat16),
                       preferred_element_type=jnp.float32)                 # [B,S,Dh]
        # per-head slice of the output projection == concat(heads) @ Wo
        attn = attn + jnp.dot(o.reshape(BS, Dh).astype(jnp.bfloat16), wo_ref[h],
                              preferred_element_type=jnp.float32)          # [BS, D]
    attn = attn + bo_ref[...]

    # -- residual + LayerNorm 1 (f32) --
    h1 = _layernorm(x + attn, g1_ref[...], be1_ref[...])

    # -- fused feed-forward: l1 + ReLU + l2, flattened over batch --
    f = jnp.dot(h1.astype(jnp.bfloat16), w1_ref[...],
                preferred_element_type=jnp.float32) + b1_ref[...]
    f = jnp.maximum(f, 0.0)
    f = jnp.dot(f.astype(jnp.bfloat16), w2_ref[...],
                preferred_element_type=jnp.float32) + b2_ref[...]

    # -- residual + LayerNorm 2 (+ fused final LayerNorm on the last block) --
    out = _layernorm(h1 + f, g2_ref[...], be2_ref[...])
    if apply_final_ln:
        out = _layernorm(out, gf_ref[...], bf_ref[...])
    o_ref[...] = out.reshape(B, S, D)


# ----------------------------------------------------------------- wrapper --

def encoder_block(x, mask_b1s, blk, final_ln, *, n_heads, apply_final_ln):
    B, S, D = x.shape
    H = n_heads
    Dh = D // H
    F = blk['w1'].shape[1]
    inv_scale = 1.0 / math.sqrt(Dh)

    def spec(shape):
        nd = len(shape)
        return pl.BlockSpec(shape, lambda i, nd=nd: (0,) * nd)

    kernel = functools.partial(_encoder_block_kernel, n_heads=H,
                               inv_scale=inv_scale,
                               apply_final_ln=apply_final_ln)
    return pl.pallas_call(
        kernel,
        out_shape=jax.ShapeDtypeStruct((B, S, D), jnp.float32),
        grid=(1,),                                  # whole batch in one step
        in_specs=[
            spec((B, S, D)),                        # x
            spec((B, 1, S)),                        # mask (never broadcast per head)
            spec((H, D, Dh)), spec((H, D, Dh)), spec((H, D, Dh)),   # Wq, Wk, Wv
            spec((H, 1, Dh)), spec((H, 1, Dh)), spec((H, 1, Dh)),   # bq, bk, bv
            spec((H, Dh, D)), spec((1, D)),         # Wo (head-major), bo
            spec((D, F)),     spec((1, F)),         # W1, b1
            spec((F, D)),     spec((1, D)),         # W2, b2
            spec((1, D)),     spec((1, D)),         # ln1 gamma, beta
            spec((1, D)),     spec((1, D)),         # ln2 gamma, beta
            spec((1, D)),     spec((1, D)),         # final ln gamma, beta
        ],
        out_specs=spec((B, S, D)),
        compiler_params=pltpu.CompilerParams(
            dimension_semantics=("arbitrary",)),
    )(x, mask_b1s,
      blk['wq'], blk['wk'], blk['wv'], blk['bq'], blk['bk'], blk['bv'],
      blk['wo'], blk['bo'],
      blk['w1'], blk['b1'], blk['w2'], blk['b2'],
      blk['ln1_g'], blk['ln1_b'], blk['ln2_g'], blk['ln2_b'],
      final_ln[0], final_ln[1])


def encoder_fwd(params, tokens, mask, *, n_heads):
    """tokens: [B, S] int32, mask: [B, 1, 1, S] bool -> [B, S, D] f32."""
    emb = params['emb']                 # [V, D]
    pos = params['pos']                 # [n_pos, D]
    B, S = tokens.shape
    D = emb.shape[1]
    # Embedding + PositionalEncodingSine: x = emb(tok) * sqrt(D) + pos_emb(arange(S))
    x = (emb[tokens] * math.sqrt(D) + pos[:S][None, :, :]).astype(jnp.float32)
    mask_b1s = mask.reshape(B, 1, S).astype(jnp.int32)

    blocks = params['blocks']
    final_ln = (params['ln_g'], params['ln_b'])
    if not blocks:                      # degenerate case: just the final LN
        return _layernorm(x, final_ln[0], final_ln[1])
    for i, blk in enumerate(blocks):
        x = encoder_block(x, mask_b1s, blk, final_ln, n_heads=n_heads,
                          apply_final_ln=(i == len(blocks) - 1))
    return x


# ------------------------------------------------------------- param init --

def init_params(key, vocab_size, d_model, d_ff, n_blocks, n_heads, n_pos=128):
    dh = d_model // n_heads
    keys = iter(jax.random.split(key, 12 * n_blocks + 2))

    def w(shape):   # MXU weights stored in bf16
        return (jax.random.normal(next(keys), shape, jnp.float32) * 0.05
                ).astype(jnp.bfloat16)

    def b(shape):   # biases stay f32
        return jax.random.normal(next(keys), shape, jnp.float32) * 0.05

    blocks = []
    for _ in range(n_blocks):
        blocks.append({
            # head-major projection weights: [H, D, Dh] / [H, Dh, D]
            'wq': w((n_heads, d_model, dh)), 'wk': w((n_heads, d_model, dh)),
            'wv': w((n_heads, d_model, dh)),
            'bq': b((n_heads, 1, dh)), 'bk': b((n_heads, 1, dh)),
            'bv': b((n_heads, 1, dh)),
            'wo': w((n_heads, dh, d_model)),   'bo': b((1, d_model)),
            'w1': w((d_model, d_ff)),          'b1': b((1, d_ff)),
            'w2': w((d_ff, d_model)),          'b2': b((1, d_model)),
            'ln1_g': jnp.ones((1, d_model), jnp.float32),
            'ln1_b': jnp.zeros((1, d_model), jnp.float32),
            'ln2_g': jnp.ones((1, d_model), jnp.float32),
            'ln2_b': jnp.zeros((1, d_model), jnp.float32),
        })
    return {
        'emb': jax.random.normal(next(keys), (vocab_size, d_model), jnp.float32) * 0.05,
        'pos': jax.random.normal(next(keys), (n_pos, d_model), jnp.float32) * 0.05,
        'blocks': blocks,
        'ln_g': jnp.ones((1, d_model), jnp.float32),
        'ln_b': jnp.zeros((1, d_model), jnp.float32),
    }


# -------------------------------------------------------------------- main --

if __name__ == "__main__":
    B, S = 2, 8
    D_MODEL, D_FF = 32, 64
    N_HEADS, N_BLOCKS = 4, 2
    VOCAB, PAD = 16, 0

    key = jax.random.PRNGKey(0)
    k_params, k_tok = jax.random.split(key)
    params = init_params(k_params, VOCAB, D_MODEL, D_FF, N_BLOCKS, N_HEADS)

    # Tokens in [1, vocab) so no row is fully padded; one pad token exercises masking.
    tokens = jax.random.randint(k_tok, (B, S), 1, VOCAB, dtype=jnp.int32)
    tokens = tokens.at[0, -1].set(PAD)
    mask = (tokens != PAD)[:, None, None, :]            # [B, 1, 1, S]

    fwd = jax.jit(functools.partial(encoder_fwd, n_heads=N_HEADS))
    out = fwd(params, tokens, mask)
    out = jax.block_until_ready(out)

    assert out.shape == (B, S, D_MODEL), out.shape
    assert bool(jnp.all(jnp.isfinite(out)))
    print("KERNEL_OK")
</pallas_src>

<mosaic_0001>
module attributes {stable_mosaic.version = 11 : i64} {
  func.func @_encoder_block_kernel(%arg0: i32, %arg1: memref<2x8x32xf32, #tpu.memory_space<vmem>>, %arg2: memref<2x1x8xi32, #tpu.memory_space<vmem>>, %arg3: memref<4x32x8xbf16, #tpu.memory_space<vmem>>, %arg4: memref<4x32x8xbf16, #tpu.memory_space<vmem>>, %arg5: memref<4x32x8xbf16, #tpu.memory_space<vmem>>, %arg6: memref<4x1x8xf32, #tpu.memory_space<vmem>>, %arg7: memref<4x1x8xf32, #tpu.memory_space<vmem>>, %arg8: memref<4x1x8xf32, #tpu.memory_space<vmem>>, %arg9: memref<4x8x32xbf16, #tpu.memory_space<vmem>>, %arg10: memref<1x32xf32, #tpu.memory_space<vmem>>, %arg11: memref<32x64xbf16, #tpu.memory_space<vmem>>, %arg12: memref<1x64xf32, #tpu.memory_space<vmem>>, %arg13: memref<64x32xbf16, #tpu.memory_space<vmem>>, %arg14: memref<1x32xf32, #tpu.memory_space<vmem>>, %arg15: memref<1x32xf32, #tpu.memory_space<vmem>>, %arg16: memref<1x32xf32, #tpu.memory_space<vmem>>, %arg17: memref<1x32xf32, #tpu.memory_space<vmem>>, %arg18: memref<1x32xf32, #tpu.memory_space<vmem>>, %arg19: memref<1x32xf32, #tpu.memory_space<vmem>>, %arg20: memref<1x32xf32, #tpu.memory_space<vmem>>, %arg21: memref<2x8x32xf32, #tpu.memory_space<vmem>>) attributes {dimension_semantics = [#tpu.dimension_semantics<arbitrary>], iteration_bounds = array<i64: 1>, scalar_prefetch = 0 : i64, scratch_operands = 0 : i64, tpu.core_type = #tpu.core_type<tc>, window_params = [{pipeline_mode = #tpu.pipeline_mode<synchronous>, transform_indices = @transform_0, window_bounds = array<i64: 2, 8, 32>}, {pipeline_mode = #tpu.pipeline_mode<synchronous>, transform_indices = @transform_1, window_bounds = array<i64: 2, 1, 8>}, {pipeline_mode = #tpu.pipeline_mode<synchronous>, transform_indices = @transform_2, window_bounds = array<i64: 4, 32, 8>}, {pipeline_mode = #tpu.pipeline_mode<synchronous>, transform_indices = @transform_3, window_bounds = array<i64: 4, 32, 8>}, {pipeline_mode = #tpu.pipeline_mode<synchronous>, transform_indices = @transform_4, window_bounds = array<i64: 4, 32, 8>}, {pipeline_mode = #tpu.pipeline_mode<synchronous>, transform_indices = @transform_5, window_bounds = array<i64: 4, 1, 8>}, {pipeline_mode = #tpu.pipeline_mode<synchronous>, transform_indices = @transform_6, window_bounds = array<i64: 4, 1, 8>}, {pipeline_mode = #tpu.pipeline_mode<synchronous>, transform_indices = @transform_7, window_bounds = array<i64: 4, 1, 8>}, {pipeline_mode = #tpu.pipeline_mode<synchronous>, transform_indices = @transform_8, window_bounds = array<i64: 4, 8, 32>}, {pipeline_mode = #tpu.pipeline_mode<synchronous>, transform_indices = @transform_9, window_bounds = array<i64: 1, 32>}, {pipeline_mode = #tpu.pipeline_mode<synchronous>, transform_indices = @transform_10, window_bounds = array<i64: 32, 64>}, {pipeline_mode = #tpu.pipeline_mode<synchronous>, transform_indices = @transform_11, window_bounds = array<i64: 1, 64>}, {pipeline_mode = #tpu.pipeline_mode<synchronous>, transform_indices = @transform_12, window_bounds = array<i64: 64, 32>}, {pipeline_mode = #tpu.pipeline_mode<synchronous>, transform_indices = @transform_13, window_bounds = array<i64: 1, 32>}, {pipeline_mode = #tpu.pipeline_mode<synchronous>, transform_indices = @transform_14, window_bounds = array<i64: 1, 32>}, {pipeline_mode = #tpu.pipeline_mode<synchronous>, transform_indices = @transform_15, window_bounds = array<i64: 1, 32>}, {pipeline_mode = #tpu.pipeline_mode<synchronous>, transform_indices = @transform_16, window_bounds = array<i64: 1, 32>}, {pipeline_mode = #tpu.pipeline_mode<synchronous>, transform_indices = @transform_17, window_bounds = array<i64: 1, 32>}, {pipeline_mode = #tpu.pipeline_mode<synchronous>, transform_indices = @transform_18, window_bounds = array<i64: 1, 32>}, {pipeline_mode = #tpu.pipeline_mode<synchronous>, transform_indices = @transform_19, window_bounds = array<i64: 1, 32>}, {pipeline_mode = #tpu.pipeline_mode<synchronous>, transform_indices = @transform_20, window_bounds = array<i64: 2, 8, 32>}]} {
    %c0 = arith.constant 0 : index
    %c0_0 = arith.constant 0 : index
    %c0_1 = arith.constant 0 : index
    %0 = vector.load %arg1[%c0, %c0_0, %c0_1] : memref<2x8x32xf32, #tpu.memory_space<vmem>>, vector<2x8x32xf32>
    %1 = vector.shape_cast %0 : vector<2x8x32xf32> to vector<16x32xf32>
    %2 = arith.truncf %1 : vector<16x32xf32> to vector<16x32xbf16>
    %c0_2 = arith.constant 0 : index
    %c0_3 = arith.constant 0 : index
    %c0_4 = arith.constant 0 : index
    %3 = vector.load %arg2[%c0_2, %c0_3, %c0_4] : memref<2x1x8xi32, #tpu.memory_space<vmem>>, vector<2x1x8xi32>
    %c0_i32 = arith.constant 0 : i32
    %4 = vector.broadcast %c0_i32 : i32 to vector<2x1x8xi32>
    %5 = arith.cmpi ne, %3, %4 : vector<2x1x8xi32>
    %cst = arith.constant 0.000000e+00 : f32
    %6 = vector.broadcast %cst : f32 to vector<16x32xf32>
    %c0_5 = arith.constant 0 : index
    %c0_6 = arith.constant 0 : index
    %c0_7 = arith.constant 0 : index
    %7 = vector.load %arg3[%c0_5, %c0_6, %c0_7] : memref<4x32x8xbf16, #tpu.memory_space<vmem>>, vector<1x32x8xbf16>
    %8 = vector.shape_cast %7 : vector<1x32x8xbf16> to vector<32x8xbf16>
    %cst_8 = arith.constant dense<0.000000e+00> : vector<16x8xf32>
    %9 = tpu.matmul %2, %8, %cst_8 {dimension_numbers = #tpu.dot_dimension_numbers<[1], [0], [0], [1], [0, 0, 1, 1], [], []>} : vector<16x32xbf16>, vector<32x8xbf16>, vector<16x8xf32> -> vector<16x8xf32>
    %c0_9 = arith.constant 0 : index
    %c0_10 = arith.constant 0 : index
    %c0_11 = arith.constant 0 : index
    %10 = vector.load %arg6[%c0_9, %c0_10, %c0_11] : memref<4x1x8xf32, #tpu.memory_space<vmem>>, vector<1x1x8xf32>
    %11 = vector.shape_cast %10 : vector<1x1x8xf32> to vector<1x8xf32>
    %12 = vector.broadcast %11 : vector<1x8xf32> to vector<16x8xf32>
    %13 = arith.addf %9, %12 : vector<16x8xf32>
    %14 = vector.shape_cast %13 : vector<16x8xf32> to vector<2x8x8xf32>
    %c0_12 = arith.constant 0 : index
    %c0_13 = arith.constant 0 : index
    %c0_14 = arith.constant 0 : index
    %15 = vector.load %arg4[%c0_12, %c0_13, %c0_14] : memref<4x32x8xbf16, #tpu.memory_space<vmem>>, vector<1x32x8xbf16>
    %16 = vector.shape_cast %15 : vector<1x32x8xbf16> to vector<32x8xbf16>
    %cst_15 = arith.constant dense<0.000000e+00> : vector<16x8xf32>
    %17 = tpu.matmul %2, %16, %cst_15 {dimension_numbers = #tpu.dot_dimension_numbers<[1], [0], [0], [1], [0, 0, 1, 1], [], []>} : vector<16x32xbf16>, vector<32x8xbf16>, vector<16x8xf32> -> vector<16x8xf32>
    %c0_16 = arith.constant 0 : index
    %c0_17 = arith.constant 0 : index
    %c0_18 = arith.constant 0 : index
    %18 = vector.load %arg7[%c0_16, %c0_17, %c0_18] : memref<4x1x8xf32, #tpu.memory_space<vmem>>, vector<1x1x8xf32>
    %19 = vector.shape_cast %18 : vector<1x1x8xf32> to vector<1x8xf32>
    %20 = vector.broadcast %19 : vector<1x8xf32> to vector<16x8xf32>
    %21 = arith.addf %17, %20 : vector<16x8xf32>
    %22 = vector.shape_cast %21 : vector<16x8xf32> to vector<2x8x8xf32>
    %c0_19 = arith.constant 0 : index
    %c0_20 = arith.constant 0 : index
    %c0_21 = arith.constant 0 : index
    %23 = vector.load %arg5[%c0_19, %c0_20, %c0_21] : memref<4x32x8xbf16, #tpu.memory_space<vmem>>, vector<1x32x8xbf16>
    %24 = vector.shape_cast %23 : vector<1x32x8xbf16> to vector<32x8xbf16>
    %cst_22 = arith.constant dense<0.000000e+00> : vector<16x8xf32>
    %25 = tpu.matmul %2, %24, %cst_22 {dimension_numbers = #tpu.dot_dimension_numbers<[1], [0], [0], [1], [0, 0, 1, 1], [], []>} : vector<16x32xbf16>, vector<32x8xbf16>, vector<16x8xf32> -> vector<16x8xf32>
    %c0_23 = arith.constant 0 : index
    %c0_24 = arith.constant 0 : index
    %c0_25 = arith.constant 0 : index
    %26 = vector.load %arg8[%c0_23, %c0_24, %c0_25] : memref<4x1x8xf32, #tpu.memory_space<vmem>>, vector<1x1x8xf32>
    %27 = vector.shape_cast %26 : vector<1x1x8xf32> to vector<1x8xf32>
    %28 = vector.broadcast %27 : vector<1x8xf32> to vector<16x8xf32>
    %29 = arith.addf %25, %28 : vector<16x8xf32>
    %30 = vector.shape_cast %29 : vector<16x8xf32> to vector<2x8x8xf32>
    %31 = arith.truncf %14 : vector<2x8x8xf32> to vector<2x8x8xbf16>
    %32 = arith.truncf %22 : vector<2x8x8xf32> to vector<2x8x8xbf16>
    "tpu.trace_start"() <{level = 10 : i32, message = "bqd,bkd->bqk"}> : () -> ()
    %cst_26 = arith.constant dense<0.000000e+00> : vector<2x8x8xf32>
    %33 = tpu.matmul %31, %32, %cst_26 {dimension_numbers = #tpu.dot_dimension_numbers<[2], [2], [1], [1], [0, 0, 0, 1, 1, 1], [0], [0]>} : vector<2x8x8xbf16>, vector<2x8x8xbf16>, vector<2x8x8xf32> -> vector<2x8x8xf32>
    "tpu.trace_stop"() : () -> ()
    %cst_27 = arith.constant 0.353553385 : f32
    %34 = vector.broadcast %cst_27 : f32 to vector<2x8x8xf32>
    %35 = arith.mulf %33, %34 : vector<2x8x8xf32>
    %cst_28 = arith.constant -1.000000e+30 : f32
    %36 = vector.shape_cast %5 : vector<2x1x8xi1> to vector<2x1x8xi1>
    %37 = vector.broadcast %36 : vector<2x1x8xi1> to vector<2x8x8xi1>
    %38 = vector.broadcast %cst_28 : f32 to vector<2x8x8xf32>
    %39 = arith.select %37, %35, %38 : vector<2x8x8xi1>, vector<2x8x8xf32>
    %cst_29 = arith.constant dense<0xFF800000> : vector<2x8xf32>
    %40 = vector.multi_reduction <maximumf>, %39, %cst_29 [2] : vector<2x8x8xf32> to vector<2x8xf32>
    %41 = vector.shape_cast %40 : vector<2x8xf32> to vector<2x8x1xf32>
    %42 = vector.broadcast %41 : vector<2x8x1xf32> to vector<2x8x8xf32>
    %43 = arith.subf %39, %42 : vector<2x8x8xf32>
    %44 = math.exp %43 : vector<2x8x8xf32>
    %cst_30 = arith.constant dense<0.000000e+00> : vector<2x8xf32>
    %45 = vector.multi_reduction <add>, %44, %cst_30 [2] : vector<2x8x8xf32> to vector<2x8xf32>
    %46 = vector.shape_cast %45 : vector<2x8xf32> to vector<2x8x1xf32>
    %47 = tpu.reciprocal %46 {approx = true} : vector<2x8x1xf32> -> vector<2x8x1xf32>
    %48 = vector.broadcast %47 : vector<2x8x1xf32> to vector<2x8x8xf32>
    %49 = arith.mulf %44, %48 : vector<2x8x8xf32>
    %50 = arith.truncf %49 : vector<2x8x8xf32> to vector<2x8x8xbf16>
    %51 = arith.truncf %30 : vector<2x8x8xf32> to vector<2x8x8xbf16>
    "tpu.trace_start"() <{level = 10 : i32, message = "bqk,bkd->bqd"}> : () -> ()
    %cst_31 = arith.constant dense<0.000000e+00> : vector<2x8x8xf32>
    %52 = tpu.matmul %50, %51, %cst_31 {dimension_numbers = #tpu.dot_dimension_numbers<[2], [1], [1], [2], [0, 0, 0, 1, 1, 2], [0], [0]>} : vector<2x8x8xbf16>, vector<2x8x8xbf16>, vector<2x8x8xf32> -> vector<2x8x8xf32>
    "tpu.trace_stop"() : () -> ()
    %53 = vector.shape_cast %52 : vector<2x8x8xf32> to vector<16x8xf32>
    %54 = arith.truncf %53 : vector<16x8xf32> to vector<16x8xbf16>
    %c0_32 = arith.constant 0 : index
    %c0_33 = arith.constant 0 : index
    %c0_34 = arith.constant 0 : index
    %55 = vector.load %arg9[%c0_32, %c0_33, %c0_34] : memref<4x8x32xbf16, #tpu.memory_space<vmem>>, vector<1x8x32xbf16>
    %56 = vector.shape_cast %55 : vector<1x8x32xbf16> to vector<8x32xbf16>
    %cst_35 = arith.constant dense<0.000000e+00> : vector<16x32xf32>
    %57 = tpu.matmul %54, %56, %cst_35 {dimension_numbers = #tpu.dot_dimension_numbers<[1], [0], [0], [1], [0, 0, 1, 1], [], []>} : vector<16x8xbf16>, vector<8x32xbf16>, vector<16x32xf32> -> vector<16x32xf32>
    %58 = arith.addf %6, %57 : vector<16x32xf32>
    %c1 = arith.constant 1 : index
    %c0_36 = arith.constant 0 : index
    %c0_37 = arith.constant 0 : index
    %59 = vector.load %arg3[%c1, %c0_36, %c0_37] : memref<4x32x8xbf16, #tpu.memory_space<vmem>>, vector<1x32x8xbf16>
    %60 = vector.shape_cast %59 : vector<1x32x8xbf16> to vector<32x8xbf16>
    %cst_38 = arith.constant dense<0.000000e+00> : vector<16x8xf32>
    %61 = tpu.matmul %2, %60, %cst_38 {dimension_numbers = #tpu.dot_dimension_numbers<[1], [0], [0], [1], [0, 0, 1, 1], [], []>} : vector<16x32xbf16>, vector<32x8xbf16>, vector<16x8xf32> -> vector<16x8xf32>
    %c1_39 = arith.constant 1 : index
    %c0_40 = arith.constant 0 : index
    %c0_41 = arith.constant 0 : index
    %62 = vector.load %arg6[%c1_39, %c0_40, %c0_41] : memref<4x1x8xf32, #tpu.memory_space<vmem>>, vector<1x1x8xf32>
    %63 = vector.shape_cast %62 : vector<1x1x8xf32> to vector<1x8xf32>
    %64 = vector.broadcast %63 : vector<1x8xf32> to vector<16x8xf32>
    %65 = arith.addf %61, %64 : vector<16x8xf32>
    %66 = vector.shape_cast %65 : vector<16x8xf32> to vector<2x8x8xf32>
    %c1_42 = arith.constant 1 : index
    %c0_43 = arith.constant 0 : index
    %c0_44 = arith.constant 0 : index
    %67 = vector.load %arg4[%c1_42, %c0_43, %c0_44] : memref<4x32x8xbf16, #tpu.memory_space<vmem>>, vector<1x32x8xbf16>
    %68 = vector.shape_cast %67 : vector<1x32x8xbf16> to vector<32x8xbf16>
    %cst_45 = arith.constant dense<0.000000e+00> : vector<16x8xf32>
    %69 = tpu.matmul %2, %68, %cst_45 {dimension_numbers = #tpu.dot_dimension_numbers<[1], [0], [0], [1], [0, 0, 1, 1], [], []>} : vector<16x32xbf16>, vector<32x8xbf16>, vector<16x8xf32> -> vector<16x8xf32>
    %c1_46 = arith.constant 1 : index
    %c0_47 = arith.constant 0 : index
    %c0_48 = arith.constant 0 : index
    %70 = vector.load %arg7[%c1_46, %c0_47, %c0_48] : memref<4x1x8xf32, #tpu.memory_space<vmem>>, vector<1x1x8xf32>
    %71 = vector.shape_cast %70 : vector<1x1x8xf32> to vector<1x8xf32>
    %72 = vector.broadcast %71 : vector<1x8xf32> to vector<16x8xf32>
    %73 = arith.addf %69, %72 : vector<16x8xf32>
    %74 = vector.shape_cast %73 : vector<16x8xf32> to vector<2x8x8xf32>
    %c1_49 = arith.constant 1 : index
    %c0_50 = arith.constant 0 : index
    %c0_51 = arith.constant 0 : index
    %75 = vector.load %arg5[%c1_49, %c0_50, %c0_51] : memref<4x32x8xbf16, #tpu.memory_space<vmem>>, vector<1x32x8xbf16>
    %76 = vector.shape_cast %75 : vector<1x32x8xbf16> to vector<32x8xbf16>
    %cst_52 = arith.constant dense<0.000000e+00> : vector<16x8xf32>
    %77 = tpu.matmul %2, %76, %cst_52 {dimension_numbers = #tpu.dot_dimension_numbers<[1], [0], [0], [1], [0, 0, 1, 1], [], []>} : vector<16x32xbf16>, vector<32x8xbf16>, vector<16x8xf32> -> vector<16x8xf32>
    %c1_53 = arith.constant 1 : index
    %c0_54 = arith.constant 0 : index
    %c0_55 = arith.constant 0 : index
    %78 = vector.load %arg8[%c1_53, %c0_54, %c0_55] : memref<4x1x8xf32, #tpu.memory_space<vmem>>, vector<1x1x8xf32>
    %79 = vector.shape_cast %78 : vector<1x1x8xf32> to vector<1x8xf32>
    %80 = vector.broadcast %79 : vector<1x8xf32> to vector<16x8xf32>
    %81 = arith.addf %77, %80 : vector<16x8xf32>
    %82 = vector.shape_cast %81 : vector<16x8xf32> to vector<2x8x8xf32>
    %83 = arith.truncf %66 : vector<2x8x8xf32> to vector<2x8x8xbf16>
    %84 = arith.truncf %74 : vector<2x8x8xf32> to vector<2x8x8xbf16>
    "tpu.trace_start"() <{level = 10 : i32, message = "bqd,bkd->bqk"}> : () -> ()
    %cst_56 = arith.constant dense<0.000000e+00> : vector<2x8x8xf32>
    %85 = tpu.matmul %83, %84, %cst_56 {dimension_numbers = #tpu.dot_dimension_numbers<[2], [2], [1], [1], [0, 0, 0, 1, 1, 1], [0], [0]>} : vector<2x8x8xbf16>, vector<2x8x8xbf16>, vector<2x8x8xf32> -> vector<2x8x8xf32>
    "tpu.trace_stop"() : () -> ()
    %cst_57 = arith.constant 0.353553385 : f32
    %86 = vector.broadcast %cst_57 : f32 to vector<2x8x8xf32>
    %87 = arith.mulf %85, %86 : vector<2x8x8xf32>
    %cst_58 = arith.constant -1.000000e+30 : f32
    %88 = vector.shape_cast %5 : vector<2x1x8xi1> to vector<2x1x8xi1>
    %89 = vector.broadcast %88 : vector<2x1x8xi1> to vector<2x8x8xi1>
    %90 = vector.broadcast %cst_58 : f32 to vector<2x8x8xf32>
    %91 = arith.select %89, %87, %90 : vector<2x8x8xi1>, vector<2x8x8xf32>
    %cst_59 = arith.constant dense<0xFF800000> : vector<2x8xf32>
    %92 = vector.multi_reduction <maximumf>, %91, %cst_59 [2] : vector<2x8x8xf32> to vector<2x8xf32>
    %93 = vector.shape_cast %92 : vector<2x8xf32> to vector<2x8x1xf32>
    %94 = vector.broadcast %93 : vector<2x8x1xf32> to vector<2x8x8xf32>
    %95 = arith.subf %91, %94 : vector<2x8x8xf32>
    %96 = math.exp %95 : vector<2x8x8xf32>
    %cst_60 = arith.constant dense<0.000000e+00> : vector<2x8xf32>
    %97 = vector.multi_reduction <add>, %96, %cst_60 [2] : vector<2x8x8xf32> to vector<2x8xf32>
    %98 = vector.shape_cast %97 : vector<2x8xf32> to vector<2x8x1xf32>
    %99 = tpu.reciprocal %98 {approx = true} : vector<2x8x1xf32> -> vector<2x8x1xf32>
    %100 = vector.broadcast %99 : vector<2x8x1xf32> to vector<2x8x8xf32>
    %101 = arith.mulf %96, %100 : vector<2x8x8xf32>
    %102 = arith.truncf %101 : vector<2x8x8xf32> to vector<2x8x8xbf16>
    %103 = arith.truncf %82 : vector<2x8x8xf32> to vector<2x8x8xbf16>
    "tpu.trace_start"() <{level = 10 : i32, message = "bqk,bkd->bqd"}> : () -> ()
    %cst_61 = arith.constant dense<0.000000e+00> : vector<2x8x8xf32>
    %104 = tpu.matmul %102, %103, %cst_61 {dimension_numbers = #tpu.dot_dimension_numbers<[2], [1], [1], [2], [0, 0, 0, 1, 1, 2], [0], [0]>} : vector<2x8x8xbf16>, vector<2x8x8xbf16>, vector<2x8x8xf32> -> vector<2x8x8xf32>
    "tpu.trace_stop"() : () -> ()
    %105 = vector.shape_cast %104 : vector<2x8x8xf32> to vector<16x8xf32>
    %106 = arith.truncf %105 : vector<16x8xf32> to vector<16x8xbf16>
    %c1_62 = arith.constant 1 : index
    %c0_63 = arith.constant 0 : index
    %c0_64 = arith.constant 0 : index
    %107 = vector.load %arg9[%c1_62, %c0_63, %c0_64] : memref<4x8x32xbf16, #tpu.memory_space<vmem>>, vector<1x8x32xbf16>
    %108 = vector.shape_cast %107 : vector<1x8x32xbf16> to vector<8x32xbf16>
    %cst_65 = arith.constant dense<0.000000e+00> : vector<16x32xf32>
    %109 = tpu.matmul %106, %108, %cst_65 {dimension_numbers = #tpu.dot_dimension_numbers<[1], [0], [0], [1], [0, 0, 1, 1], [], []>} : vector<16x8xbf16>, vector<8x32xbf16>, vector<16x32xf32> -> vector<16x32xf32>
    %110 = arith.addf %58, %109 : vector<16x32xf32>
    %c2 = arith.constant 2 : index
    %c0_66 = arith.constant 0 : index
    %c0_67 = arith.constant 0 : index
    %111 = vector.load %arg3[%c2, %c0_66, %c0_67] : memref<4x32x8xbf16, #tpu.memory_space<vmem>>, vector<1x32x8xbf16>
    %112 = vector.shape_cast %111 : vector<1x32x8xbf16> to vector<32x8xbf16>
    %cst_68 = arith.constant dense<0.000000e+00> : vector<16x8xf32>
    %113 = tpu.matmul %2, %112, %cst_68 {dimension_numbers = #tpu.dot_dimension_numbers<[1], [0], [0], [1], [0, 0, 1, 1], [], []>} : vector<16x32xbf16>, vector<32x8xbf16>, vector<16x8xf32> -> vector<16x8xf32>
    %c2_69 = arith.constant 2 : index
    %c0_70 = arith.constant 0 : index
    %c0_71 = arith.constant 0 : index
    %114 = vector.load %arg6[%c2_69, %c0_70, %c0_71] : memref<4x1x8xf32, #tpu.memory_space<vmem>>, vector<1x1x8xf32>
    %115 = vector.shape_cast %114 : vector<1x1x8xf32> to vector<1x8xf32>
    %116 = vector.broadcast %115 : vector<1x8xf32> to vector<16x8xf32>
    %117 = arith.addf %113, %116 : vector<16x8xf32>
    %118 = vector.shape_cast %117 : vector<16x8xf32> to vector<2x8x8xf32>
    %c2_72 = arith.constant 2 : index
    %c0_73 = arith.constant 0 : index
    %c0_74 = arith.constant 0 : index
    %119 = vector.load %arg4[%c2_72, %c0_73, %c0_74] : memref<4x32x8xbf16, #tpu.memory_space<vmem>>, vector<1x32x8xbf16>
    %120 = vector.shape_cast %119 : vector<1x32x8xbf16> to vector<32x8xbf16>
    %cst_75 = arith.constant dense<0.000000e+00> : vector<16x8xf32>
    %121 = tpu.matmul %2, %120, %cst_75 {dimension_numbers = #tpu.dot_dimension_numbers<[1], [0], [0], [1], [0, 0, 1, 1], [], []>} : vector<16x32xbf16>, vector<32x8xbf16>, vector<16x8xf32> -> vector<16x8xf32>
    %c2_76 = arith.constant 2 : index
    %c0_77 = arith.constant 0 : index
    %c0_78 = arith.constant 0 : index
    %122 = vector.load %arg7[%c2_76, %c0_77, %c0_78] : memref<4x1x8xf32, #tpu.memory_space<vmem>>, vector<1x1x8xf32>
    %123 = vector.shape_cast %122 : vector<1x1x8xf32> to vector<1x8xf32>
    %124 = vector.broadcast %123 : vector<1x8xf32> to vector<16x8xf32>
    %125 = arith.addf %121, %124 : vector<16x8xf32>
    %126 = vector.shape_cast %125 : vector<16x8xf32> to vector<2x8x8xf32>
    %c2_79 = arith.constant 2 : index
    %c0_80 = arith.constant 0 : index
    %c0_81 = arith.constant 0 : index
    %127 = vector.load %arg5[%c2_79, %c0_80, %c0_81] : memref<4x32x8xbf16, #tpu.memory_space<vmem>>, vector<1x32x8xbf16>
    %128 = vector.shape_cast %127 : vector<1x32x8xbf16> to vector<32x8xbf16>
    %cst_82 = arith.constant dense<0.000000e+00> : vector<16x8xf32>
    %129 = tpu.matmul %2, %128, %cst_82 {dimension_numbers = #tpu.dot_dimension_numbers<[1], [0], [0], [1], [0, 0, 1, 1], [], []>} : vector<16x32xbf16>, vector<32x8xbf16>, vector<16x8xf32> -> vector<16x8xf32>
    %c2_83 = arith.constant 2 : index
    %c0_84 = arith.constant 0 : index
    %c0_85 = arith.constant 0 : index
    %130 = vector.load %arg8[%c2_83, %c0_84, %c0_85] : memref<4x1x8xf32, #tpu.memory_space<vmem>>, vector<1x1x8xf32>
    %131 = vector.shape_cast %130 : vector<1x1x8xf32> to vector<1x8xf32>
    %132 = vector.broadcast %131 : vector<1x8xf32> to vector<16x8xf32>
    %133 = arith.addf %129, %132 : vector<16x8xf32>
    %134 = vector.shape_cast %133 : vector<16x8xf32> to vector<2x8x8xf32>
    %135 = arith.truncf %118 : vector<2x8x8xf32> to vector<2x8x8xbf16>
    %136 = arith.truncf %126 : vector<2x8x8xf32> to vector<2x8x8xbf16>
    "tpu.trace_start"() <{level = 10 : i32, message = "bqd,bkd->bqk"}> : () -> ()
    %cst_86 = arith.constant dense<0.000000e+00> : vector<2x8x8xf32>
    %137 = tpu.matmul %135, %136, %cst_86 {dimension_numbers = #tpu.dot_dimension_numbers<[2], [2], [1], [1], [0, 0, 0, 1, 1, 1], [0], [0]>} : vector<2x8x8xbf16>, vector<2x8x8xbf16>, vector<2x8x8xf32> -> vector<2x8x8xf32>
    "tpu.trace_stop"() : () -> ()
    %cst_87 = arith.constant 0.353553385 : f32
    %138 = vector.broadcast %cst_87 : f32 to vector<2x8x8xf32>
    %139 = arith.mulf %137, %138 : vector<2x8x8xf32>
    %cst_88 = arith.constant -1.000000e+30 : f32
    %140 = vector.shape_cast %5 : vector<2x1x8xi1> to vector<2x1x8xi1>
    %141 = vector.broadcast %140 : vector<2x1x8xi1> to vector<2x8x8xi1>
    %142 = vector.broadcast %cst_88 : f32 to vector<2x8x8xf32>
    %143 = arith.select %141, %139, %142 : vector<2x8x8xi1>, vector<2x8x8xf32>
    %cst_89 = arith.constant dense<0xFF800000> : vector<2x8xf32>
    %144 = vector.multi_reduction <maximumf>, %143, %cst_89 [2] : vector<2x8x8xf32> to vector<2x8xf32>
    %145 = vector.shape_cast %144 : vector<2x8xf32> to vector<2x8x1xf32>
    %146 = vector.broadcast %145 : vector<2x8x1xf32> to vector<2x8x8xf32>
    %147 = arith.subf %143, %146 : vector<2x8x8xf32>
    %148 = math.exp %147 : vector<2x8x8xf32>
    %cst_90 = arith.constant dense<0.000000e+00> : vector<2x8xf32>
    %149 = vector.multi_reduction <add>, %148, %cst_90 [2] : vector<2x8x8xf32> to vector<2x8xf32>
    %150 = vector.shape_cast %149 : vector<2x8xf32> to vector<2x8x1xf32>
    %151 = tpu.reciprocal %150 {approx = true} : vector<2x8x1xf32> -> vector<2x8x1xf32>
    %152 = vector.broadcast %151 : vector<2x8x1xf32> to vector<2x8x8xf32>
    %153 = arith.mulf %148, %152 : vector<2x8x8xf32>
    %154 = arith.truncf %153 : vector<2x8x8xf32> to vector<2x8x8xbf16>
    %155 = arith.truncf %134 : vector<2x8x8xf32> to vector<2x8x8xbf16>
    "tpu.trace_start"() <{level = 10 : i32, message = "bqk,bkd->bqd"}> : () -> ()
    %cst_91 = arith.constant dense<0.000000e+00> : vector<2x8x8xf32>
    %156 = tpu.matmul %154, %155, %cst_91 {dimension_numbers = #tpu.dot_dimension_numbers<[2], [1], [1], [2], [0, 0, 0, 1, 1, 2], [0], [0]>} : vector<2x8x8xbf16>, vector<2x8x8xbf16>, vector<2x8x8xf32> -> vector<2x8x8xf32>
    "tpu.trace_stop"() : () -> ()
    %157 = vector.shape_cast %156 : vector<2x8x8xf32> to vector<16x8xf32>
    %158 = arith.truncf %157 : vector<16x8xf32> to vector<16x8xbf16>
    %c2_92 = arith.constant 2 : index
    %c0_93 = arith.constant 0 : index
    %c0_94 = arith.constant 0 : index
    %159 = vector.load %arg9[%c2_92, %c0_93, %c0_94] : memref<4x8x32xbf16, #tpu.memory_space<vmem>>, vector<1x8x32xbf16>
    %160 = vector.shape_cast %159 : vector<1x8x32xbf16> to vector<8x32xbf16>
    %cst_95 = arith.constant dense<0.000000e+00> : vector<16x32xf32>
    %161 = tpu.matmul %158, %160, %cst_95 {dimension_numbers = #tpu.dot_dimension_numbers<[1], [0], [0], [1], [0, 0, 1, 1], [], []>} : vector<16x8xbf16>, vector<8x32xbf16>, vector<16x32xf32> -> vector<16x32xf32>
    %162 = arith.addf %110, %161 : vector<16x32xf32>
    %c3 = arith.constant 3 : index
    %c0_96 = arith.constant 0 : index
    %c0_97 = arith.constant 0 : index
    %163 = vector.load %arg3[%c3, %c0_96, %c0_97] : memref<4x32x8xbf16, #tpu.memory_space<vmem>>, vector<1x32x8xbf16>
    %164 = vector.shape_cast %163 : vector<1x32x8xbf16> to vector<32x8xbf16>
    %cst_98 = arith.constant dense<0.000000e+00> : vector<16x8xf32>
    %165 = tpu.matmul %2, %164, %cst_98 {dimension_numbers = #tpu.dot_dimension_numbers<[1], [0], [0], [1], [0, 0, 1, 1], [], []>} : vector<16x32xbf16>, vector<32x8xbf16>, vector<16x8xf32> -> vector<16x8xf32>
    %c3_99 = arith.constant 3 : index
    %c0_100 = arith.constant 0 : index
    %c0_101 = arith.constant 0 : index
    %166 = vector.load %arg6[%c3_99, %c0_100, %c0_101] : memref<4x1x8xf32, #tpu.memory_space<vmem>>, vector<1x1x8xf32>
    %167 = vector.shape_cast %166 : vector<1x1x8xf32> to vector<1x8xf32>
    %168 = vector.broadcast %167 : vector<1x8xf32> to vector<16x8xf32>
    %169 = arith.addf %165, %168 : vector<16x8xf32>
    %170 = vector.shape_cast %169 : vector<16x8xf32> to vector<2x8x8xf32>
    %c3_102 = arith.constant 3 : index
    %c0_103 = arith.constant 0 : index
    %c0_104 = arith.constant 0 : index
    %171 = vector.load %arg4[%c3_102, %c0_103, %c0_104] : memref<4x32x8xbf16, #tpu.memory_space<vmem>>, vector<1x32x8xbf16>
    %172 = vector.shape_cast %171 : vector<1x32x8xbf16> to vector<32x8xbf16>
    %cst_105 = arith.constant dense<0.000000e+00> : vector<16x8xf32>
    %173 = tpu.matmul %2, %172, %cst_105 {dimension_numbers = #tpu.dot_dimension_numbers<[1], [0], [0], [1], [0, 0, 1, 1], [], []>} : vector<16x32xbf16>, vector<32x8xbf16>, vector<16x8xf32> -> vector<16x8xf32>
    %c3_106 = arith.constant 3 : index
    %c0_107 = arith.constant 0 : index
    %c0_108 = arith.constant 0 : index
    %174 = vector.load %arg7[%c3_106, %c0_107, %c0_108] : memref<4x1x8xf32, #tpu.memory_space<vmem>>, vector<1x1x8xf32>
    %175 = vector.shape_cast %174 : vector<1x1x8xf32> to vector<1x8xf32>
    %176 = vector.broadcast %175 : vector<1x8xf32> to vector<16x8xf32>
    %177 = arith.addf %173, %176 : vector<16x8xf32>
    %178 = vector.shape_cast %177 : vector<16x8xf32> to vector<2x8x8xf32>
    %c3_109 = arith.constant 3 : index
    %c0_110 = arith.constant 0 : index
    %c0_111 = arith.constant 0 : index
    %179 = vector.load %arg5[%c3_109, %c0_110, %c0_111] : memref<4x32x8xbf16, #tpu.memory_space<vmem>>, vector<1x32x8xbf16>
    %180 = vector.shape_cast %179 : vector<1x32x8xbf16> to vector<32x8xbf16>
    %cst_112 = arith.constant dense<0.000000e+00> : vector<16x8xf32>
    %181 = tpu.matmul %2, %180, %cst_112 {dimension_numbers = #tpu.dot_dimension_numbers<[1], [0], [0], [1], [0, 0, 1, 1], [], []>} : vector<16x32xbf16>, vector<32x8xbf16>, vector<16x8xf32> -> vector<16x8xf32>
    %c3_113 = arith.constant 3 : index
    %c0_114 = arith.constant 0 : index
    %c0_115 = arith.constant 0 : index
    %182 = vector.load %arg8[%c3_113, %c0_114, %c0_115] : memref<4x1x8xf32, #tpu.memory_space<vmem>>, vector<1x1x8xf32>
    %183 = vector.shape_cast %182 : vector<1x1x8xf32> to vector<1x8xf32>
    %184 = vector.broadcast %183 : vector<1x8xf32> to vector<16x8xf32>
    %185 = arith.addf %181, %184 : vector<16x8xf32>
    %186 = vector.shape_cast %185 : vector<16x8xf32> to vector<2x8x8xf32>
    %187 = arith.truncf %170 : vector<2x8x8xf32> to vector<2x8x8xbf16>
    %188 = arith.truncf %178 : vector<2x8x8xf32> to vector<2x8x8xbf16>
    "tpu.trace_start"() <{level = 10 : i32, message = "bqd,bkd->bqk"}> : () -> ()
    %cst_116 = arith.constant dense<0.000000e+00> : vector<2x8x8xf32>
    %189 = tpu.matmul %187, %188, %cst_116 {dimension_numbers = #tpu.dot_dimension_numbers<[2], [2], [1], [1], [0, 0, 0, 1, 1, 1], [0], [0]>} : vector<2x8x8xbf16>, vector<2x8x8xbf16>, vector<2x8x8xf32> -> vector<2x8x8xf32>
    "tpu.trace_stop"() : () -> ()
    %cst_117 = arith.constant 0.353553385 : f32
    %190 = vector.broadcast %cst_117 : f32 to vector<2x8x8xf32>
    %191 = arith.mulf %189, %190 : vector<2x8x8xf32>
    %cst_118 = arith.constant -1.000000e+30 : f32
    %192 = vector.shape_cast %5 : vector<2x1x8xi1> to vector<2x1x8xi1>
    %193 = vector.broadcast %192 : vector<2x1x8xi1> to vector<2x8x8xi1>
    %194 = vector.broadcast %cst_118 : f32 to vector<2x8x8xf32>
    %195 = arith.select %193, %191, %194 : vector<2x8x8xi1>, vector<2x8x8xf32>
    %cst_119 = arith.constant dense<0xFF800000> : vector<2x8xf32>
    %196 = vector.multi_reduction <maximumf>, %195, %cst_119 [2] : vector<2x8x8xf32> to vector<2x8xf32>
    %197 = vector.shape_cast %196 : vector<2x8xf32> to vector<2x8x1xf32>
    %198 = vector.broadcast %197 : vector<2x8x1xf32> to vector<2x8x8xf32>
    %199 = arith.subf %195, %198 : vector<2x8x8xf32>
    %200 = math.exp %199 : vector<2x8x8xf32>
    %cst_120 = arith.constant dense<0.000000e+00> : vector<2x8xf32>
    %201 = vector.multi_reduction <add>, %200, %cst_120 [2] : vector<2x8x8xf32> to vector<2x8xf32>
    %202 = vector.shape_cast %201 : vector<2x8xf32> to vector<2x8x1xf32>
    %203 = tpu.reciprocal %202 {approx = true} : vector<2x8x1xf32> -> vector<2x8x1xf32>
    %204 = vector.broadcast %203 : vector<2x8x1xf32> to vector<2x8x8xf32>
    %205 = arith.mulf %200, %204 : vector<2x8x8xf32>
    %206 = arith.truncf %205 : vector<2x8x8xf32> to vector<2x8x8xbf16>
    %207 = arith.truncf %186 : vector<2x8x8xf32> to vector<2x8x8xbf16>
    "tpu.trace_start"() <{level = 10 : i32, message = "bqk,bkd->bqd"}> : () -> ()
    %cst_121 = arith.constant dense<0.000000e+00> : vector<2x8x8xf32>
    %208 = tpu.matmul %206, %207, %cst_121 {dimension_numbers = #tpu.dot_dimension_numbers<[2], [1], [1], [2], [0, 0, 0, 1, 1, 2], [0], [0]>} : vector<2x8x8xbf16>, vector<2x8x8xbf16>, vector<2x8x8xf32> -> vector<2x8x8xf32>
    "tpu.trace_stop"() : () -> ()
    %209 = vector.shape_cast %208 : vector<2x8x8xf32> to vector<16x8xf32>
    %210 = arith.truncf %209 : vector<16x8xf32> to vector<16x8xbf16>
    %c3_122 = arith.constant 3 : index
    %c0_123 = arith.constant 0 : index
    %c0_124 = arith.constant 0 : index
    %211 = vector.load %arg9[%c3_122, %c0_123, %c0_124] : memref<4x8x32xbf16, #tpu.memory_space<vmem>>, vector<1x8x32xbf16>
    %212 = vector.shape_cast %211 : vector<1x8x32xbf16> to vector<8x32xbf16>
    %cst_125 = arith.constant dense<0.000000e+00> : vector<16x32xf32>
    %213 = tpu.matmul %210, %212, %cst_125 {dimension_numbers = #tpu.dot_dimension_numbers<[1], [0], [0], [1], [0, 0, 1, 1], [], []>} : vector<16x8xbf16>, vector<8x32xbf16>, vector<16x32xf32> -> vector<16x32xf32>
    %214 = arith.addf %162, %213 : vector<16x32xf32>
    %c0_126 = arith.constant 0 : index
    %c0_127 = arith.constant 0 : index
    %215 = vector.load %arg10[%c0_126, %c0_127] : memref<1x32xf32, #tpu.memory_space<vmem>>, vector<1x32xf32>
    %216 = vector.broadcast %215 : vector<1x32xf32> to vector<16x32xf32>
    %217 = arith.addf %214, %216 : vector<16x32xf32>
    %218 = arith.addf %1, %217 : vector<16x32xf32>
    %c0_128 = arith.constant 0 : index
    %c0_129 = arith.constant 0 : index
    %219 = vector.load %arg15[%c0_128, %c0_129] : memref<1x32xf32, #tpu.memory_space<vmem>>, vector<1x32xf32>
    %c0_130 = arith.constant 0 : index
    %c0_131 = arith.constant 0 : index
    %220 = vector.load %arg16[%c0_130, %c0_131] : memref<1x32xf32, #tpu.memory_space<vmem>>, vector<1x32xf32>
    %cst_132 = arith.constant dense<0.000000e+00> : vector<16xf32>
    %221 = vector.multi_reduction <add>, %218, %cst_132 [1] : vector<16x32xf32> to vector<16xf32>
    %222 = vector.shape_cast %221 : vector<16xf32> to vector<16x1xf32>
    %cst_133 = arith.constant 3.200000e+01 : f32
    %223 = vector.broadcast %cst_133 : f32 to vector<16x1xf32>
    %224 = arith.divf %222, %223 : vector<16x1xf32>
    %225 = vector.broadcast %224 : vector<16x1xf32> to vector<16x32xf32>
    %226 = arith.subf %218, %225 : vector<16x32xf32>
    %227 = arith.mulf %226, %226 : vector<16x32xf32>
    %cst_134 = arith.constant dense<0.000000e+00> : vector<16xf32>
    %228 = vector.multi_reduction <add>, %227, %cst_134 [1] : vector<16x32xf32> to vector<16xf32>
    %229 = vector.shape_cast %228 : vector<16xf32> to vector<16x1xf32>
    %cst_135 = arith.constant 3.200000e+01 : f32
    %230 = vector.broadcast %cst_135 : f32 to vector<16x1xf32>
    %231 = arith.divf %229, %230 : vector<16x1xf32>
    %232 = vector.broadcast %224 : vector<16x1xf32> to vector<16x32xf32>
    %233 = arith.subf %218, %232 : vector<16x32xf32>
    %cst_136 = arith.constant 9.99999974E-6 : f32
    %234 = vector.broadcast %cst_136 : f32 to vector<16x1xf32>
    %235 = arith.addf %231, %234 : vector<16x1xf32>
    %236 = math.rsqrt %235 : vector<16x1xf32>
    %237 = vector.broadcast %236 : vector<16x1xf32> to vector<16x32xf32>
    %238 = arith.mulf %233, %237 : vector<16x32xf32>
    %239 = vector.broadcast %219 : vector<1x32xf32> to vector<16x32xf32>
    %240 = arith.mulf %238, %239 : vector<16x32xf32>
    %241 = vector.broadcast %220 : vector<1x32xf32> to vector<16x32xf32>
    %242 = arith.addf %240, %241 : vector<16x32xf32>
    %243 = arith.truncf %242 : vector<16x32xf32> to vector<16x32xbf16>
    %c0_137 = arith.constant 0 : index
    %c0_138 = arith.constant 0 : index
    %244 = vector.load %arg11[%c0_137, %c0_138] : memref<32x64xbf16, #tpu.memory_space<vmem>>, vector<32x64xbf16>
    %cst_139 = arith.constant dense<0.000000e+00> : vector<16x64xf32>
    %245 = tpu.matmul %243, %244, %cst_139 {dimension_numbers = #tpu.dot_dimension_numbers<[1], [0], [0], [1], [0, 0, 1, 1], [], []>} : vector<16x32xbf16>, vector<32x64xbf16>, vector<16x64xf32> -> vector<16x64xf32>
    %c0_140 = arith.constant 0 : index
    %c0_141 = arith.constant 0 : index
    %246 = vector.load %arg12[%c0_140, %c0_141] : memref<1x64xf32, #tpu.memory_space<vmem>>, vector<1x64xf32>
    %247 = vector.broadcast %246 : vector<1x64xf32> to vector<16x64xf32>
    %248 = arith.addf %245, %247 : vector<16x64xf32>
    %cst_142 = arith.constant 0.000000e+00 : f32
    %249 = vector.broadcast %cst_142 : f32 to vector<16x64xf32>
    %250 = arith.maximumf %248, %249 : vector<16x64xf32>
    %251 = arith.truncf %250 : vector<16x64xf32> to vector<16x64xbf16>
    %c0_143 = arith.constant 0 : index
    %c0_144 = arith.constant 0 : index
    %252 = vector.load %arg13[%c0_143, %c0_144] : memref<64x32xbf16, #tpu.memory_space<vmem>>, vector<64x32xbf16>
    %cst_145 = arith.constant dense<0.000000e+00> : vector<16x32xf32>
    %253 = tpu.matmul %251, %252, %cst_145 {dimension_numbers = #tpu.dot_dimension_numbers<[1], [0], [0], [1], [0, 0, 1, 1], [], []>} : vector<16x64xbf16>, vector<64x32xbf16>, vector<16x32xf32> -> vector<16x32xf32>
    %c0_146 = arith.constant 0 : index
    %c0_147 = arith.constant 0 : index
    %254 = vector.load %arg14[%c0_146, %c0_147] : memref<1x32xf32, #tpu.memory_space<vmem>>, vector<1x32xf32>
    %255 = vector.broadcast %254 : vector<1x32xf32> to vector<16x32xf32>
    %256 = arith.addf %253, %255 : vector<16x32xf32>
    %257 = arith.addf %242, %256 : vector<16x32xf32>
    %c0_148 = arith.constant 0 : index
    %c0_149 = arith.constant 0 : index
    %258 = vector.load %arg17[%c0_148, %c0_149] : memref<1x32xf32, #tpu.memory_space<vmem>>, vector<1x32xf32>
    %c0_150 = arith.constant 0 : index
    %c0_151 = arith.constant 0 : index
    %259 = vector.load %arg18[%c0_150, %c0_151] : memref<1x32xf32, #tpu.memory_space<vmem>>, vector<1x32xf32>
    %cst_152 = arith.constant dense<0.000000e+00> : vector<16xf32>
    %260 = vector.multi_reduction <add>, %257, %cst_152 [1] : vector<16x32xf32> to vector<16xf32>
    %261 = vector.shape_cast %260 : vector<16xf32> to vector<16x1xf32>
    %cst_153 = arith.constant 3.200000e+01 : f32
    %262 = vector.broadcast %cst_153 : f32 to vector<16x1xf32>
    %263 = arith.divf %261, %262 : vector<16x1xf32>
    %264 = vector.broadcast %263 : vector<16x1xf32> to vector<16x32xf32>
    %265 = arith.subf %257, %264 : vector<16x32xf32>
    %266 = arith.mulf %265, %265 : vector<16x32xf32>
    %cst_154 = arith.constant dense<0.000000e+00> : vector<16xf32>
    %267 = vector.multi_reduction <add>, %266, %cst_154 [1] : vector<16x32xf32> to vector<16xf32>
    %268 = vector.shape_cast %267 : vector<16xf32> to vector<16x1xf32>
    %cst_155 = arith.constant 3.200000e+01 : f32
    %269 = vector.broadcast %cst_155 : f32 to vector<16x1xf32>
    %270 = arith.divf %268, %269 : vector<16x1xf32>
    %271 = vector.broadcast %263 : vector<16x1xf32> to vector<16x32xf32>
    %272 = arith.subf %257, %271 : vector<16x32xf32>
    %cst_156 = arith.constant 9.99999974E-6 : f32
    %273 = vector.broadcast %cst_156 : f32 to vector<16x1xf32>
    %274 = arith.addf %270, %273 : vector<16x1xf32>
    %275 = math.rsqrt %274 : vector<16x1xf32>
    %276 = vector.broadcast %275 : vector<16x1xf32> to vector<16x32xf32>
    %277 = arith.mulf %272, %276 : vector<16x32xf32>
    %278 = vector.broadcast %258 : vector<1x32xf32> to vector<16x32xf32>
    %279 = arith.mulf %277, %278 : vector<16x32xf32>
    %280 = vector.broadcast %259 : vector<1x32xf32> to vector<16x32xf32>
    %281 = arith.addf %279, %280 : vector<16x32xf32>
    %282 = vector.shape_cast %281 : vector<16x32xf32> to vector<2x8x32xf32>
    %c0_157 = arith.constant 0 : index
    %c0_158 = arith.constant 0 : index
    %c0_159 = arith.constant 0 : index
    %283 = vector.load %arg21[%c0_157, %c0_158, %c0_159] : memref<2x8x32xf32, #tpu.memory_space<vmem>>, vector<2x8x32xf32>
    tpu.vector_store %arg21[%c0_157, %c0_158, %c0_159], %282 {strides = array<i32>} : memref<2x8x32xf32, #tpu.memory_space<vmem>>, vector<2x8x32xf32>,
    return
  }
  func.func @transform_0(%arg0: i32) -> (i32, i32, i32) {
    %c0_i32 = arith.constant 0 : i32
    %c0_i32_0 = arith.constant 0 : i32
    %c0_i32_1 = arith.constant 0 : i32
    %c0_i32_2 = arith.constant 0 : i32
    return %c0_i32, %c0_i32_0, %c0_i32_1 : i32, i32, i32
  }
  func.func @transform_1(%arg0: i32) -> (i32, i32, i32) {
    %c0_i32 = arith.constant 0 : i32
    %c0_i32_0 = arith.constant 0 : i32
    %c0_i32_1 = arith.constant 0 : i32
    %c0_i32_2 = arith.constant 0 : i32
    return %c0_i32, %c0_i32_0, %c0_i32_1 : i32, i32, i32
  }
  func.func @transform_2(%arg0: i32) -> (i32, i32, i32) {
    %c0_i32 = arith.constant 0 : i32
    %c0_i32_0 = arith.constant 0 : i32
    %c0_i32_1 = arith.constant 0 : i32
    %c0_i32_2 = arith.constant 0 : i32
    return %c0_i32, %c0_i32_0, %c0_i32_1 : i32, i32, i32
  }
  func.func @transform_3(%arg0: i32) -> (i32, i32, i32) {
    %c0_i32 = arith.constant 0 : i32
    %c0_i32_0 = arith.constant 0 : i32
    %c0_i32_1 = arith.constant 0 : i32
    %c0_i32_2 = arith.constant 0 : i32
    return %c0_i32, %c0_i32_0, %c0_i32_1 : i32, i32, i32
  }
  func.func @transform_4(%arg0: i32) -> (i32, i32, i32) {
    %c0_i32 = arith.constant 0 : i32
    %c0_i32_0 = arith.constant 0 : i32
    %c0_i32_1 = arith.constant 0 : i32
    %c0_i32_2 = arith.constant 0 : i32
    return %c0_i32, %c0_i32_0, %c0_i32_1 : i32, i32, i32
  }
  func.func @transform_5(%arg0: i32) -> (i32, i32, i32) {
    %c0_i32 = arith.constant 0 : i32
    %c0_i32_0 = arith.constant 0 : i32
    %c0_i32_1 = arith.constant 0 : i32
    %c0_i32_2 = arith.constant 0 : i32
    return %c0_i32, %c0_i32_0, %c0_i32_1 : i32, i32, i32
  }
  func.func @transform_6(%arg0: i32) -> (i32, i32, i32) {
    %c0_i32 = arith.constant 0 : i32
    %c0_i32_0 = arith.constant 0 : i32
    %c0_i32_1 = arith.constant 0 : i32
    %c0_i32_2 = arith.constant 0 : i32
    return %c0_i32, %c0_i32_0, %c0_i32_1 : i32, i32, i32
  }
  func.func @transform_7(%arg0: i32) -> (i32, i32, i32) {
    %c0_i32 = arith.constant 0 : i32
    %c0_i32_0 = arith.constant 0 : i32
    %c0_i32_1 = arith.constant 0 : i32
    %c0_i32_2 = arith.constant 0 : i32
    return %c0_i32, %c0_i32_0, %c0_i32_1 : i32, i32, i32
  }
  func.func @transform_8(%arg0: i32) -> (i32, i32, i32) {
    %c0_i32 = arith.constant 0 : i32
    %c0_i32_0 = arith.constant 0 : i32
    %c0_i32_1 = arith.constant 0 : i32
    %c0_i32_2 = arith.constant 0 : i32
    return %c0_i32, %c0_i32_0, %c0_i32_1 : i32, i32, i32
  }
  func.func @transform_9(%arg0: i32) -> (i32, i32) {
    %c0_i32 = arith.constant 0 : i32
    %c0_i32_0 = arith.constant 0 : i32
    %c0_i32_1 = arith.constant 0 : i32
    return %c0_i32, %c0_i32_0 : i32, i32
  }
  func.func @transform_10(%arg0: i32) -> (i32, i32) {
    %c0_i32 = arith.constant 0 : i32
    %c0_i32_0 = arith.constant 0 : i32
    %c0_i32_1 = arith.constant 0 : i32
    return %c0_i32, %c0_i32_0 : i32, i32
  }
  func.func @transform_11(%arg0: i32) -> (i32, i32) {
    %c0_i32 = arith.constant 0 : i32
    %c0_i32_0 = arith.constant 0 : i32
    %c0_i32_1 = arith.constant 0 : i32
    return %c0_i32, %c0_i32_0 : i32, i32
  }
  func.func @transform_12(%arg0: i32) -> (i32, i32) {
    %c0_i32 = arith.constant 0 : i32
    %c0_i32_0 = arith.constant 0 : i32
    %c0_i32_1 = arith.constant 0 : i32
    return %c0_i32, %c0_i32_0 : i32, i32
  }
  func.func @transform_13(%arg0: i32) -> (i32, i32) {
    %c0_i32 = arith.constant 0 : i32
    %c0_i32_0 = arith.constant 0 : i32
    %c0_i32_1 = arith.constant 0 : i32
    return %c0_i32, %c0_i32_0 : i32, i32
  }
  func.func @transform_14(%arg0: i32) -> (i32, i32) {
    %c0_i32 = arith.constant 0 : i32
    %c0_i32_0 = arith.constant 0 : i32
    %c0_i32_1 = arith.constant 0 : i32
    return %c0_i32, %c0_i32_0 : i32, i32
  }
  func.func @transform_15(%arg0: i32) -> (i32, i32) {
    %c0_i32 = arith.constant 0 : i32
    %c0_i32_0 = arith.constant 0 : i32
    %c0_i32_1 = arith.constant 0 : i32
    return %c0_i32, %c0_i32_0 : i32, i32
  }
  func.func @transform_16(%arg0: i32) -> (i32, i32) {
    %c0_i32 = arith.constant 0 : i32
    %c0_i32_0 = arith.constant 0 : i32
    %c0_i32_1 = arith.constant 0 : i32
    return %c0_i32, %c0_i32_0 : i32, i32
  }
  func.func @transform_17(%arg0: i32) -> (i32, i32) {
    %c0_i32 = arith.constant 0 : i32
    %c0_i32_0 = arith.constant 0 : i32
    %c0_i32_1 = arith.constant 0 : i32
    return %c0_i32, %c0_i32_0 : i32, i32
  }
  func.func @transform_18(%arg0: i32) -> (i32, i32) {
    %c0_i32 = arith.constant 0 : i32
    %c0_i32_0 = arith.constant 0 : i32
    %c0_i32_1 = arith.constant 0 : i32
    return %c0_i32, %c0_i32_0 : i32, i32
  }
  func.func @transform_19(%arg0: i32) -> (i32, i32) {
    %c0_i32 = arith.constant 0 : i32
    %c0_i32_0 = arith.constant 0 : i32
    %c0_i32_1 = arith.constant 0 : i32
    return %c0_i32, %c0_i32_0 : i32, i32
  }
  func.func @transform_20(%arg0: i32) -> (i32, i32, i32) {
    %c0_i32 = arith.constant 0 : i32
    %c0_i32_0 = arith.constant 0 : i32
    %c0_i32_1 = arith.constant 0 : i32
    %c0_i32_2 = arith.constant 0 : i32
    return %c0_i32, %c0_i32_0, %c0_i32_1 : i32, i32, i32
  }
}

module attributes {stable_mosaic.version = 11 : i64} {
  func.func @_encoder_block_kernel(%arg0: i32, %arg1: memref<2x8x32xf32, #tpu.memory_space<vmem>>, %arg2: memref<2x1x8xi32, #tpu.memory_space<vmem>>, %arg3: memref<4x32x8xbf16, #tpu.memory_space<vmem>>, %arg4: memref<4x32x8xbf16, #tpu.memory_space<vmem>>, %arg5: memref<4x32x8xbf16, #tpu.memory_space<vmem>>, %arg6: memref<4x1x8xf32, #tpu.memory_space<vmem>>, %arg7: memref<4x1x8xf32, #tpu.memory_space<vmem>>, %arg8: memref<4x1x8xf32, #tpu.memory_space<vmem>>, %arg9: memref<4x8x32xbf16, #tpu.memory_space<vmem>>, %arg10: memref<1x32xf32, #tpu.memory_space<vmem>>, %arg11: memref<32x64xbf16, #tpu.memory_space<vmem>>, %arg12: memref<1x64xf32, #tpu.memory_space<vmem>>, %arg13: memref<64x32xbf16, #tpu.memory_space<vmem>>, %arg14: memref<1x32xf32, #tpu.memory_space<vmem>>, %arg15: memref<1x32xf32, #tpu.memory_space<vmem>>, %arg16: memref<1x32xf32, #tpu.memory_space<vmem>>, %arg17: memref<1x32xf32, #tpu.memory_space<vmem>>, %arg18: memref<1x32xf32, #tpu.memory_space<vmem>>, %arg19: memref<1x32xf32, #tpu.memory_space<vmem>>, %arg20: memref<1x32xf32, #tpu.memory_space<vmem>>, %arg21: memref<2x8x32xf32, #tpu.memory_space<vmem>>) attributes {dimension_semantics = [#tpu.dimension_semantics<arbitrary>], iteration_bounds = array<i64: 1>, scalar_prefetch = 0 : i64, scratch_operands = 0 : i64, tpu.core_type = #tpu.core_type<tc>, window_params = [{pipeline_mode = #tpu.pipeline_mode<synchronous>, transform_indices = @transform_0, window_bounds = array<i64: 2, 8, 32>}, {pipeline_mode = #tpu.pipeline_mode<synchronous>, transform_indices = @transform_1, window_bounds = array<i64: 2, 1, 8>}, {pipeline_mode = #tpu.pipeline_mode<synchronous>, transform_indices = @transform_2, window_bounds = array<i64: 4, 32, 8>}, {pipeline_mode = #tpu.pipeline_mode<synchronous>, transform_indices = @transform_3, window_bounds = array<i64: 4, 32, 8>}, {pipeline_mode = #tpu.pipeline_mode<synchronous>, transform_indices = @transform_4, window_bounds = array<i64: 4, 32, 8>}, {pipeline_mode = #tpu.pipeline_mode<synchronous>, transform_indices = @transform_5, window_bounds = array<i64: 4, 1, 8>}, {pipeline_mode = #tpu.pipeline_mode<synchronous>, transform_indices = @transform_6, window_bounds = array<i64: 4, 1, 8>}, {pipeline_mode = #tpu.pipeline_mode<synchronous>, transform_indices = @transform_7, window_bounds = array<i64: 4, 1, 8>}, {pipeline_mode = #tpu.pipeline_mode<synchronous>, transform_indices = @transform_8, window_bounds = array<i64: 4, 8, 32>}, {pipeline_mode = #tpu.pipeline_mode<synchronous>, transform_indices = @transform_9, window_bounds = array<i64: 1, 32>}, {pipeline_mode = #tpu.pipeline_mode<synchronous>, transform_indices = @transform_10, window_bounds = array<i64: 32, 64>}, {pipeline_mode = #tpu.pipeline_mode<synchronous>, transform_indices = @transform_11, window_bounds = array<i64: 1, 64>}, {pipeline_mode = #tpu.pipeline_mode<synchronous>, transform_indices = @transform_12, window_bounds = array<i64: 64, 32>}, {pipeline_mode = #tpu.pipeline_mode<synchronous>, transform_indices = @transform_13, window_bounds = array<i64: 1, 32>}, {pipeline_mode = #tpu.pipeline_mode<synchronous>, transform_indices = @transform_14, window_bounds = array<i64: 1, 32>}, {pipeline_mode = #tpu.pipeline_mode<synchronous>, transform_indices = @transform_15, window_bounds = array<i64: 1, 32>}, {pipeline_mode = #tpu.pipeline_mode<synchronous>, transform_indices = @transform_16, window_bounds = array<i64: 1, 32>}, {pipeline_mode = #tpu.pipeline_mode<synchronous>, transform_indices = @transform_17, window_bounds = array<i64: 1, 32>}, {pipeline_mode = #tpu.pipeline_mode<synchronous>, transform_indices = @transform_18, window_bounds = array<i64: 1, 32>}, {pipeline_mode = #tpu.pipeline_mode<synchronous>, transform_indices = @transform_19, window_bounds = array<i64: 1, 32>}, {pipeline_mode = #tpu.pipeline_mode<synchronous>, transform_indices = @transform_20, window_bounds = array<i64: 2, 8, 32>}]} {
    %c0 = arith.constant 0 : index
    %c0_0 = arith.constant 0 : index
    %c0_1 = arith.constant 0 : index
    %0 = vector.load %arg1[%c0, %c0_0, %c0_1] : memref<2x8x32xf32, #tpu.memory_space<vmem>>, vector<2x8x32xf32>
    %1 = vector.shape_cast %0 : vector<2x8x32xf32> to vector<16x32xf32>
    %2 = arith.truncf %1 : vector<16x32xf32> to vector<16x32xbf16>
    %c0_2 = arith.constant 0 : index
    %c0_3 = arith.constant 0 : index
    %c0_4 = arith.constant 0 : index
    %3 = vector.load %arg2[%c0_2, %c0_3, %c0_4] : memref<2x1x8xi32, #tpu.memory_space<vmem>>, vector<2x1x8xi32>
    %c0_i32 = arith.constant 0 : i32
    %4 = vector.broadcast %c0_i32 : i32 to vector<2x1x8xi32>
    %5 = arith.cmpi ne, %3, %4 : vector<2x1x8xi32>
    %cst = arith.constant 0.000000e+00 : f32
    %6 = vector.broadcast %cst : f32 to vector<16x32xf32>
    %c0_5 = arith.constant 0 : index
    %c0_6 = arith.constant 0 : index
    %c0_7 = arith.constant 0 : index
    %7 = vector.load %arg3[%c0_5, %c0_6, %c0_7] : memref<4x32x8xbf16, #tpu.memory_space<vmem>>, vector<1x32x8xbf16>
    %8 = vector.shape_cast %7 : vector<1x32x8xbf16> to vector<32x8xbf16>
    %cst_8 = arith.constant dense<0.000000e+00> : vector<16x8xf32>
    %9 = tpu.matmul %2, %8, %cst_8 {dimension_numbers = #tpu.dot_dimension_numbers<[1], [0], [0], [1], [0, 0, 1, 1], [], []>} : vector<16x32xbf16>, vector<32x8xbf16>, vector<16x8xf32> -> vector<16x8xf32>
    %c0_9 = arith.constant 0 : index
    %c0_10 = arith.constant 0 : index
    %c0_11 = arith.constant 0 : index
    %10 = vector.load %arg6[%c0_9, %c0_10, %c0_11] : memref<4x1x8xf32, #tpu.memory_space<vmem>>, vector<1x1x8xf32>
    %11 = vector.shape_cast %10 : vector<1x1x8xf32> to vector<1x8xf32>
    %12 = vector.broadcast %11 : vector<1x8xf32> to vector<16x8xf32>
    %13 = arith.addf %9, %12 : vector<16x8xf32>
    %14 = vector.shape_cast %13 : vector<16x8xf32> to vector<2x8x8xf32>
    %c0_12 = arith.constant 0 : index
    %c0_13 = arith.constant 0 : index
    %c0_14 = arith.constant 0 : index
    %15 = vector.load %arg4[%c0_12, %c0_13, %c0_14] : memref<4x32x8xbf16, #tpu.memory_space<vmem>>, vector<1x32x8xbf16>
    %16 = vector.shape_cast %15 : vector<1x32x8xbf16> to vector<32x8xbf16>
    %cst_15 = arith.constant dense<0.000000e+00> : vector<16x8xf32>
    %17 = tpu.matmul %2, %16, %cst_15 {dimension_numbers = #tpu.dot_dimension_numbers<[1], [0], [0], [1], [0, 0, 1, 1], [], []>} : vector<16x32xbf16>, vector<32x8xbf16>, vector<16x8xf32> -> vector<16x8xf32>
    %c0_16 = arith.constant 0 : index
    %c0_17 = arith.constant 0 : index
    %c0_18 = arith.constant 0 : index
    %18 = vector.load %arg7[%c0_16, %c0_17, %c0_18] : memref<4x1x8xf32, #tpu.memory_space<vmem>>, vector<1x1x8xf32>
    %19 = vector.shape_cast %18 : vector<1x1x8xf32> to vector<1x8xf32>
    %20 = vector.broadcast %19 : vector<1x8xf32> to vector<16x8xf32>
    %21 = arith.addf %17, %20 : vector<16x8xf32>
    %22 = vector.shape_cast %21 : vector<16x8xf32> to vector<2x8x8xf32>
    %c0_19 = arith.constant 0 : index
    %c0_20 = arith.constant 0 : index
    %c0_21 = arith.constant 0 : index
    %23 = vector.load %arg5[%c0_19, %c0_20, %c0_21] : memref<4x32x8xbf16, #tpu.memory_space<vmem>>, vector<1x32x8xbf16>
    %24 = vector.shape_cast %23 : vector<1x32x8xbf16> to vector<32x8xbf16>
    %cst_22 = arith.constant dense<0.000000e+00> : vector<16x8xf32>
    %25 = tpu.matmul %2, %24, %cst_22 {dimension_numbers = #tpu.dot_dimension_numbers<[1], [0], [0], [1], [0, 0, 1, 1], [], []>} : vector<16x32xbf16>, vector<32x8xbf16>, vector<16x8xf32> -> vector<16x8xf32>
    %c0_23 = arith.constant 0 : index
    %c0_24 = arith.constant 0 : index
    %c0_25 = arith.constant 0 : index
    %26 = vector.load %arg8[%c0_23, %c0_24, %c0_25] : memref<4x1x8xf32, #tpu.memory_space<vmem>>, vector<1x1x8xf32>
    %27 = vector.shape_cast %26 : vector<1x1x8xf32> to vector<1x8xf32>
    %28 = vector.broadcast %27 : vector<1x8xf32> to vector<16x8xf32>
    %29 = arith.addf %25, %28 : vector<16x8xf32>
    %30 = vector.shape_cast %29 : vector<16x8xf32> to vector<2x8x8xf32>
    %31 = arith.truncf %14 : vector<2x8x8xf32> to vector<2x8x8xbf16>
    %32 = arith.truncf %22 : vector<2x8x8xf32> to vector<2x8x8xbf16>
    "tpu.trace_start"() <{level = 10 : i32, message = "bqd,bkd->bqk"}> : () -> ()
    %cst_26 = arith.constant dense<0.000000e+00> : vector<2x8x8xf32>
    %33 = tpu.matmul %31, %32, %cst_26 {dimension_numbers = #tpu.dot_dimension_numbers<[2], [2], [1], [1], [0, 0, 0, 1, 1, 1], [0], [0]>} : vector<2x8x8xbf16>, vector<2x8x8xbf16>, vector<2x8x8xf32> -> vector<2x8x8xf32>
    "tpu.trace_stop"() : () -> ()
    %cst_27 = arith.constant 0.353553385 : f32
    %34 = vector.broadcast %cst_27 : f32 to vector<2x8x8xf32>
    %35 = arith.mulf %33, %34 : vector<2x8x8xf32>
    %cst_28 = arith.constant -1.000000e+30 : f32
    %36 = vector.shape_cast %5 : vector<2x1x8xi1> to vector<2x1x8xi1>
    %37 = vector.broadcast %36 : vector<2x1x8xi1> to vector<2x8x8xi1>
    %38 = vector.broadcast %cst_28 : f32 to vector<2x8x8xf32>
    %39 = arith.select %37, %35, %38 : vector<2x8x8xi1>, vector<2x8x8xf32>
    %cst_29 = arith.constant dense<0xFF800000> : vector<2x8xf32>
    %40 = vector.multi_reduction <maximumf>, %39, %cst_29 [2] : vector<2x8x8xf32> to vector<2x8xf32>
    %41 = vector.shape_cast %40 : vector<2x8xf32> to vector<2x8x1xf32>
    %42 = vector.broadcast %41 : vector<2x8x1xf32> to vector<2x8x8xf32>
    %43 = arith.subf %39, %42 : vector<2x8x8xf32>
    %44 = math.exp %43 : vector<2x8x8xf32>
    %cst_30 = arith.constant dense<0.000000e+00> : vector<2x8xf32>
    %45 = vector.multi_reduction <add>, %44, %cst_30 [2] : vector<2x8x8xf32> to vector<2x8xf32>
    %46 = vector.shape_cast %45 : vector<2x8xf32> to vector<2x8x1xf32>
    %47 = tpu.reciprocal %46 {approx = true} : vector<2x8x1xf32> -> vector<2x8x1xf32>
    %48 = vector.broadcast %47 : vector<2x8x1xf32> to vector<2x8x8xf32>
    %49 = arith.mulf %44, %48 : vector<2x8x8xf32>
    %50 = arith.truncf %49 : vector<2x8x8xf32> to vector<2x8x8xbf16>
    %51 = arith.truncf %30 : vector<2x8x8xf32> to vector<2x8x8xbf16>
    "tpu.trace_start"() <{level = 10 : i32, message = "bqk,bkd->bqd"}> : () -> ()
    %cst_31 = arith.constant dense<0.000000e+00> : vector<2x8x8xf32>
    %52 = tpu.matmul %50, %51, %cst_31 {dimension_numbers = #tpu.dot_dimension_numbers<[2], [1], [1], [2], [0, 0, 0, 1, 1, 2], [0], [0]>} : vector<2x8x8xbf16>, vector<2x8x8xbf16>, vector<2x8x8xf32> -> vector<2x8x8xf32>
    "tpu.trace_stop"() : () -> ()
    %53 = vector.shape_cast %52 : vector<2x8x8xf32> to vector<16x8xf32>
    %54 = arith.truncf %53 : vector<16x8xf32> to vector<16x8xbf16>
    %c0_32 = arith.constant 0 : index
    %c0_33 = arith.constant 0 : index
    %c0_34 = arith.constant 0 : index
    %55 = vector.load %arg9[%c0_32, %c0_33, %c0_34] : memref<4x8x32xbf16, #tpu.memory_space<vmem>>, vector<1x8x32xbf16>
    %56 = vector.shape_cast %55 : vector<1x8x32xbf16> to vector<8x32xbf16>
    %cst_35 = arith.constant dense<0.000000e+00> : vector<16x32xf32>
    %57 = tpu.matmul %54, %56, %cst_35 {dimension_numbers = #tpu.dot_dimension_numbers<[1], [0], [0], [1], [0, 0, 1, 1], [], []>} : vector<16x8xbf16>, vector<8x32xbf16>, vector<16x32xf32> -> vector<16x32xf32>
    %58 = arith.addf %6, %57 : vector<16x32xf32>
    %c1 = arith.constant 1 : index
    %c0_36 = arith.constant 0 : index
    %c0_37 = arith.constant 0 : index
    %59 = vector.load %arg3[%c1, %c0_36, %c0_37] : memref<4x32x8xbf16, #tpu.memory_space<vmem>>, vector<1x32x8xbf16>
    %60 = vector.shape_cast %59 : vector<1x32x8xbf16> to vector<32x8xbf16>
    %cst_38 = arith.constant dense<0.000000e+00> : vector<16x8xf32>
    %61 = tpu.matmul %2, %60, %cst_38 {dimension_numbers = #tpu.dot_dimension_numbers<[1], [0], [0], [1], [0, 0, 1, 1], [], []>} : vector<16x32xbf16>, vector<32x8xbf16>, vector<16x8xf32> -> vector<16x8xf32>
    %c1_39 = arith.constant 1 : index
    %c0_40 = arith.constant 0 : index
    %c0_41 = arith.constant 0 : index
    %62 = vector.load %arg6[%c1_39, %c0_40, %c0_41] : memref<4x1x8xf32, #tpu.memory_space<vmem>>, vector<1x1x8xf32>
    %63 = vector.shape_cast %62 : vector<1x1x8xf32> to vector<1x8xf32>
    %64 = vector.broadcast %63 : vector<1x8xf32> to vector<16x8xf32>
    %65 = arith.addf %61, %64 : vector<16x8xf32>
    %66 = vector.shape_cast %65 : vector<16x8xf32> to vector<2x8x8xf32>
    %c1_42 = arith.constant 1 : index
    %c0_43 = arith.constant 0 : index
    %c0_44 = arith.constant 0 : index
    %67 = vector.load %arg4[%c1_42, %c0_43, %c0_44] : memref<4x32x8xbf16, #tpu.memory_space<vmem>>, vector<1x32x8xbf16>
    %68 = vector.shape_cast %67 : vector<1x32x8xbf16> to vector<32x8xbf16>
    %cst_45 = arith.constant dense<0.000000e+00> : vector<16x8xf32>
    %69 = tpu.matmul %2, %68, %cst_45 {dimension_numbers = #tpu.dot_dimension_numbers<[1], [0], [0], [1], [0, 0, 1, 1], [], []>} : vector<16x32xbf16>, vector<32x8xbf16>, vector<16x8xf32> -> vector<16x8xf32>
    %c1_46 = arith.constant 1 : index
    %c0_47 = arith.constant 0 : index
    %c0_48 = arith.constant 0 : index
    %70 = vector.load %arg7[%c1_46, %c0_47, %c0_48] : memref<4x1x8xf32, #tpu.memory_space<vmem>>, vector<1x1x8xf32>
    %71 = vector.shape_cast %70 : vector<1x1x8xf32> to vector<1x8xf32>
    %72 = vector.broadcast %71 : vector<1x8xf32> to vector<16x8xf32>
    %73 = arith.addf %69, %72 : vector<16x8xf32>
    %74 = vector.shape_cast %73 : vector<16x8xf32> to vector<2x8x8xf32>
    %c1_49 = arith.constant 1 : index
    %c0_50 = arith.constant 0 : index
    %c0_51 = arith.constant 0 : index
    %75 = vector.load %arg5[%c1_49, %c0_50, %c0_51] : memref<4x32x8xbf16, #tpu.memory_space<vmem>>, vector<1x32x8xbf16>
    %76 = vector.shape_cast %75 : vector<1x32x8xbf16> to vector<32x8xbf16>
    %cst_52 = arith.constant dense<0.000000e+00> : vector<16x8xf32>
    %77 = tpu.matmul %2, %76, %cst_52 {dimension_numbers = #tpu.dot_dimension_numbers<[1], [0], [0], [1], [0, 0, 1, 1], [], []>} : vector<16x32xbf16>, vector<32x8xbf16>, vector<16x8xf32> -> vector<16x8xf32>
    %c1_53 = arith.constant 1 : index
    %c0_54 = arith.constant 0 : index
    %c0_55 = arith.constant 0 : index
    %78 = vector.load %arg8[%c1_53, %c0_54, %c0_55] : memref<4x1x8xf32, #tpu.memory_space<vmem>>, vector<1x1x8xf32>
    %79 = vector.shape_cast %78 : vector<1x1x8xf32> to vector<1x8xf32>
    %80 = vector.broadcast %79 : vector<1x8xf32> to vector<16x8xf32>
    %81 = arith.addf %77, %80 : vector<16x8xf32>
    %82 = vector.shape_cast %81 : vector<16x8xf32> to vector<2x8x8xf32>
    %83 = arith.truncf %66 : vector<2x8x8xf32> to vector<2x8x8xbf16>
    %84 = arith.truncf %74 : vector<2x8x8xf32> to vector<2x8x8xbf16>
    "tpu.trace_start"() <{level = 10 : i32, message = "bqd,bkd->bqk"}> : () -> ()
    %cst_56 = arith.constant dense<0.000000e+00> : vector<2x8x8xf32>
    %85 = tpu.matmul %83, %84, %cst_56 {dimension_numbers = #tpu.dot_dimension_numbers<[2], [2], [1], [1], [0, 0, 0, 1, 1, 1], [0], [0]>} : vector<2x8x8xbf16>, vector<2x8x8xbf16>, vector<2x8x8xf32> -> vector<2x8x8xf32>
    "tpu.trace_stop"() : () -> ()
    %cst_57 = arith.constant 0.353553385 : f32
    %86 = vector.broadcast %cst_57 : f32 to vector<2x8x8xf32>
    %87 = arith.mulf %85, %86 : vector<2x8x8xf32>
    %cst_58 = arith.constant -1.000000e+30 : f32
    %88 = vector.shape_cast %5 : vector<2x1x8xi1> to vector<2x1x8xi1>
    %89 = vector.broadcast %88 : vector<2x1x8xi1> to vector<2x8x8xi1>
    %90 = vector.broadcast %cst_58 : f32 to vector<2x8x8xf32>
    %91 = arith.select %89, %87, %90 : vector<2x8x8xi1>, vector<2x8x8xf32>
    %cst_59 = arith.constant dense<0xFF800000> : vector<2x8xf32>
    %92 = vector.multi_reduction <maximumf>, %91, %cst_59 [2] : vector<2x8x8xf32> to vector<2x8xf32>
    %93 = vector.shape_cast %92 : vector<2x8xf32> to vector<2x8x1xf32>
    %94 = vector.broadcast %93 : vector<2x8x1xf32> to vector<2x8x8xf32>
    %95 = arith.subf %91, %94 : vector<2x8x8xf32>
    %96 = math.exp %95 : vector<2x8x8xf32>
    %cst_60 = arith.constant dense<0.000000e+00> : vector<2x8xf32>
    %97 = vector.multi_reduction <add>, %96, %cst_60 [2] : vector<2x8x8xf32> to vector<2x8xf32>
    %98 = vector.shape_cast %97 : vector<2x8xf32> to vector<2x8x1xf32>
    %99 = tpu.reciprocal %98 {approx = true} : vector<2x8x1xf32> -> vector<2x8x1xf32>
    %100 = vector.broadcast %99 : vector<2x8x1xf32> to vector<2x8x8xf32>
    %101 = arith.mulf %96, %100 : vector<2x8x8xf32>
    %102 = arith.truncf %101 : vector<2x8x8xf32> to vector<2x8x8xbf16>
    %103 = arith.truncf %82 : vector<2x8x8xf32> to vector<2x8x8xbf16>
    "tpu.trace_start"() <{level = 10 : i32, message = "bqk,bkd->bqd"}> : () -> ()
    %cst_61 = arith.constant dense<0.000000e+00> : vector<2x8x8xf32>
    %104 = tpu.matmul %102, %103, %cst_61 {dimension_numbers = #tpu.dot_dimension_numbers<[2], [1], [1], [2], [0, 0, 0, 1, 1, 2], [0], [0]>} : vector<2x8x8xbf16>, vector<2x8x8xbf16>, vector<2x8x8xf32> -> vector<2x8x8xf32>
    "tpu.trace_stop"() : () -> ()
    %105 = vector.shape_cast %104 : vector<2x8x8xf32> to vector<16x8xf32>
    %106 = arith.truncf %105 : vector<16x8xf32> to vector<16x8xbf16>
    %c1_62 = arith.constant 1 : index
    %c0_63 = arith.constant 0 : index
    %c0_64 = arith.constant 0 : index
    %107 = vector.load %arg9[%c1_62, %c0_63, %c0_64] : memref<4x8x32xbf16, #tpu.memory_space<vmem>>, vector<1x8x32xbf16>
    %108 = vector.shape_cast %107 : vector<1x8x32xbf16> to vector<8x32xbf16>
    %cst_65 = arith.constant dense<0.000000e+00> : vector<16x32xf32>
    %109 = tpu.matmul %106, %108, %cst_65 {dimension_numbers = #tpu.dot_dimension_numbers<[1], [0], [0], [1], [0, 0, 1, 1], [], []>} : vector<16x8xbf16>, vector<8x32xbf16>, vector<16x32xf32> -> vector<16x32xf32>
    %110 = arith.addf %58, %109 : vector<16x32xf32>
    %c2 = arith.constant 2 : index
    %c0_66 = arith.constant 0 : index
    %c0_67 = arith.constant 0 : index
    %111 = vector.load %arg3[%c2, %c0_66, %c0_67] : memref<4x32x8xbf16, #tpu.memory_space<vmem>>, vector<1x32x8xbf16>
    %112 = vector.shape_cast %111 : vector<1x32x8xbf16> to vector<32x8xbf16>
    %cst_68 = arith.constant dense<0.000000e+00> : vector<16x8xf32>
    %113 = tpu.matmul %2, %112, %cst_68 {dimension_numbers = #tpu.dot_dimension_numbers<[1], [0], [0], [1], [0, 0, 1, 1], [], []>} : vector<16x32xbf16>, vector<32x8xbf16>, vector<16x8xf32> -> vector<16x8xf32>
    %c2_69 = arith.constant 2 : index
    %c0_70 = arith.constant 0 : index
    %c0_71 = arith.constant 0 : index
    %114 = vector.load %arg6[%c2_69, %c0_70, %c0_71] : memref<4x1x8xf32, #tpu.memory_space<vmem>>, vector<1x1x8xf32>
    %115 = vector.shape_cast %114 : vector<1x1x8xf32> to vector<1x8xf32>
    %116 = vector.broadcast %115 : vector<1x8xf32> to vector<16x8xf32>
    %117 = arith.addf %113, %116 : vector<16x8xf32>
    %118 = vector.shape_cast %117 : vector<16x8xf32> to vector<2x8x8xf32>
    %c2_72 = arith.constant 2 : index
    %c0_73 = arith.constant 0 : index
    %c0_74 = arith.constant 0 : index
    %119 = vector.load %arg4[%c2_72, %c0_73, %c0_74] : memref<4x32x8xbf16, #tpu.memory_space<vmem>>, vector<1x32x8xbf16>
    %120 = vector.shape_cast %119 : vector<1x32x8xbf16> to vector<32x8xbf16>
    %cst_75 = arith.constant dense<0.000000e+00> : vector<16x8xf32>
    %121 = tpu.matmul %2, %120, %cst_75 {dimension_numbers = #tpu.dot_dimension_numbers<[1], [0], [0], [1], [0, 0, 1, 1], [], []>} : vector<16x32xbf16>, vector<32x8xbf16>, vector<16x8xf32> -> vector<16x8xf32>
    %c2_76 = arith.constant 2 : index
    %c0_77 = arith.constant 0 : index
    %c0_78 = arith.constant 0 : index
    %122 = vector.load %arg7[%c2_76, %c0_77, %c0_78] : memref<4x1x8xf32, #tpu.memory_space<vmem>>, vector<1x1x8xf32>
    %123 = vector.shape_cast %122 : vector<1x1x8xf32> to vector<1x8xf32>
    %124 = vector.broadcast %123 : vector<1x8xf32> to vector<16x8xf32>
    %125 = arith.addf %121, %124 : vector<16x8xf32>
    %126 = vector.shape_cast %125 : vector<16x8xf32> to vector<2x8x8xf32>
    %c2_79 = arith.constant 2 : index
    %c0_80 = arith.constant 0 : index
    %c0_81 = arith.constant 0 : index
    %127 = vector.load %arg5[%c2_79, %c0_80, %c0_81] : memref<4x32x8xbf16, #tpu.memory_space<vmem>>, vector<1x32x8xbf16>
    %128 = vector.shape_cast %127 : vector<1x32x8xbf16> to vector<32x8xbf16>
    %cst_82 = arith.constant dense<0.000000e+00> : vector<16x8xf32>
    %129 = tpu.matmul %2, %128, %cst_82 {dimension_numbers = #tpu.dot_dimension_numbers<[1], [0], [0], [1], [0, 0, 1, 1], [], []>} : vector<16x32xbf16>, vector<32x8xbf16>, vector<16x8xf32> -> vector<16x8xf32>
    %c2_83 = arith.constant 2 : index
    %c0_84 = arith.constant 0 : index
    %c0_85 = arith.constant 0 : index
    %130 = vector.load %arg8[%c2_83, %c0_84, %c0_85] : memref<4x1x8xf32, #tpu.memory_space<vmem>>, vector<1x1x8xf32>
    %131 = vector.shape_cast %130 : vector<1x1x8xf32> to vector<1x8xf32>
    %132 = vector.broadcast %131 : vector<1x8xf32> to vector<16x8xf32>
    %133 = arith.addf %129, %132 : vector<16x8xf32>
    %134 = vector.shape_cast %133 : vector<16x8xf32> to vector<2x8x8xf32>
    %135 = arith.truncf %118 : vector<2x8x8xf32> to vector<2x8x8xbf16>
    %136 = arith.truncf %126 : vector<2x8x8xf32> to vector<2x8x8xbf16>
    "tpu.trace_start"() <{level = 10 : i32, message = "bqd,bkd->bqk"}> : () -> ()
    %cst_86 = arith.constant dense<0.000000e+00> : vector<2x8x8xf32>
    %137 = tpu.matmul %135, %136, %cst_86 {dimension_numbers = #tpu.dot_dimension_numbers<[2], [2], [1], [1], [0, 0, 0, 1, 1, 1], [0], [0]>} : vector<2x8x8xbf16>, vector<2x8x8xbf16>, vector<2x8x8xf32> -> vector<2x8x8xf32>
    "tpu.trace_stop"() : () -> ()
    %cst_87 = arith.constant 0.353553385 : f32
    %138 = vector.broadcast %cst_87 : f32 to vector<2x8x8xf32>
    %139 = arith.mulf %137, %138 : vector<2x8x8xf32>
    %cst_88 = arith.constant -1.000000e+30 : f32
    %140 = vector.shape_cast %5 : vector<2x1x8xi1> to vector<2x1x8xi1>
    %141 = vector.broadcast %140 : vector<2x1x8xi1> to vector<2x8x8xi1>
    %142 = vector.broadcast %cst_88 : f32 to vector<2x8x8xf32>
    %143 = arith.select %141, %139, %142 : vector<2x8x8xi1>, vector<2x8x8xf32>
    %cst_89 = arith.constant dense<0xFF800000> : vector<2x8xf32>
    %144 = vector.multi_reduction <maximumf>, %143, %cst_89 [2] : vector<2x8x8xf32> to vector<2x8xf32>
    %145 = vector.shape_cast %144 : vector<2x8xf32> to vector<2x8x1xf32>
    %146 = vector.broadcast %145 : vector<2x8x1xf32> to vector<2x8x8xf32>
    %147 = arith.subf %143, %146 : vector<2x8x8xf32>
    %148 = math.exp %147 : vector<2x8x8xf32>
    %cst_90 = arith.constant dense<0.000000e+00> : vector<2x8xf32>
    %149 = vector.multi_reduction <add>, %148, %cst_90 [2] : vector<2x8x8xf32> to vector<2x8xf32>
    %150 = vector.shape_cast %149 : vector<2x8xf32> to vector<2x8x1xf32>
    %151 = tpu.reciprocal %150 {approx = true} : vector<2x8x1xf32> -> vector<2x8x1xf32>
    %152 = vector.broadcast %151 : vector<2x8x1xf32> to vector<2x8x8xf32>
    %153 = arith.mulf %148, %152 : vector<2x8x8xf32>
    %154 = arith.truncf %153 : vector<2x8x8xf32> to vector<2x8x8xbf16>
    %155 = arith.truncf %134 : vector<2x8x8xf32> to vector<2x8x8xbf16>
    "tpu.trace_start"() <{level = 10 : i32, message = "bqk,bkd->bqd"}> : () -> ()
    %cst_91 = arith.constant dense<0.000000e+00> : vector<2x8x8xf32>
    %156 = tpu.matmul %154, %155, %cst_91 {dimension_numbers = #tpu.dot_dimension_numbers<[2], [1], [1], [2], [0, 0, 0, 1, 1, 2], [0], [0]>} : vector<2x8x8xbf16>, vector<2x8x8xbf16>, vector<2x8x8xf32> -> vector<2x8x8xf32>
    "tpu.trace_stop"() : () -> ()
    %157 = vector.shape_cast %156 : vector<2x8x8xf32> to vector<16x8xf32>
    %158 = arith.truncf %157 : vector<16x8xf32> to vector<16x8xbf16>
    %c2_92 = arith.constant 2 : index
    %c0_93 = arith.constant 0 : index
    %c0_94 = arith.constant 0 : index
    %159 = vector.load %arg9[%c2_92, %c0_93, %c0_94] : memref<4x8x32xbf16, #tpu.memory_space<vmem>>, vector<1x8x32xbf16>
    %160 = vector.shape_cast %159 : vector<1x8x32xbf16> to vector<8x32xbf16>
    %cst_95 = arith.constant dense<0.000000e+00> : vector<16x32xf32>
    %161 = tpu.matmul %158, %160, %cst_95 {dimension_numbers = #tpu.dot_dimension_numbers<[1], [0], [0], [1], [0, 0, 1, 1], [], []>} : vector<16x8xbf16>, vector<8x32xbf16>, vector<16x32xf32> -> vector<16x32xf32>
    %162 = arith.addf %110, %161 : vector<16x32xf32>
    %c3 = arith.constant 3 : index
    %c0_96 = arith.constant 0 : index
    %c0_97 = arith.constant 0 : index
    %163 = vector.load %arg3[%c3, %c0_96, %c0_97] : memref<4x32x8xbf16, #tpu.memory_space<vmem>>, vector<1x32x8xbf16>
    %164 = vector.shape_cast %163 : vector<1x32x8xbf16> to vector<32x8xbf16>
    %cst_98 = arith.constant dense<0.000000e+00> : vector<16x8xf32>
    %165 = tpu.matmul %2, %164, %cst_98 {dimension_numbers = #tpu.dot_dimension_numbers<[1], [0], [0], [1], [0, 0, 1, 1], [], []>} : vector<16x32xbf16>, vector<32x8xbf16>, vector<16x8xf32> -> vector<16x8xf32>
    %c3_99 = arith.constant 3 : index
    %c0_100 = arith.constant 0 : index
    %c0_101 = arith.constant 0 : index
    %166 = vector.load %arg6[%c3_99, %c0_100, %c0_101] : memref<4x1x8xf32, #tpu.memory_space<vmem>>, vector<1x1x8xf32>
    %167 = vector.shape_cast %166 : vector<1x1x8xf32> to vector<1x8xf32>
    %168 = vector.broadcast %167 : vector<1x8xf32> to vector<16x8xf32>
    %169 = arith.addf %165, %168 : vector<16x8xf32>
    %170 = vector.shape_cast %169 : vector<16x8xf32> to vector<2x8x8xf32>
    %c3_102 = arith.constant 3 : index
    %c0_103 = arith.constant 0 : index
    %c0_104 = arith.constant 0 : index
    %171 = vector.load %arg4[%c3_102, %c0_103, %c0_104] : memref<4x32x8xbf16, #tpu.memory_space<vmem>>, vector<1x32x8xbf16>
    %172 = vector.shape_cast %171 : vector<1x32x8xbf16> to vector<32x8xbf16>
    %cst_105 = arith.constant dense<0.000000e+00> : vector<16x8xf32>
    %173 = tpu.matmul %2, %172, %cst_105 {dimension_numbers = #tpu.dot_dimension_numbers<[1], [0], [0], [1], [0, 0, 1, 1], [], []>} : vector<16x32xbf16>, vector<32x8xbf16>, vector<16x8xf32> -> vector<16x8xf32>
    %c3_106 = arith.constant 3 : index
    %c0_107 = arith.constant 0 : index
    %c0_108 = arith.constant 0 : index
    %174 = vector.load %arg7[%c3_106, %c0_107, %c0_108] : memref<4x1x8xf32, #tpu.memory_space<vmem>>, vector<1x1x8xf32>
    %175 = vector.shape_cast %174 : vector<1x1x8xf32> to vector<1x8xf32>
    %176 = vector.broadcast %175 : vector<1x8xf32> to vector<16x8xf32>
    %177 = arith.addf %173, %176 : vector<16x8xf32>
    %178 = vector.shape_cast %177 : vector<16x8xf32> to vector<2x8x8xf32>
    %c3_109 = arith.constant 3 : index
    %c0_110 = arith.constant 0 : index
    %c0_111 = arith.constant 0 : index
    %179 = vector.load %arg5[%c3_109, %c0_110, %c0_111] : memref<4x32x8xbf16, #tpu.memory_space<vmem>>, vector<1x32x8xbf16>
    %180 = vector.shape_cast %179 : vector<1x32x8xbf16> to vector<32x8xbf16>
    %cst_112 = arith.constant dense<0.000000e+00> : vector<16x8xf32>
    %181 = tpu.matmul %2, %180, %cst_112 {dimension_numbers = #tpu.dot_dimension_numbers<[1], [0], [0], [1], [0, 0, 1, 1], [], []>} : vector<16x32xbf16>, vector<32x8xbf16>, vector<16x8xf32> -> vector<16x8xf32>
    %c3_113 = arith.constant 3 : index
    %c0_114 = arith.constant 0 : index
    %c0_115 = arith.constant 0 : index
    %182 = vector.load %arg8[%c3_113, %c0_114, %c0_115] : memref<4x1x8xf32, #tpu.memory_space<vmem>>, vector<1x1x8xf32>
    %183 = vector.shape_cast %182 : vector<1x1x8xf32> to vector<1x8xf32>
    %184 = vector.broadcast %183 : vector<1x8xf32> to vector<16x8xf32>
    %185 = arith.addf %181, %184 : vector<16x8xf32>
    %186 = vector.shape_cast %185 : vector<16x8xf32> to vector<2x8x8xf32>
    %187 = arith.truncf %170 : vector<2x8x8xf32> to vector<2x8x8xbf16>
    %188 = arith.truncf %178 : vector<2x8x8xf32> to vector<2x8x8xbf16>
    "tpu.trace_start"() <{level = 10 : i32, message = "bqd,bkd->bqk"}> : () -> ()
    %cst_116 = arith.constant dense<0.000000e+00> : vector<2x8x8xf32>
    %189 = tpu.matmul %187, %188, %cst_116 {dimension_numbers = #tpu.dot_dimension_numbers<[2], [2], [1], [1], [0, 0, 0, 1, 1, 1], [0], [0]>} : vector<2x8x8xbf16>, vector<2x8x8xbf16>, vector<2x8x8xf32> -> vector<2x8x8xf32>
    "tpu.trace_stop"() : () -> ()
    %cst_117 = arith.constant 0.353553385 : f32
    %190 = vector.broadcast %cst_117 : f32 to vector<2x8x8xf32>
    %191 = arith.mulf %189, %190 : vector<2x8x8xf32>
    %cst_118 = arith.constant -1.000000e+30 : f32
    %192 = vector.shape_cast %5 : vector<2x1x8xi1> to vector<2x1x8xi1>
    %193 = vector.broadcast %192 : vector<2x1x8xi1> to vector<2x8x8xi1>
    %194 = vector.broadcast %cst_118 : f32 to vector<2x8x8xf32>
    %195 = arith.select %193, %191, %194 : vector<2x8x8xi1>, vector<2x8x8xf32>
    %cst_119 = arith.constant dense<0xFF800000> : vector<2x8xf32>
    %196 = vector.multi_reduction <maximumf>, %195, %cst_119 [2] : vector<2x8x8xf32> to vector<2x8xf32>
    %197 = vector.shape_cast %196 : vector<2x8xf32> to vector<2x8x1xf32>
    %198 = vector.broadcast %197 : vector<2x8x1xf32> to vector<2x8x8xf32>
    %199 = arith.subf %195, %198 : vector<2x8x8xf32>
    %200 = math.exp %199 : vector<2x8x8xf32>
    %cst_120 = arith.constant dense<0.000000e+00> : vector<2x8xf32>
    %201 = vector.multi_reduction <add>, %200, %cst_120 [2] : vector<2x8x8xf32> to vector<2x8xf32>
    %202 = vector.shape_cast %201 : vector<2x8xf32> to vector<2x8x1xf32>
    %203 = tpu.reciprocal %202 {approx = true} : vector<2x8x1xf32> -> vector<2x8x1xf32>
    %204 = vector.broadcast %203 : vector<2x8x1xf32> to vector<2x8x8xf32>
    %205 = arith.mulf %200, %204 : vector<2x8x8xf32>
    %206 = arith.truncf %205 : vector<2x8x8xf32> to vector<2x8x8xbf16>
    %207 = arith.truncf %186 : vector<2x8x8xf32> to vector<2x8x8xbf16>
    "tpu.trace_start"() <{level = 10 : i32, message = "bqk,bkd->bqd"}> : () -> ()
    %cst_121 = arith.constant dense<0.000000e+00> : vector<2x8x8xf32>
    %208 = tpu.matmul %206, %207, %cst_121 {dimension_numbers = #tpu.dot_dimension_numbers<[2], [1], [1], [2], [0, 0, 0, 1, 1, 2], [0], [0]>} : vector<2x8x8xbf16>, vector<2x8x8xbf16>, vector<2x8x8xf32> -> vector<2x8x8xf32>
    "tpu.trace_stop"() : () -> ()
    %209 = vector.shape_cast %208 : vector<2x8x8xf32> to vector<16x8xf32>
    %210 = arith.truncf %209 : vector<16x8xf32> to vector<16x8xbf16>
    %c3_122 = arith.constant 3 : index
    %c0_123 = arith.constant 0 : index
    %c0_124 = arith.constant 0 : index
    %211 = vector.load %arg9[%c3_122, %c0_123, %c0_124] : memref<4x8x32xbf16, #tpu.memory_space<vmem>>, vector<1x8x32xbf16>
    %212 = vector.shape_cast %211 : vector<1x8x32xbf16> to vector<8x32xbf16>
    %cst_125 = arith.constant dense<0.000000e+00> : vector<16x32xf32>
    %213 = tpu.matmul %210, %212, %cst_125 {dimension_numbers = #tpu.dot_dimension_numbers<[1], [0], [0], [1], [0, 0, 1, 1], [], []>} : vector<16x8xbf16>, vector<8x32xbf16>, vector<16x32xf32> -> vector<16x32xf32>
    %214 = arith.addf %162, %213 : vector<16x32xf32>
    %c0_126 = arith.constant 0 : index
    %c0_127 = arith.constant 0 : index
    %215 = vector.load %arg10[%c0_126, %c0_127] : memref<1x32xf32, #tpu.memory_space<vmem>>, vector<1x32xf32>
    %216 = vector.broadcast %215 : vector<1x32xf32> to vector<16x32xf32>
    %217 = arith.addf %214, %216 : vector<16x32xf32>
    %218 = arith.addf %1, %217 : vector<16x32xf32>
    %c0_128 = arith.constant 0 : index
    %c0_129 = arith.constant 0 : index
    %219 = vector.load %arg15[%c0_128, %c0_129] : memref<1x32xf32, #tpu.memory_space<vmem>>, vector<1x32xf32>
    %c0_130 = arith.constant 0 : index
    %c0_131 = arith.constant 0 : index
    %220 = vector.load %arg16[%c0_130, %c0_131] : memref<1x32xf32, #tpu.memory_space<vmem>>, vector<1x32xf32>
    %cst_132 = arith.constant dense<0.000000e+00> : vector<16xf32>
    %221 = vector.multi_reduction <add>, %218, %cst_132 [1] : vector<16x32xf32> to vector<16xf32>
    %222 = vector.shape_cast %221 : vector<16xf32> to vector<16x1xf32>
    %cst_133 = arith.constant 3.200000e+01 : f32
    %223 = vector.broadcast %cst_133 : f32 to vector<16x1xf32>
    %224 = arith.divf %222, %223 : vector<16x1xf32>
    %225 = vector.broadcast %224 : vector<16x1xf32> to vector<16x32xf32>
    %226 = arith.subf %218, %225 : vector<16x32xf32>
    %227 = arith.mulf %226, %226 : vector<16x32xf32>
    %cst_134 = arith.constant dense<0.000000e+00> : vector<16xf32>
    %228 = vector.multi_reduction <add>, %227, %cst_134 [1] : vector<16x32xf32> to vector<16xf32>
    %229 = vector.shape_cast %228 : vector<16xf32> to vector<16x1xf32>
    %cst_135 = arith.constant 3.200000e+01 : f32
    %230 = vector.broadcast %cst_135 : f32 to vector<16x1xf32>
    %231 = arith.divf %229, %230 : vector<16x1xf32>
    %232 = vector.broadcast %224 : vector<16x1xf32> to vector<16x32xf32>
    %233 = arith.subf %218, %232 : vector<16x32xf32>
    %cst_136 = arith.constant 9.99999974E-6 : f32
    %234 = vector.broadcast %cst_136 : f32 to vector<16x1xf32>
    %235 = arith.addf %231, %234 : vector<16x1xf32>
    %236 = math.rsqrt %235 : vector<16x1xf32>
    %237 = vector.broadcast %236 : vector<16x1xf32> to vector<16x32xf32>
    %238 = arith.mulf %233, %237 : vector<16x32xf32>
    %239 = vector.broadcast %219 : vector<1x32xf32> to vector<16x32xf32>
    %240 = arith.mulf %238, %239 : vector<16x32xf32>
    %241 = vector.broadcast %220 : vector<1x32xf32> to vector<16x32xf32>
    %242 = arith.addf %240, %241 : vector<16x32xf32>
    %243 = arith.truncf %242 : vector<16x32xf32> to vector<16x32xbf16>
    %c0_137 = arith.constant 0 : index
    %c0_138 = arith.constant 0 : index
    %244 = vector.load %arg11[%c0_137, %c0_138] : memref<32x64xbf16, #tpu.memory_space<vmem>>, vector<32x64xbf16>
    %cst_139 = arith.constant dense<0.000000e+00> : vector<16x64xf32>
    %245 = tpu.matmul %243, %244, %cst_139 {dimension_numbers = #tpu.dot_dimension_numbers<[1], [0], [0], [1], [0, 0, 1, 1], [], []>} : vector<16x32xbf16>, vector<32x64xbf16>, vector<16x64xf32> -> vector<16x64xf32>
    %c0_140 = arith.constant 0 : index
    %c0_141 = arith.constant 0 : index
    %246 = vector.load %arg12[%c0_140, %c0_141] : memref<1x64xf32, #tpu.memory_space<vmem>>, vector<1x64xf32>
    %247 = vector.broadcast %246 : vector<1x64xf32> to vector<16x64xf32>
    %248 = arith.addf %245, %247 : vector<16x64xf32>
    %cst_142 = arith.constant 0.000000e+00 : f32
    %249 = vector.broadcast %cst_142 : f32 to vector<16x64xf32>
    %250 = arith.maximumf %248, %249 : vector<16x64xf32>
    %251 = arith.truncf %250 : vector<16x64xf32> to vector<16x64xbf16>
    %c0_143 = arith.constant 0 : index
    %c0_144 = arith.constant 0 : index
    %252 = vector.load %arg13[%c0_143, %c0_144] : memref<64x32xbf16, #tpu.memory_space<vmem>>, vector<64x32xbf16>
    %cst_145 = arith.constant dense<0.000000e+00> : vector<16x32xf32>
    %253 = tpu.matmul %251, %252, %cst_145 {dimension_numbers = #tpu.dot_dimension_numbers<[1], [0], [0], [1], [0, 0, 1, 1], [], []>} : vector<16x64xbf16>, vector<64x32xbf16>, vector<16x32xf32> -> vector<16x32xf32>
    %c0_146 = arith.constant 0 : index
    %c0_147 = arith.constant 0 : index
    %254 = vector.load %arg14[%c0_146, %c0_147] : memref<1x32xf32, #tpu.memory_space<vmem>>, vector<1x32xf32>
    %255 = vector.broadcast %254 : vector<1x32xf32> to vector<16x32xf32>
    %256 = arith.addf %253, %255 : vector<16x32xf32>
    %257 = arith.addf %242, %256 : vector<16x32xf32>
    %c0_148 = arith.constant 0 : index
    %c0_149 = arith.constant 0 : index
    %258 = vector.load %arg17[%c0_148, %c0_149] : memref<1x32xf32, #tpu.memory_space<vmem>>, vector<1x32xf32>
    %c0_150 = arith.constant 0 : index
    %c0_151 = arith.constant 0 : index
    %259 = vector.load %arg18[%c0_150, %c0_151] : memref<1x32xf32, #tpu.memory_space<vmem>>, vector<1x32xf32>
    %cst_152 = arith.constant dense<0.000000e+00> : vector<16xf32>
    %260 = vector.multi_reduction <add>, %257, %cst_152 [1] : vector<16x32xf32> to vector<16xf32>
    %261 = vector.shape_cast %260 : vector<16xf32> to vector<16x1xf32>
    %cst_153 = arith.constant 3.200000e+01 : f32
    %262 = vector.broadcast %cst_153 : f32 to vector<16x1xf32>
    %263 = arith.divf %261, %262 : vector<16x1xf32>
    %264 = vector.broadcast %263 : vector<16x1xf32> to vector<16x32xf32>
    %265 = arith.subf %257, %264 : vector<16x32xf32>
    %266 = arith.mulf %265, %265 : vector<16x32xf32>
    %cst_154 = arith.constant dense<0.000000e+00> : vector<16xf32>
    %267 = vector.multi_reduction <add>, %266, %cst_154 [1] : vector<16x32xf32> to vector<16xf32>
    %268 = vector.shape_cast %267 : vector<16xf32> to vector<16x1xf32>
    %cst_155 = arith.constant 3.200000e+01 : f32
    %269 = vector.broadcast %cst_155 : f32 to vector<16x1xf32>
    %270 = arith.divf %268, %269 : vector<16x1xf32>
    %271 = vector.broadcast %263 : vector<16x1xf32> to vector<16x32xf32>
    %272 = arith.subf %257, %271 : vector<16x32xf32>
    %cst_156 = arith.constant 9.99999974E-6 : f32
    %273 = vector.broadcast %cst_156 : f32 to vector<16x1xf32>
    %274 = arith.addf %270, %273 : vector<16x1xf32>
    %275 = math.rsqrt %274 : vector<16x1xf32>
    %276 = vector.broadcast %275 : vector<16x1xf32> to vector<16x32xf32>
    %277 = arith.mulf %272, %276 : vector<16x32xf32>
    %278 = vector.broadcast %258 : vector<1x32xf32> to vector<16x32xf32>
    %279 = arith.mulf %277, %278 : vector<16x32xf32>
    %280 = vector.broadcast %259 : vector<1x32xf32> to vector<16x32xf32>
    %281 = arith.addf %279, %280 : vector<16x32xf32>
    %c0_157 = arith.constant 0 : index
    %c0_158 = arith.constant 0 : index
    %282 = vector.load %arg19[%c0_157, %c0_158] : memref<1x32xf32, #tpu.memory_space<vmem>>, vector<1x32xf32>
    %c0_159 = arith.constant 0 : index
    %c0_160 = arith.constant 0 : index
    %283 = vector.load %arg20[%c0_159, %c0_160] : memref<1x32xf32, #tpu.memory_space<vmem>>, vector<1x32xf32>
    %cst_161 = arith.constant dense<0.000000e+00> : vector<16xf32>
    %284 = vector.multi_reduction <add>, %281, %cst_161 [1] : vector<16x32xf32> to vector<16xf32>
    %285 = vector.shape_cast %284 : vector<16xf32> to vector<16x1xf32>
    %cst_162 = arith.constant 3.200000e+01 : f32
    %286 = vector.broadcast %cst_162 : f32 to vector<16x1xf32>
    %287 = arith.divf %285, %286 : vector<16x1xf32>
    %288 = vector.broadcast %287 : vector<16x1xf32> to vector<16x32xf32>
    %289 = arith.subf %281, %288 : vector<16x32xf32>
    %290 = arith.mulf %289, %289 : vector<16x32xf32>
    %cst_163 = arith.constant dense<0.000000e+00> : vector<16xf32>
    %291 = vector.multi_reduction <add>, %290, %cst_163 [1] : vector<16x32xf32> to vector<16xf32>
    %292 = vector.shape_cast %291 : vector<16xf32> to vector<16x1xf32>
    %cst_164 = arith.constant 3.200000e+01 : f32
    %293 = vector.broadcast %cst_164 : f32 to vector<16x1xf32>
    %294 = arith.divf %292, %293 : vector<16x1xf32>
    %295 = vector.broadcast %287 : vector<16x1xf32> to vector<16x32xf32>
    %296 = arith.subf %281, %295 : vector<16x32xf32>
    %cst_165 = arith.constant 9.99999974E-6 : f32
    %297 = vector.broadcast %cst_165 : f32 to vector<16x1xf32>
    %298 = arith.addf %294, %297 : vector<16x1xf32>
    %299 = math.rsqrt %298 : vector<16x1xf32>
    %300 = vector.broadcast %299 : vector<16x1xf32> to vector<16x32xf32>
    %301 = arith.mulf %296, %300 : vector<16x32xf32>
    %302 = vector.broadcast %282 : vector<1x32xf32> to vector<16x32xf32>
    %303 = arith.mulf %301, %302 : vector<16x32xf32>
    %304 = vector.broadcast %283 : vector<1x32xf32> to vector<16x32xf32>
    %305 = arith.addf %303, %304 : vector<16x32xf32>
    %306 = vector.shape_cast %305 : vector<16x32xf32> to vector<2x8x32xf32>
    %c0_166 = arith.constant 0 : index
    %c0_167 = arith.constant 0 : index
    %c0_168 = arith.constant 0 : index
    %307 = vector.load %arg21[%c0_166, %c0_167, %c0_168] : memref<2x8x32xf32, #tpu.memory_space<vmem>>, vector<2x8x32xf32>
    tpu.vector_store %arg21[%c0_166, %c0_167, %c0_168], %306 {strides = array<i32>} : memref<2x8x32xf32, #tpu.memory_space<vmem>>, vector<2x8x32xf32>,
    return
  }
  func.func @transform_0(%arg0: i32) -> (i32, i32, i32) {
    %c0_i32 = arith.constant 0 : i32
    %c0_i32_0 = arith.constant 0 : i32
    %c0_i32_1 = arith.constant 0 : i32
    %c0_i32_2 = arith.constant 0 : i32
    return %c0_i32, %c0_i32_0, %c0_i32_1 : i32, i32, i32
  }
  func.func @transform_1(%arg0: i32) -> (i32, i32, i32) {
    %c0_i32 = arith.constant 0 : i32
    %c0_i32_0 = arith.constant 0 : i32
    %c0_i32_1 = arith.constant 0 : i32
    %c0_i32_2 = arith.constant 0 : i32
    return %c0_i32, %c0_i32_0, %c0_i32_1 : i32, i32, i32
  }
  func.func @transform_2(%arg0: i32) -> (i32, i32, i32) {
    %c0_i32 = arith.constant 0 : i32
    %c0_i32_0 = arith.constant 0 : i32
    %c0_i32_1 = arith.constant 0 : i32
    %c0_i32_2 = arith.constant 0 : i32
    return %c0_i32, %c0_i32_0, %c0_i32_1 : i32, i32, i32
  }
  func.func @transform_3(%arg0: i32) -> (i32, i32, i32) {
    %c0_i32 = arith.constant 0 : i32
    %c0_i32_0 = arith.constant 0 : i32
    %c0_i32_1 = arith.constant 0 : i32
    %c0_i32_2 = arith.constant 0 : i32
    return %c0_i32, %c0_i32_0, %c0_i32_1 : i32, i32, i32
  }
  func.func @transform_4(%arg0: i32) -> (i32, i32, i32) {
    %c0_i32 = arith.constant 0 : i32
    %c0_i32_0 = arith.constant 0 : i32
    %c0_i32_1 = arith.constant 0 : i32
    %c0_i32_2 = arith.constant 0 : i32
    return %c0_i32, %c0_i32_0, %c0_i32_1 : i32, i32, i32
  }
  func.func @transform_5(%arg0: i32) -> (i32, i32, i32) {
    %c0_i32 = arith.constant 0 : i32
    %c0_i32_0 = arith.constant 0 : i32
    %c0_i32_1 = arith.constant 0 : i32
    %c0_i32_2 = arith.constant 0 : i32
    return %c0_i32, %c0_i32_0, %c0_i32_1 : i32, i32, i32
  }
  func.func @transform_6(%arg0: i32) -> (i32, i32, i32) {
    %c0_i32 = arith.constant 0 : i32
    %c0_i32_0 = arith.constant 0 : i32
    %c0_i32_1 = arith.constant 0 : i32
    %c0_i32_2 = arith.constant 0 : i32
    return %c0_i32, %c0_i32_0, %c0_i32_1 : i32, i32, i32
  }
  func.func @transform_7(%arg0: i32) -> (i32, i32, i32) {
    %c0_i32 = arith.constant 0 : i32
    %c0_i32_0 = arith.constant 0 : i32
    %c0_i32_1 = arith.constant 0 : i32
    %c0_i32_2 = arith.constant 0 : i32
    return %c0_i32, %c0_i32_0, %c0_i32_1 : i32, i32, i32
  }
  func.func @transform_8(%arg0: i32) -> (i32, i32, i32) {
    %c0_i32 = arith.constant 0 : i32
    %c0_i32_0 = arith.constant 0 : i32
    %c0_i32_1 = arith.constant 0 : i32
    %c0_i32_2 = arith.constant 0 : i32
    return %c0_i32, %c0_i32_0, %c0_i32_1 : i32, i32, i32
  }
  func.func @transform_9(%arg0: i32) -> (i32, i32) {
    %c0_i32 = arith.constant 0 : i32
    %c0_i32_0 = arith.constant 0 : i32
    %c0_i32_1 = arith.constant 0 : i32
    return %c0_i32, %c0_i32_0 : i32, i32
  }
  func.func @transform_10(%arg0: i32) -> (i32, i32) {
    %c0_i32 = arith.constant 0 : i32
    %c0_i32_0 = arith.constant 0 : i32
    %c0_i32_1 = arith.constant 0 : i32
    return %c0_i32, %c0_i32_0 : i32, i32
  }
  func.func @transform_11(%arg0: i32) -> (i32, i32) {
    %c0_i32 = arith.constant 0 : i32
    %c0_i32_0 = arith.constant 0 : i32
    %c0_i32_1 = arith.constant 0 : i32
    return %c0_i32, %c0_i32_0 : i32, i32
  }
  func.func @transform_12(%arg0: i32) -> (i32, i32) {
    %c0_i32 = arith.constant 0 : i32
    %c0_i32_0 = arith.constant 0 : i32
    %c0_i32_1 = arith.constant 0 : i32
    return %c0_i32, %c0_i32_0 : i32, i32
  }
  func.func @transform_13(%arg0: i32) -> (i32, i32) {
    %c0_i32 = arith.constant 0 : i32
    %c0_i32_0 = arith.constant 0 : i32
    %c0_i32_1 = arith.constant 0 : i32
    return %c0_i32, %c0_i32_0 : i32, i32
  }
  func.func @transform_14(%arg0: i32) -> (i32, i32) {
    %c0_i32 = arith.constant 0 : i32
    %c0_i32_0 = arith.constant 0 : i32
    %c0_i32_1 = arith.constant 0 : i32
    return %c0_i32, %c0_i32_0 : i32, i32
  }
  func.func @transform_15(%arg0: i32) -> (i32, i32) {
    %c0_i32 = arith.constant 0 : i32
    %c0_i32_0 = arith.constant 0 : i32
    %c0_i32_1 = arith.constant 0 : i32
    return %c0_i32, %c0_i32_0 : i32, i32
  }
  func.func @transform_16(%arg0: i32) -> (i32, i32) {
    %c0_i32 = arith.constant 0 : i32
    %c0_i32_0 = arith.constant 0 : i32
    %c0_i32_1 = arith.constant 0 : i32
    return %c0_i32, %c0_i32_0 : i32, i32
  }
  func.func @transform_17(%arg0: i32) -> (i32, i32) {
    %c0_i32 = arith.constant 0 : i32
    %c0_i32_0 = arith.constant 0 : i32
    %c0_i32_1 = arith.constant 0 : i32
    return %c0_i32, %c0_i32_0 : i32, i32
  }
  func.func @transform_18(%arg0: i32) -> (i32, i32) {
    %c0_i32 = arith.constant 0 : i32
    %c0_i32_0 = arith.constant 0 : i32
    %c0_i32_1 = arith.constant 0 : i32
    return %c0_i32, %c0_i32_0 : i32, i32
  }
  func.func @transform_19(%arg0: i32) -> (i32, i32) {
    %c0_i32 = arith.constant 0 : i32
    %c0_i32_0 = arith.constant 0 : i32
    %c0_i32_1 = arith.constant 0 : i32
    return %c0_i32, %c0_i32_0 : i32, i32
  }
  func.func @transform_20(%arg0: i32) -> (i32, i32, i32) {
    %c0_i32 = arith.constant 0 : i32
    %c0_i32_0 = arith.constant 0 : i32
    %c0_i32_1 = arith.constant 0 : i32
    %c0_i32_2 = arith.constant 0 : i32
    return %c0_i32, %c0_i32_0, %c0_i32_1 : i32, i32, i32
  }
}

</mosaic_0001>

<bundles_post_ra>
// kernel: encoder_fwd.3
= control target key start
LH: loop header
LB: loop body
LE: loop exit
PB: predicated region body
PF: predicated region fallthrough
CT: control target
= control target key end

     0   :  { %s2132_s0 = inlined_call_operand.vmem [shape: f32[2,8,32], index: 0, kind: input, shape index: {}]   ;;  %s2133_s1 = inlined_call_operand.vmem [shape: s32[2,1,8], index: 1, kind: input, shape index: {}]   ;;  %s2134_s2 = inlined_call_operand.vmem [shape: bf16[4,32,8], index: 2, kind: input, shape index: {}]   ;;  %s2135_s3 = inlined_call_operand.vmem [shape: bf16[4,32,8], index: 3, kind: input, shape index: {}]   ;;  %s2136_s4 = inlined_call_operand.vmem [shape: bf16[4,32,8], index: 4, kind: input, shape index: {}]   ;;  %s2137_s5 = inlined_call_operand.vmem [shape: f32[4,1,8], index: 5, kind: input, shape index: {}]   ;;  %s2138_s6 = inlined_call_operand.vmem [shape: f32[4,1,8], index: 6, kind: input, shape index: {}]   ;;  %s2139_s7 = inlined_call_operand.vmem [shape: f32[4,1,8], index: 7, kind: input, shape index: {}]   ;;  %s2140_s8 = inlined_call_operand.vmem [shape: bf16[4,8,32], index: 8, kind: input, shape index: {}]   ;;  %s2141_s9 = inlined_call_operand.vmem [shape: f32[1,32], index: 9, kind: input, shape index: {}]   ;;  %s2142_s10 = inlined_call_operand.vmem [shape: bf16[32,64], index: 10, kind: input, shape index: {}]   ;;  %s2143_s11 = inlined_call_operand.vmem [shape: f32[1,64], index: 11, kind: input, shape index: {}]   ;;  %s2144_s12 = inlined_call_operand.vmem [shape: bf16[64,32], index: 12, kind: input, shape index: {}]   ;;  %s2145_s13 = inlined_call_operand.vmem [shape: f32[1,32], index: 13, kind: input, shape index: {}]   ;;  %s2146_s14 = inlined_call_operand.vmem [shape: f32[1,32], index: 14, kind: input, shape index: {}]   ;;  %s2147_s15 = inlined_call_operand.vmem [shape: f32[1,32], index: 15, kind: input, shape index: {}]   ;;  %s2148_s16 = inlined_call_operand.vmem [shape: f32[1,32], index: 16, kind: input, shape index: {}]   ;;  %s2149_s17 = inlined_call_operand.vmem [shape: f32[1,32], index: 17, kind: input, shape index: {}]   ;;  %s2150_s18 = inlined_call_operand.vmem [shape: f32[1,32], index: 18, kind: input, shape index: {}]   ;;  %s2151_s19 = inlined_call_operand.vmem [shape: f32[1,32], index: 19, kind: input, shape index: {}]   ;;  %s2152_s20 = inlined_call_operand.hbm [shape: f32[2,8,32], index: 20, kind: output, shape index: {}]  }
   0x1   :  { %2158 = sst [smem:[#allocation5_spill]] %s2132_s0 }
   0x2   :  { %2159 = sst [smem:[#allocation6_spill]] %s2133_s1 }
   0x3   :  { %2160 = sst [smem:[#allocation7_spill]] %s2134_s2 }
   0x4   :  { %2161 = sst [smem:[#allocation8_spill]] %s2135_s3 }
   0x5   :  { %2162 = sst [smem:[#allocation9_spill]] %s2136_s4 }
   0x6   :  { %2163 = sst [smem:[#allocation10_spill]] %s2145_s13 }
   0x7   :  { %s2164_s23 = sld [smem:[#allocation7_spill]]  ;;  %vm94_vm0 = vcmask 261120  }
   0x8   :  { %s2165_s13 = sld [smem:[#allocation8_spill]] }
   0x9   :  { %s2166_s29 = sld [smem:[#allocation5_spill]] }
   0xd   :  { %v1550_v0 = vld [vmem:[%s2164_s23 + $0x8] sm:$0xff]  ;;  %v1549_v2 = vld [vmem:[%s2164_s23] sm:$0xff] }
   0xe   :  { %v1552_v1 = vld [vmem:[%s2165_s13 + $0x8] sm:$0xff]  ;;  %v1551_v3 = vld [vmem:[%s2165_s13] sm:$0xff]  ;;  %104 = vmatpush.bf16.msra.mxu0 %v1550_v0 }
   0xf   :  { %v1802_v4 = vld [vmem:[%s2166_s29] sm:$0xff]  ;;  %138 = vmatpush.bf16.msra.mxu1 %v1552_v1  ;;  %v1807_v5 = vld [vmem:[%s2166_s29 + $0x8] sm:$0xff] }
  0x10   :  { %v1811_v6 = vpack.c.bf16 %v1807_v5, %v1802_v4 }
  0x12   :  { %105 = vmatpush.bf16.msra.mxu0 %v1549_v2 }
  0x13   :  { %139 = vmatpush.bf16.msra.mxu1 %v1551_v3 }
  0x15   :  { %1355 = vmatmul.msk.bf16.vlgmr.msra.gmra.mxu0 %vm94_vm0, %v1811_v6 }
  0x16   :  { %1364 = vmatmul.msk.bf16.vlgmr.msra.gmra.mxu1 %vm94_vm0, %v1811_v6 }
  0x17   :  { %25 = vsyncpa [#allocation3], 0  ;;  %v1585_v7 = vld [vmem:[%s2138_s6] ss:$0 sm:$0xff]  ;;  %vm184_vm1 = vcmask 64512   ;;  %v1556_v13 = vld [vmem:[%s2164_s23 + $0x18] sm:$0xff] }
  0x18   :  { %v1584_v9 = vld [vmem:[%s2137_s5] ss:$0 sm:$0xff]  ;;  %v1555_v16 = vld [vmem:[%s2164_s23 + $0x10] sm:$0xff]  ;;  %v1558_v21 = vld [vmem:[%s2165_s13 + $0x18] sm:$0xff]  ;;  %s2167_s21 = sld [smem:[#allocation6_spill]]  ;;  %v1677_v29 = vmov 0  }
  0x19   :  { %v1557_v25 = vld [vmem:[%s2165_s13 + $0x10] sm:$0xff]  ;;  %s2172_s25 = sld [smem:[#allocation9_spill]]  ;;  %v1587_v48 = vld [vmem:[%s2137_s5 + $0x1] ss:$0 sm:$0xff]  ;;  %vm262_vm6 = vcmask 1043456   ;;  %vm1195_vm14 = vcmask 523264  }
  0x1a   :  { %v1586_v50 = vld [vmem:[%s2138_s6 + $0x1] ss:$0 sm:$0xff]  ;;  %s1681_s4 = smov 8  }
  0x1e   :  { %v70_v27 = vld [vmem:[%s2167_s21] sm:$0x1]  ;;  %v71_v28 = vld [vmem:[%s2167_s21 + $0x1] sm:$0x1] }
  0x1f   :  { %vm72_vm2 = vcmp.ne.s32.totalorder %v70_v27, 0  ;;  %vm73_vm3 = vcmp.ne.s32.totalorder %v71_v28, 0  ;;  %v1554_v44 = vld [vmem:[%s2172_s25 + $0x8] sm:$0xff]  ;;  %v1553_v46 = vld [vmem:[%s2172_s25] sm:$0xff]  ;;  %v1559_v28 = vld [vmem:[%s2172_s25 + $0x10] sm:$0xff] }
  0x20   :  { %v225_v30 = vsel %vm72_vm2, 1, %v1677_v29  ;;  %v226_v31 = vsel %vm73_vm3, 1, %v1677_v29  ;;  %172 = vmatpush.bf16.msra.mxu2 %v1554_v44  ;;  %v299_v44 = vld [vmem:[%s2140_s8] sm:$0xf] }
  0x21   :  { %v227_v32 = vperm.slane %v225_v30, 0  ;;  %v228_v33 = vperm.slane %v226_v31, 0 }
  0x23   :  { %vm1849_vm4 = vcmp.eq.s32.totalorder %v227_v32, 1  ;;  %vm1853_vm5 = vcmp.eq.s32.totalorder %v228_v33, 1 }
  0x24   :  { %173 = vmatpush.bf16.msra.mxu2 %v1553_v46 }
  0x27   :  { %1373 = vmatmul.msk.bf16.vlgmr.msra.gmra.mxu2 %vm94_vm0, %v1811_v6 }
  0x92   :  { %v107_v11 = vpop.f32.mrf.mxu0 }
  0x93   :  { %v141_v8 = vpop.f32.mrf.mxu1  ;;  %v108_v14 = vadd.f32 %v1584_v9, %v107_v11 }
  0x94   :  { %v142_v10 = vadd.f32 %v1585_v7, %v141_v8 }
  0x95   :  { %v180_v18 = vpack.c.bf16 %v108_v14, %v108_v14 }
  0x96   :  { %v182_v12 = vpack.c.bf16 %v142_v10, %v142_v10  ;;  %v1588_v10 = vld [vmem:[%s2139_s7] ss:$0 sm:$0xff] }
  0x98   :  { %v189_v15 = vsel %vm184_vm1, %v182_v12, 0 }
  0x99   :  { %198 = vmatpush.bf16.xpose.msra.mxu3 %v189_v15 }
  0x9a   :  { %v109_v22 = vpop.f32.mrf.mxu0 }
  0x9b   :  { %v143_v17 = vpop.f32.mrf.mxu1  ;;  %v110_v24 = vadd.f32 %v1584_v9, %v109_v22 }
  0x9c   :  { %v144_v19 = vadd.f32 %v1585_v7, %v143_v17 }
  0x9d   :  { %v181_v26 = vpack.c.bf16 %v110_v24, %v110_v24 }
  0x9e   :  { %v183_v20 = vpack.c.bf16 %v144_v19, %v144_v19 }
  0xa0   :  { %1374 = vmatmul.msk.bf16.vlgmr.msra.gmra.mxu3 %vm184_vm1, %v180_v18  ;;  %v208_v23 = vsel %vm184_vm1, %v183_v20, 0 }
  0xa1   :  { %328 = vmatpush.bf16.msrb.mxu3 %v1556_v13  ;;  %217 = vmatpush.bf16.xpose.msrb.mxu0 %v208_v23 }
  0xa5   :  { %329 = vmatpush.bf16.msrb.mxu3 %v1555_v16 }
  0xa8   :  { %1375 = vmatmul.msk.bf16.vlgmr.msrb.gmra.mxu0 %vm184_vm1, %v181_v26  ;;  %v1560_v26 = vld [vmem:[%s2172_s25 + $0x18] sm:$0xff] }
  0xa9   :  { %364 = vmatpush.bf16.msra.mxu0 %v1558_v21 }
  0xaa   :  { %v175_v11 = vpop.f32.mrf.mxu2 }
  0xab   :  { %v176_v12 = vadd.f32 %v1588_v10, %v175_v11 }
  0xad   :  { %365 = vmatpush.bf16.msra.mxu0 %v1557_v25  ;;  %v257_v13 = vpack.c.bf16 %v176_v12, %v176_v12 }
  0xaf   :  { %v264_v14 = vsel %vm262_vm6, %v257_v13, 0 }
  0xb0   :  { %1391 = vmatmul.msk.bf16.vlgmr.msrb.gmra.mxu3 %vm94_vm0, %v1811_v6  ;;  %273 = vmatpush.bf16.msrb.mxu1 %v264_v14 }
  0xb2   :  { %v177_v16 = vpop.f32.mrf.mxu2 }
  0xb3   :  { %v178_v17 = vadd.f32 %v1588_v10, %v177_v16  ;;  %v1563_v16 = vld [vmem:[%s2165_s13 + $0x20] sm:$0xff] }
  0xb4   :  { %400 = vmatpush.bf16.msra.mxu1 %v1560_v26  ;;  %v1590_v26 = vld [vmem:[%s2138_s6 + $0x2] ss:$0 sm:$0xff] }
  0xb5   :  { %v258_v18 = vpack.c.bf16 %v178_v17, %v178_v17  ;;  %v1562_v17 = vld [vmem:[%s2164_s23 + $0x28] sm:$0xff] }
  0xb7   :  { %v283_v20 = vsel %vm262_vm6, %v258_v18, 0  ;;  %v1561_v18 = vld [vmem:[%s2164_s23 + $0x20] sm:$0xff] }
  0xb8   :  { %1405 = vmatmul.msk.bf16.vlgmr.msra.gmra.mxu0 %vm94_vm0, %v1811_v6  ;;  %292 = vmatpush.bf16.msrb.mxu2 %v283_v20 }
  0xb9   :  { %401 = vmatpush.bf16.msra.mxu1 %v1559_v28 }
 0x123   :  { %v200_v34 = vpop.f32.mrf.mxu3 }
 0x124   :  { %v223_v36 = vmul.f32 0.35355338, %v200_v34 }
 0x125   :  { %v219_v37 = vpop.f32.mrf.mxu0 }
 0x126   :  { %v224_v39 = vmul.f32 0.35355338, %v219_v37  ;;  %v231_v40 = vsel %vm1849_vm4, %v223_v36, -1e+30 }
 0x127   :  { %v233_v41 = vsel %vm184_vm1, %v231_v40, -inf }
 0x128   :  { %234 = vmax.xlane.f32.xlu1 %v233_v41  ;;  %v232_v42 = vsel %vm1853_vm5, %v224_v39, -1e+30 }
 0x129   :  { %v236_v43 = vsel %vm184_vm1, %v232_v42, -inf }
 0x12a   :  { %237 = vmax.xlane.f32.xlu0 %v236_v43 }
 0x12b   :  { %v202_v45 = vpop.f32.mrf.mxu3 }
 0x12c   :  { %v545_v45 = vsel %vm262_vm6, %v299_v44, 0 }
 0x12d   :  { %v221_v47 = vpop.f32.mrf.mxu0 }
 0x133   :  { %v331_v49 = vpop.f32.mrf.mxu3 }
 0x134   :  { %v1877_v51 = vadd.f32 %v1587_v48, %v331_v49 }
 0x135   :  { %v367_v52 = vpop.f32.mrf.mxu0 }
 0x136   :  { %v368_v53 = vadd.f32 %v1586_v50, %v367_v52  ;;  %v408_v37 = vpack.c.bf16 %v1877_v51, %v1877_v51 }
 0x138   :  { %v410_v15 = vpack.c.bf16 %v368_v53, %v368_v53 }
 0x13a   :  { %v416_v19 = vsel %vm184_vm1, %v410_v15, 0  ;;  %v1564_v15 = vld [vmem:[%s2165_s13 + $0x28] sm:$0xff] }
 0x13b   :  { %v333_v56 = vpop.f32.mrf.mxu3  ;;  %425 = vmatpush.bf16.xpose.msra.mxu2 %v416_v19 }
 0x13c   :  { %v334_v59 = vadd.f32 %v1587_v48, %v333_v56 }
 0x13d   :  { %v369_v54 = vpop.f32.mrf.mxu0 }
 0x13e   :  { %v370_v55 = vadd.f32 %v1586_v50, %v369_v54  ;;  %v409_v60 = vpack.c.bf16 %v334_v59, %v334_v59  ;;  %v1589_v50 = vld [vmem:[%s2139_s7 + $0x1] ss:$0 sm:$0xff] }
 0x140   :  { %v411_v57 = vpack.c.bf16 %v370_v55, %v370_v55 }
 0x142   :  { %v435_v58 = vsel %vm184_vm1, %v411_v57, 0 }
 0x143   :  { %444 = vmatpush.bf16.xpose.msra.mxu3 %v435_v58 }
 0x14a   :  { %1421 = vmatmul.msk.bf16.vlgmr.msra.gmra.mxu3 %vm184_vm1, %v409_v60 }
 0x14b   :  { %554 = vmatpush.bf16.msrb.mxu3 %v545_v45 }
 0x19b   :  { %v235_v61 = vpop.xlane.xlu1 %234 }
 0x19c   :  { %v239_v62 = vsub.f32 %v231_v40, %v235_v61 }
 0x19d   :  { %v238_v63 = vpop.xlane.xlu0 %237 }
 0x19e   :  { %v241_v0 = vmul.f32 1.442695, %v239_v62  ;;  %v240_v1 = vsub.f32 %v232_v42, %v238_v63 }
 0x1a0   :  { %1605 = vpow2.f32 %v241_v0  ;;  %v243_v2 = vmul.f32 1.442695, %v240_v1 }
 0x1a2   :  { %1607 = vpow2.f32 %v243_v2 }
 0x1a6   :  { %v1606_v3 = vpop.eup %1605 }
 0x1a7   :  { %v245_v7 = vsel %vm184_vm1, %v1606_v3, 0.0 }
 0x1a8   :  { %v1608_v8 = vpop.eup %1607  ;;  %246 = vadd.xlane.f32.xlu1 %v245_v7 }
 0x1a9   :  { %v248_v9 = vsel %vm184_vm1, %v1608_v8, 0.0 }
 0x1aa   :  { %249 = vadd.xlane.f32.xlu0 %v248_v9 }
 0x1cd   :  { %v446_v21 = vpop.f32.mrf.mxu3 }
 0x1ce   :  { %v451_v22 = vmul.f32 0.35355338, %v446_v21 }
 0x1d0   :  { %v453_v23 = vsel %vm1853_vm5, %v451_v22, -1e+30 }
 0x1d1   :  { %v457_v24 = vsel %vm184_vm1, %v453_v23, -inf }
 0x1d2   :  { %458 = vmax.xlane.f32.xlu2 %v457_v24 }
 0x1d5   :  { %v448_v25 = vpop.f32.mrf.mxu3 }
 0x21b   :  { %v247_v27 = vpop.xlane.xlu1 %246 }
 0x21c   :  { %1609 = vrcp.f32 %v247_v27 }
 0x21d   :  { %v250_v29 = vpop.xlane.xlu0 %249 }
 0x21e   :  { %1611 = vrcp.f32 %v250_v29 }
 0x222   :  { %v1610_v30 = vpop.eup %1609 }
 0x223   :  { %v253_v31 = vmul.f32 %v1610_v30, %v1606_v3 }
 0x224   :  { %v1612_v32 = vpop.eup %1611 }
 0x225   :  { %v254_v33 = vmul.f32 %v1612_v32, %v1608_v8  ;;  %v255_v34 = vpack.c.bf16 %v253_v31, %v253_v31 }
 0x227   :  { %1376 = vmatmul.msk.bf16.vlgmr.msrb.gmra.mxu1 %vm184_vm1, %v255_v34  ;;  %v256_v36 = vpack.c.bf16 %v254_v33, %v254_v33 }
 0x229   :  { %1377 = vmatmul.msk.bf16.vlgmr.msrb.gmra.mxu2 %vm184_vm1, %v256_v36 }
 0x237   :  { %1419 = vmatmul.msk.bf16.vlgmr.msra.gmra.mxu1 %vm94_vm0, %v1811_v6 }
 0x239   :  { %1420 = vmatmul.msk.bf16.vlgmr.msra.gmra.mxu2 %vm184_vm1, %v408_v37 }
 0x245   :  { %v459_v39 = vpop.xlane.xlu2 %458 }
 0x246   :  { %v461_v40 = vsub.f32 %v453_v23, %v459_v39  ;;  %v1424_v23 = vld [vmem:[%s2140_s8 + $0x4] sm:$0xf]  ;;  %v1591_v39 = vld [vmem:[%s2137_s5 + $0x2] ss:$0 sm:$0xff] }
 0x247   :  { %v525_v24 = vsel %vm262_vm6, %v1424_v23, 0  ;;  %v1567_v23 = vld [vmem:[%s2164_s23 + $0x30] sm:$0xff] }
 0x248   :  { %v464_v41 = vmul.f32 1.442695, %v461_v40  ;;  %534 = vmatpush.bf16.msrb.mxu2 %v525_v24 }
 0x24a   :  { %1613 = vpow2.f32 %v464_v41 }
 0x250   :  { %v1614_v42 = vpop.eup %1613 }
 0x251   :  { %v469_v43 = vsel %vm184_vm1, %v1614_v42, 0.0 }
 0x252   :  { %470 = vadd.xlane.f32.xlu0 %v469_v43 }
 0x2a4   :  { %v275_v46 = vpop.f32.mrf.mxu1 }
 0x2ac   :  { %v277_v47 = vpop.f32.mrf.mxu1  ;;  %v294_v48 = vpop.f32.mrf.mxu2 }
 0x2ad   :  { %v298_v49 = vpack.c.bf16 %v294_v48, %v275_v46  ;;  %v1566_v46 = vld [vmem:[%s2172_s25 + $0x28] sm:$0xff]  ;;  %v1565_v47 = vld [vmem:[%s2172_s25 + $0x20] sm:$0xff] }
 0x2ae   :  { %661 = vmatpush.bf16.msra.mxu2 %v1566_v46 }
 0x2af   :  { %1426 = vmatmul.msk.bf16.vlgmr.msrb.gmra.mxu3 %vm184_vm1, %v298_v49 }
 0x2b2   :  { %662 = vmatpush.bf16.msra.mxu2 %v1565_v47 }
 0x2b4   :  { %v296_v51 = vpop.f32.mrf.mxu2  ;;  %v403_v52 = vpop.f32.mrf.mxu1 }
 0x2b5   :  { %v404_v53 = vadd.f32 %v1589_v50, %v403_v52 }
 0x2b7   :  { %v478_v54 = vpack.c.bf16 %v404_v53, %v404_v53 }
 0x2b9   :  { %v484_v55 = vsel %vm262_vm6, %v478_v54, 0 }
 0x2ba   :  { %493 = vmatpush.bf16.msrb.mxu0 %v484_v55 }
 0x2bc   :  { %v427_v56 = vpop.f32.mrf.mxu2  ;;  %v405_v57 = vpop.f32.mrf.mxu1 }
 0x2bd   :  { %v450_v58 = vmul.f32 0.35355338, %v427_v56  ;;  %v406_v59 = vadd.f32 %v1589_v50, %v405_v57 }
 0x2be   :  { %589 = vmatpush.bf16.msra.mxu0 %v1562_v17 }
 0x2bf   :  { %v452_v60 = vsel %vm1849_vm4, %v450_v58, -1e+30  ;;  %v479_v61 = vpack.c.bf16 %v406_v59, %v406_v59 }
 0x2c0   :  { %v454_v62 = vsel %vm184_vm1, %v452_v60, -inf }
 0x2c1   :  { %455 = vmax.xlane.f32.xlu2 %v454_v62  ;;  %v503_v63 = vsel %vm262_vm6, %v479_v61, 0  ;;  %v1592_v62 = vld [vmem:[%s2139_s7 + $0x2] ss:$0 sm:$0xff] }
 0x2c2   :  { %512 = vmatpush.bf16.msrb.mxu1 %v503_v63  ;;  %590 = vmatpush.bf16.msra.mxu0 %v1561_v18 }
 0x2c4   :  { %v429_v0 = vpop.f32.mrf.mxu2 }
 0x2c5   :  { %v471_v1 = vpop.xlane.xlu0 %470 }
 0x2c6   :  { %1615 = vrcp.f32 %v471_v1  ;;  %625 = vmatpush.bf16.msra.mxu1 %v1564_v15 }
 0x2ca   :  { %626 = vmatpush.bf16.msra.mxu1 %v1563_v16 }
 0x2cc   :  { %v1616_v2 = vpop.eup %1615 }
 0x2cd   :  { %v475_v3 = vmul.f32 %v1616_v2, %v1614_v42 }
 0x2cf   :  { %v477_v7 = vpack.c.bf16 %v475_v3, %v475_v3 }
 0x2d1   :  { %1423 = vmatmul.msk.bf16.vlgmr.msrb.gmra.mxu1 %vm184_vm1, %v477_v7 }
 0x2e1   :  { %1454 = vmatmul.msk.bf16.vlgmr.msra.gmra.mxu1 %vm94_vm0, %v1811_v6 }
 0x332   :  { %v1959_v48 = vpop.f32.mrf.mxu3 }
 0x334   :  { %v456_v8 = vpop.xlane.xlu2 %455 }
 0x335   :  { %v460_v9 = vsub.f32 %v452_v60, %v456_v8 }
 0x337   :  { %v462_v10 = vmul.f32 1.442695, %v460_v9 }
 0x339   :  { %1617 = vpow2.f32 %v462_v10 }
 0x33a   :  { %v1963_v49 = vpop.f32.mrf.mxu3 }
 0x33f   :  { %v1618_v11 = vpop.eup %1617 }
 0x340   :  { %v466_v12 = vsel %vm184_vm1, %v1618_v11, 0.0 }
 0x341   :  { %467 = vadd.xlane.f32.xlu1 %v466_v12 }
 0x34e   :  { %v514_v13 = vpop.f32.mrf.mxu1 }
 0x356   :  { %v516_v14 = vpop.f32.mrf.mxu1 }
 0x35e   :  { %v628_v25 = vpop.f32.mrf.mxu1 }
 0x35f   :  { %v629_v27 = vadd.f32 %v1590_v26, %v628_v25 }
 0x361   :  { %v671_v28 = vpack.c.bf16 %v629_v27, %v629_v27 }
 0x363   :  { %v677_v29 = vsel %vm184_vm1, %v671_v28, 0 }
 0x364   :  { %686 = vmatpush.bf16.xpose.msra.mxu3 %v677_v29 }
 0x366   :  { %v630_v30 = vpop.f32.mrf.mxu1 }
 0x367   :  { %v631_v31 = vadd.f32 %v1590_v26, %v630_v30 }
 0x369   :  { %v672_v32 = vpack.c.bf16 %v631_v31, %v631_v31 }
 0x36b   :  { %v696_v33 = vsel %vm184_vm1, %v672_v32, 0  ;;  %v1473_v32 = vld [vmem:[%s2140_s8 + $0x8] sm:$0xf] }
 0x3b4   :  { %v468_v19 = vpop.xlane.xlu1 %467 }
 0x3b5   :  { %1619 = vrcp.f32 %v468_v19 }
 0x3bb   :  { %v1620_v20 = vpop.eup %1619 }
 0x3bc   :  { %v474_v21 = vmul.f32 %v1620_v20, %v1618_v11  ;;  %v1570_v20 = vld [vmem:[%s2165_s13 + $0x38] sm:$0xff] }
 0x3be   :  { %v476_v22 = vpack.c.bf16 %v474_v21, %v474_v21  ;;  %v1569_v21 = vld [vmem:[%s2165_s13 + $0x30] sm:$0xff] }
 0x3c0   :  { %1422 = vmatmul.msk.bf16.vlgmr.msrb.gmra.mxu0 %vm184_vm1, %v476_v22  ;;  %v1568_v22 = vld [vmem:[%s2164_s23 + $0x38] sm:$0xff] }
 0x3c1   :  { %705 = vmatpush.bf16.xpose.msrb.mxu0 %v696_v33  ;;  %v786_v33 = vsel %vm262_vm6, %v1473_v32, 0 }
 0x3c2   :  { %795 = vmatpush.bf16.msrb.mxu3 %v786_v33 }
 0x3d0   :  { %1440 = vmatmul.msk.bf16.vlgmr.msra.gmra.mxu0 %vm94_vm0, %v1811_v6 }
 0x3d1   :  { %832 = vmatpush.bf16.msra.mxu0 %v1568_v22 }
 0x3d5   :  { %833 = vmatpush.bf16.msra.mxu0 %v1567_v23 }
 0x43d   :  { %v495_v34 = vpop.f32.mrf.mxu0 }
 0x43e   :  { %v518_v36 = vpack.c.bf16 %v514_v13, %v495_v34 }
 0x440   :  { %1425 = vmatmul.msk.bf16.vlgmr.msrb.gmra.mxu2 %vm184_vm1, %v518_v36 }
 0x445   :  { %v497_v37 = vpop.f32.mrf.mxu0 }
 0x44d   :  { %v592_v40 = vpop.f32.mrf.mxu0 }
 0x44e   :  { %v593_v41 = vadd.f32 %v1591_v39, %v592_v40  ;;  %v1593_v40 = vld [vmem:[%s2138_s6 + $0x3] ss:$0 sm:$0xff] }
 0x450   :  { %v669_v42 = vpack.c.bf16 %v593_v41, %v593_v41  ;;  %1468 = vmatmul.msk.bf16.vlgmr.msra.gmra.mxu2 %vm94_vm0, %v1811_v6 }
 0x452   :  { %1469 = vmatmul.msk.bf16.vlgmr.msra.gmra.mxu3 %vm184_vm1, %v669_v42 }
 0x455   :  { %v594_v43 = vpop.f32.mrf.mxu0 }
 0x456   :  { %v595_v44 = vadd.f32 %v1591_v39, %v594_v43 }
 0x458   :  { %v670_v45 = vpack.c.bf16 %v595_v44, %v595_v44  ;;  %v1594_v44 = vld [vmem:[%s2137_s5 + $0x3] ss:$0 sm:$0xff] }
 0x45a   :  { %1470 = vmatmul.msk.bf16.vlgmr.msrb.gmra.mxu0 %vm184_vm1, %v670_v45 }
 0x46a   :  { %1488 = vmatmul.msk.bf16.vlgmr.msra.gmra.mxu0 %vm94_vm0, %v1811_v6 }
 0x4c3   :  { %v1971_v60 = vpop.f32.mrf.mxu2 }
 0x4cb   :  { %v1973_v61 = vpop.f32.mrf.mxu2 }
 0x4d3   :  { %v664_v63 = vpop.f32.mrf.mxu2 }
 0x4d4   :  { %v665_v0 = vadd.f32 %v1592_v62, %v664_v63  ;;  %v557_v63 = vadd.f32 %v1959_v48, %v1971_v60 }
 0x4d5   :  { %v688_v50 = vpop.f32.mrf.mxu3 }
 0x4d6   :  { %v711_v51 = vmul.f32 0.35355338, %v688_v50  ;;  %v739_v3 = vpack.c.bf16 %v665_v0, %v665_v0 }
 0x4d7   :  { %v707_v52 = vpop.f32.mrf.mxu0 }
 0x4d8   :  { %v712_v53 = vmul.f32 0.35355338, %v707_v52  ;;  %v713_v54 = vsel %vm1849_vm4, %v711_v51, -1e+30  ;;  %v745_v10 = vsel %vm262_vm6, %v739_v3, 0 }
 0x4d9   :  { %v715_v55 = vsel %vm184_vm1, %v713_v54, -inf  ;;  %754 = vmatpush.bf16.msrb.mxu1 %v745_v10 }
 0x4da   :  { %716 = vmax.xlane.f32.xlu2 %v715_v55  ;;  %v714_v56 = vsel %vm1853_vm5, %v712_v53, -1e+30 }
 0x4db   :  { %v718_v57 = vsel %vm184_vm1, %v714_v56, -inf  ;;  %v666_v12 = vpop.f32.mrf.mxu2 }
 0x4dc   :  { %719 = vmax.xlane.f32.xlu0 %v718_v57  ;;  %v667_v13 = vadd.f32 %v1592_v62, %v666_v12  ;;  %v1571_v62 = vld [vmem:[%s2172_s25 + $0x30] sm:$0xff] }
 0x4dd   :  { %v690_v58 = vpop.f32.mrf.mxu3  ;;  %868 = vmatpush.bf16.msra.mxu1 %v1570_v20 }
 0x4de   :  { %v740_v14 = vpack.c.bf16 %v667_v13, %v667_v13  ;;  %v1595_v13 = vld [vmem:[%s2139_s7 + $0x3] ss:$0 sm:$0xff]  ;;  %s2173_s7 = sld [smem:[#allocation10_spill]] }
 0x4df   :  { %v709_v59 = vpop.f32.mrf.mxu0 }
 0x4e0   :  { %v764_v16 = vsel %vm262_vm6, %v740_v14, 0  ;;  %v1572_v59 = vld [vmem:[%s2172_s25 + $0x38] sm:$0xff] }
 0x4e1   :  { %773 = vmatpush.bf16.msrb.mxu2 %v764_v16  ;;  %869 = vmatpush.bf16.msra.mxu1 %v1569_v21 }
 0x4e5   :  { %904 = vmatpush.bf16.msra.mxu2 %v1572_v59 }
 0x4e7   :  { %v835_v45 = vpop.f32.mrf.mxu0 }
 0x4e8   :  { %v836_v50 = vadd.f32 %v1594_v44, %v835_v45 }
 0x4e9   :  { %905 = vmatpush.bf16.msra.mxu2 %v1571_v62  ;;  %v1678_v62 = vmov 32.0  }
 0x4ea   :  { %v912_v52 = vpack.c.bf16 %v836_v50, %v836_v50 }
 0x4ef   :  { %v837_v55 = vpop.f32.mrf.mxu0 }
 0x4f0   :  { %v838_v57 = vadd.f32 %v1594_v44, %v837_v55 }
 0x4f2   :  { %v913_v58 = vpack.c.bf16 %v838_v57, %v838_v57 }
 0x54d   :  { %v717_v1 = vpop.xlane.xlu2 %716 }
 0x54e   :  { %v721_v2 = vsub.f32 %v713_v54, %v717_v1 }
 0x54f   :  { %v720_v7 = vpop.xlane.xlu0 %719 }
 0x550   :  { %v723_v8 = vmul.f32 1.442695, %v721_v2  ;;  %v722_v9 = vsub.f32 %v714_v56, %v720_v7  ;;  %v559_v2 = vadd.f32 %v1963_v49, %v1973_v61 }
 0x552   :  { %1621 = vpow2.f32 %v723_v8  ;;  %v725_v11 = vmul.f32 1.442695, %v722_v9 }
 0x554   :  { %1623 = vpow2.f32 %v725_v11 }
 0x558   :  { %v1622_v15 = vpop.eup %1621 }
 0x559   :  { %v727_v17 = vsel %vm184_vm1, %v1622_v15, 0.0 }
 0x55a   :  { %v1624_v18 = vpop.eup %1623  ;;  %728 = vadd.xlane.f32.xlu1 %v727_v17 }
 0x55b   :  { %v730_v19 = vsel %vm184_vm1, %v1624_v18, 0.0 }
 0x55c   :  { %731 = vadd.xlane.f32.xlu2 %v730_v19 }
 0x5cd   :  { %v729_v24 = vpop.xlane.xlu1 %728 }
 0x5ce   :  { %1625 = vrcp.f32 %v729_v24 }
 0x5cf   :  { %v732_v25 = vpop.xlane.xlu2 %731 }
 0x5d0   :  { %1627 = vrcp.f32 %v732_v25 }
 0x5d4   :  { %v1626_v26 = vpop.eup %1625 }
 0x5d5   :  { %v735_v27 = vmul.f32 %v1626_v26, %v1622_v15 }
 0x5d6   :  { %v1628_v28 = vpop.eup %1627 }
 0x5d7   :  { %v737_v29 = vpack.c.bf16 %v735_v27, %v735_v27  ;;  %v736_v30 = vmul.f32 %v1628_v28, %v1624_v18 }
 0x5d9   :  { %v738_v31 = vpack.c.bf16 %v736_v30, %v736_v30  ;;  %1471 = vmatmul.msk.bf16.vlgmr.msrb.gmra.mxu1 %vm184_vm1, %v737_v29 }
 0x5db   :  { %1472 = vmatmul.msk.bf16.vlgmr.msrb.gmra.mxu2 %vm184_vm1, %v738_v31 }
 0x5e9   :  { %1502 = vmatmul.msk.bf16.vlgmr.msra.gmra.mxu1 %vm94_vm0, %v1811_v6 }
 0x5eb   :  { %1516 = vmatmul.msk.bf16.vlgmr.msra.gmra.mxu2 %vm94_vm0, %v1811_v6 }
 0x656   :  { %v756_v34 = vpop.f32.mrf.mxu1 }
 0x65e   :  { %v758_v36 = vpop.f32.mrf.mxu1  ;;  %v775_v37 = vpop.f32.mrf.mxu2 }
 0x65f   :  { %v779_v39 = vpack.c.bf16 %v775_v37, %v756_v34 }
 0x661   :  { %1474 = vmatmul.msk.bf16.vlgmr.msrb.gmra.mxu3 %vm184_vm1, %v779_v39 }
 0x666   :  { %v777_v41 = vpop.f32.mrf.mxu2  ;;  %v871_v42 = vpop.f32.mrf.mxu1 }
 0x667   :  { %v872_v43 = vadd.f32 %v1593_v40, %v871_v42 }
 0x669   :  { %v914_v46 = vpack.c.bf16 %v872_v43, %v872_v43 }
 0x66b   :  { %v920_v47 = vsel %vm184_vm1, %v914_v46, 0 }
 0x66c   :  { %929 = vmatpush.bf16.xpose.msra.mxu3 %v920_v47  ;;  %v1596_v47 = vld [vmem:[%s2141_s9] ss:$0 sm:$0xff] }
 0x66e   :  { %v873_v51 = vpop.f32.mrf.mxu1  ;;  %v907_v14 = vpop.f32.mrf.mxu2 }
 0x66f   :  { %v874_v53 = vadd.f32 %v1593_v40, %v873_v51  ;;  %v908_v15 = vadd.f32 %v1595_v13, %v907_v14  ;;  %v1521_v40 = vld [vmem:[%s2140_s8 + $0xc] sm:$0xf]  ;;  %v1573_v14 = vld [vmem:[%s2142_s10] sm:$0xff] }
 0x670   :  { %v1029_v41 = vsel %vm262_vm6, %v1521_v40, 0 }
 0x671   :  { %v915_v54 = vpack.c.bf16 %v874_v53, %v874_v53  ;;  %v982_v17 = vpack.c.bf16 %v908_v15, %v908_v15 }
 0x673   :  { %v939_v56 = vsel %vm184_vm1, %v915_v54, 0  ;;  %1517 = vmatmul.msk.bf16.vlgmr.msra.gmra.mxu3 %vm184_vm1, %v912_v52  ;;  %v988_v38 = vsel %vm262_vm6, %v982_v17, 0 }
 0x674   :  { %948 = vmatpush.bf16.xpose.msrb.mxu0 %v939_v56  ;;  %997 = vmatpush.bf16.msrb.mxu1 %v988_v38 }
 0x675   :  { %1038 = vmatpush.bf16.msrb.mxu3 %v1029_v41 }
 0x676   :  { %v909_v22 = vpop.f32.mrf.mxu2 }
 0x677   :  { %v910_v23 = vadd.f32 %v1595_v13, %v909_v22 }
 0x679   :  { %v983_v24 = vpack.c.bf16 %v910_v23, %v910_v23 }
 0x67b   :  { %1518 = vmatmul.msk.bf16.vlgmr.msrb.gmra.mxu0 %vm184_vm1, %v913_v58  ;;  %v1007_v26 = vsel %vm262_vm6, %v983_v24, 0 }
 0x67c   :  { %1016 = vmatpush.bf16.msrb.mxu2 %v1007_v26 }
 0x6e4   :  { %v797_v0 = vpop.f32.mrf.mxu3 }
 0x6e5   :  { %v2023_v1 = vadd.f32 %v797_v0, %v557_v63 }
 0x6ec   :  { %v799_v3 = vpop.f32.mrf.mxu3 }
 0x6ed   :  { %v2029_v7 = vadd.f32 %v799_v3, %v559_v2 }
 0x6f6   :  { %v931_v8 = vpop.f32.mrf.mxu3 }
 0x6f7   :  { %v954_v9 = vmul.f32 0.35355338, %v931_v8 }
 0x6f8   :  { %v950_v10 = vpop.f32.mrf.mxu0 }
 0x6f9   :  { %v955_v11 = vmul.f32 0.35355338, %v950_v10  ;;  %v956_v48 = vsel %vm1849_vm4, %v954_v9, -1e+30 }
 0x6fa   :  { %v958_v60 = vsel %vm184_vm1, %v956_v48, -inf }
 0x6fb   :  { %959 = vmax.xlane.f32.xlu1 %v958_v60  ;;  %v957_v12 = vsel %vm1853_vm5, %v955_v11, -1e+30 }
 0x6fc   :  { %v961_v6 = vsel %vm184_vm1, %v957_v12, -inf }
 0x6fd   :  { %962 = vmax.xlane.f32.xlu0 %v961_v6 }
 0x6fe   :  { %v933_v49 = vpop.f32.mrf.mxu3 }
 0x6ff   :  { %v1574_v49 = vld [vmem:[%s2142_s10 + $0x8] sm:$0xff]  ;;  %s1335_s10 = sshll.u32 %s2152_s20, 4  ;;  %s1336_s10 = int_to_ptr.hbm [resolvable:$true] %s1335_s10 }
 0x700   :  { %v952_v61 = vpop.f32.mrf.mxu0  ;;  %1148 = vmatpush.bf16.msra.mxu0 %v1574_v49 }
 0x704   :  { %1149 = vmatpush.bf16.msra.mxu0 %v1573_v14 }
 0x76e   :  { %v960_v16 = vpop.xlane.xlu1 %959 }
 0x76f   :  { %v964_v35 = vsub.f32 %v956_v48, %v960_v16 }
 0x770   :  { %v963_v18 = vpop.xlane.xlu0 %962 }
 0x771   :  { %v966_v19 = vmul.f32 1.442695, %v964_v35  ;;  %v965_v20 = vsub.f32 %v957_v12, %v963_v18 }
 0x773   :  { %1629 = vpow2.f32 %v966_v19  ;;  %v968_v21 = vmul.f32 1.442695, %v965_v20 }
 0x775   :  { %1631 = vpow2.f32 %v968_v21 }
 0x779   :  { %v1630_v25 = vpop.eup %1629 }
 0x77a   :  { %v970_v27 = vsel %vm184_vm1, %v1630_v25, 0.0 }
 0x77b   :  { %v1632_v28 = vpop.eup %1631  ;;  %971 = vadd.xlane.f32.xlu0 %v970_v27 }
 0x77c   :  { %v973_v29 = vsel %vm184_vm1, %v1632_v28, 0.0 }
 0x77d   :  { %974 = vadd.xlane.f32.xlu2 %v973_v29  ;;  %v1597_v29 = vld [vmem:[%s2146_s14] ss:$0 sm:$0xff] }
 0x7ee   :  { %v972_v30 = vpop.xlane.xlu0 %971 }
 0x7ef   :  { %1633 = vrcp.f32 %v972_v30 }
 0x7f0   :  { %v975_v31 = vpop.xlane.xlu2 %974 }
 0x7f1   :  { %1635 = vrcp.f32 %v975_v31 }
 0x7f2   :  { %1637 = vrcp.f32 %v1678_v62 }
 0x7f5   :  { %v1634_v32 = vpop.eup %1633 }
 0x7f6   :  { %v978_v33 = vmul.f32 %v1634_v32, %v1630_v25 }
 0x7f7   :  { %v1636_v34 = vpop.eup %1635 }
 0x7f8   :  { %v980_v36 = vpack.c.bf16 %v978_v33, %v978_v33  ;;  %v979_v37 = vmul.f32 %v1636_v34, %v1632_v28  ;;  %v1638_v63 = vpop.eup %1637  ;;  %v1598_v33 = vld [vmem:[%s2147_s15] ss:$0 sm:$0xff] }
 0x7f9   :  { %v1064_v0 = vmul.f32 32.0, %v1638_v63  ;;  %vm1068_vm7 = vweird.f32 %v1638_v63 }
 0x7fa   :  { %v981_v39 = vpack.c.bf16 %v979_v37, %v979_v37  ;;  %1519 = vmatmul.msk.bf16.vlgmr.msrb.gmra.mxu1 %vm184_vm1, %v980_v36 }
 0x7fc   :  { %1520 = vmatmul.msk.bf16.vlgmr.msrb.gmra.mxu2 %vm184_vm1, %v981_v39 }
 0x877   :  { %v999_v42 = vpop.f32.mrf.mxu1 }
 0x87f   :  { %v1001_v43 = vpop.f32.mrf.mxu1  ;;  %v1018_v44 = vpop.f32.mrf.mxu2 }
 0x880   :  { %v1022_v45 = vpack.c.bf16 %v1018_v44, %v999_v42  ;;  %v1578_v42 = vld [vmem:[%s2144_s12 + $0x18] sm:$0xff]  ;;  %v1577_v43 = vld [vmem:[%s2144_s12 + $0x10] sm:$0xff]  ;;  %v1576_v44 = vld [vmem:[%s2144_s12 + $0x8] sm:$0xff] }
 0x881   :  { %1203 = vmatpush.bf16.msra.mxu1 %v1578_v42 }
 0x882   :  { %1522 = vmatmul.msk.bf16.vlgmr.msrb.gmra.mxu3 %vm184_vm1, %v1022_v45  ;;  %v1575_v45 = vld [vmem:[%s2144_s12] sm:$0xff] }
 0x885   :  { %1204 = vmatpush.bf16.msra.mxu1 %v1577_v43 }
 0x887   :  { %v1020_v46 = vpop.f32.mrf.mxu2 }
 0x889   :  { %1205 = vmatpush.bf16.msra.mxu1 %v1576_v44 }
 0x88d   :  { %1206 = vmatpush.bf16.msra.mxu1 %v1575_v45 }
 0x905   :  { %v1040_v50 = vpop.f32.mrf.mxu3 }
 0x906   :  { %v1045_v51 = vadd.f32 %v1040_v50, %v2023_v1  ;;  %v1065_v1 = vsub.f32 1.0, %v1064_v0 }
 0x908   :  { %v1051_v52 = vadd.f32 %v1596_v47, %v1045_v51  ;;  %v1066_v2 = vmul.f32 %v1638_v63, %v1065_v1 }
 0x90a   :  { %v1053_v53 = vadd.f32 %v1051_v52, %v1802_v4  ;;  %v1067_v3 = vadd.f32 %v1638_v63, %v1066_v2 }
 0x90c   :  { %v1057_v54 = vsel %vm94_vm0, %v1053_v53, 0.0  ;;  %v2060_v4 = vsel %vm1068_vm7, %v1638_v63, %v1067_v3 }
 0x90d   :  { %1058 = vadd.xlane.f32.xlu1 %v1057_v54  ;;  %v1042_v55 = vpop.f32.mrf.mxu3 }
 0x90e   :  { %v1046_v56 = vadd.f32 %v1042_v55, %v2029_v7 }
 0x910   :  { %v1052_v57 = vadd.f32 %v1596_v47, %v1046_v56  ;;  %v1599_v47 = vld [vmem:[%s2143_s11] ss:$0 sm:$0xff] }
 0x911   :  { %v1600_v56 = vld [vmem:[%s2173_s7] ss:$0 sm:$0xff] }
 0x912   :  { %v1054_v58 = vadd.f32 %v1052_v57, %v1807_v5 }
 0x914   :  { %v1060_v59 = vsel %vm94_vm0, %v1054_v58, 0.0 }
 0x915   :  { %1061 = vadd.xlane.f32.xlu2 %v1060_v59 }
 0x980   :  { %v1059_v8 = vpop.xlane.xlu1 %1058 }
 0x981   :  { %v1070_v9 = vmul.f32 %v2060_v4, %v1059_v8 }
 0x983   :  { %v1072_v7 = vsub.f32 %v1053_v53, %v1070_v9 }
 0x985   :  { %v1074_v10 = vmul.f32 %v1072_v7, %v1072_v7 }
 0x987   :  { %v1076_v5 = vsel %vm94_vm0, %v1074_v10, 0.0 }
 0x988   :  { %1077 = vadd.xlane.f32.xlu0 %v1076_v5  ;;  %v1062_v11 = vpop.xlane.xlu2 %1061 }
 0x989   :  { %v1071_v48 = vmul.f32 %v2060_v4, %v1062_v11 }
 0x98b   :  { %v1073_v60 = vsub.f32 %v1054_v58, %v1071_v48 }
 0x98d   :  { %v1075_v12 = vmul.f32 %v1073_v60, %v1073_v60 }
 0x98f   :  { %v1079_v6 = vsel %vm94_vm0, %v1075_v12, 0.0 }
 0x990   :  { %1080 = vadd.xlane.f32.xlu1 %v1079_v6 }
 0x9fb   :  { %v1078_v61 = vpop.xlane.xlu0 %1077 }
 0x9fc   :  { %v1082_v13 = vmul.f32 %v1078_v61, %v2060_v4 }
 0x9fe   :  { %v1084_v15 = vadd.f32 1e-05, %v1082_v13 }
 0xa00   :  { %1639 = vrsqrt.f32 %v1084_v15  ;;  %vm1092_vm9 = vweird.f32 %v1084_v15 }
 0xa03   :  { %v1081_v16 = vpop.xlane.xlu1 %1080 }
 0xa04   :  { %v1083_v35 = vmul.f32 %v1081_v16, %v2060_v4 }
 0xa06   :  { %v1640_v17 = vpop.eup %1639  ;;  %v1085_v18 = vadd.f32 1e-05, %v1083_v35 }
 0xa07   :  { %v1087_v19 = vmul.f32 %v1640_v17, %v1084_v15  ;;  %vm1093_vm8 = vweird.f32 %v1640_v17 }
 0xa08   :  { %1641 = vrsqrt.f32 %v1085_v18  ;;  %vm1094_vm10 = vmor %vm1092_vm9, %vm1093_vm8  ;;  %vm1102_vm12 = vweird.f32 %v1085_v18 }
 0xa09   :  { %v1088_v20 = vmul.f32 %v1640_v17, %v1087_v19 }
 0xa0b   :  { %v1089_v38 = vmul.f32 0.5, %v1088_v20 }
 0xa0d   :  { %v1090_v21 = vsub.f32 1.5, %v1089_v38 }
 0xa0e   :  { %v1642_v22 = vpop.eup %1641 }
 0xa0f   :  { %v1091_v23 = vmul.f32 %v1640_v17, %v1090_v21  ;;  %v1097_v24 = vmul.f32 %v1642_v22, %v1085_v18  ;;  %vm1103_vm11 = vweird.f32 %v1642_v22 }
 0xa10   :  { %vm1104_vm13 = vmor %vm1102_vm12, %vm1103_vm11 }
 0xa11   :  { %v1098_v25 = vmul.f32 %v1642_v22, %v1097_v24  ;;  %v1095_v26 = vsel %vm1094_vm10, %v1640_v17, %v1091_v23 }
 0xa12   :  { %v1106_v30 = vmul.f32 %v1095_v26, %v1072_v7  ;;  %v1602_v26 = vld [vmem:[%s2149_s17] ss:$0 sm:$0xff] }
 0xa13   :  { %v1099_v27 = vmul.f32 0.5, %v1098_v25 }
 0xa14   :  { %v1111_v34 = vmul.f32 %v1597_v29, %v1106_v30 }
 0xa15   :  { %v1100_v28 = vsub.f32 1.5, %v1099_v27 }
 0xa16   :  { %v1116_v39 = vadd.f32 %v1598_v33, %v1111_v34 }
 0xa17   :  { %v1101_v31 = vmul.f32 %v1642_v22, %v1100_v28 }
 0xa19   :  { %v1105_v32 = vsel %vm1104_vm13, %v1642_v22, %v1101_v31  ;;  %v1601_v22 = vld [vmem:[%s2148_s16] ss:$0 sm:$0xff] }
 0xa1a   :  { %v1107_v36 = vmul.f32 %v1105_v32, %v1073_v60 }
 0xa1c   :  { %v1112_v37 = vmul.f32 %v1597_v29, %v1107_v36 }
 0xa1e   :  { %v1117_v40 = vadd.f32 %v1598_v33, %v1112_v37 }
 0xa20   :  { %v1118_v41 = vpack.c.bf16 %v1117_v40, %v1116_v39 }
 0xa22   :  { %1531 = vmatmul.msk.bf16.vlgmr.msra.gmra.mxu0 %vm94_vm0, %v1118_v41 }
 0xa9f   :  { %v1151_v46 = vpop.f32.mrf.mxu0 }
 0xaa0   :  { %v1152_v50 = vadd.f32 %v1599_v47, %v1151_v46 }
 0xaa2   :  { %v1156_v53 = vmax.f32 %v1152_v50, 0.0 }
 0xaa7   :  { %v1153_v51 = vpop.f32.mrf.mxu0 }
 0xaa8   :  { %v1154_v52 = vadd.f32 %v1599_v47, %v1153_v51 }
 0xaaa   :  { %v1157_v54 = vmax.f32 %v1154_v52, 0.0 }
 0xaac   :  { %v1158_v55 = vpack.c.bf16 %v1157_v54, %v1156_v53 }
 0xaae   :  { %1548 = vmatmul.msk.bf16.vlgmr.msra.gmra.mxu1 %vm1195_vm14, %v1158_v55 }
 0xb2b   :  { %v1208_v57 = vpop.f32.mrf.mxu1 }
 0xb2c   :  { %v1209_v58 = vadd.f32 %v1600_v56, %v1208_v57 }
 0xb2e   :  { %v1213_v59 = vadd.f32 %v1209_v58, %v1116_v39 }
 0xb30   :  { %v1217_v62 = vsel %vm94_vm0, %v1213_v59, 0.0 }
 0xb31   :  { %1218 = vadd.xlane.f32.xlu2 %v1217_v62 }
 0xb33   :  { %v1210_v63 = vpop.f32.mrf.mxu1 }
 0xb34   :  { %v1211_v0 = vadd.f32 %v1600_v56, %v1210_v63 }
 0xb36   :  { %v1214_v1 = vadd.f32 %v1211_v0, %v1117_v40 }
 0xb38   :  { %v1220_v2 = vsel %vm94_vm0, %v1214_v1, 0.0 }
 0xb39   :  { %1221 = vadd.xlane.f32.xlu0 %v1220_v2 }
 0xba4   :  { %v1219_v3 = vpop.xlane.xlu2 %1218 }
 0xba5   :  { %v1223_v8 = vmul.f32 %v1219_v3, %v2060_v4 }
 0xba7   :  { %v1225_v9 = vsub.f32 %v1213_v59, %v1223_v8  ;;  %v1603_v8 = vld [vmem:[%s2150_s18] ss:$0 sm:$0xff]  ;;  %s1679_s18 = smov [#allocation2]  }
 0xba8   :  { %s1333_s9 = sshll.u32 %s1679_s18, 4  ;;  %s1334_s9 = int_to_ptr.vmem [resolvable:$true] %s1333_s9 }
 0xba9   :  { %v1227_v7 = vmul.f32 %v1225_v9, %v1225_v9 }
 0xbab   :  { %v1229_v10 = vsel %vm94_vm0, %v1227_v7, 0.0 }
 0xbac   :  { %v1222_v5 = vpop.xlane.xlu0 %1221  ;;  %1230 = vadd.xlane.f32.xlu1 %v1229_v10  ;;  %v1604_v10 = vld [vmem:[%s2151_s19] ss:$0 sm:$0xff]  ;;  %s1680_s19 = smov 128  }
 0xbad   :  { %v1224_v11 = vmul.f32 %v1222_v5, %v2060_v4 }
 0xbaf   :  { %v1226_v48 = vsub.f32 %v1214_v1, %v1224_v11 }
 0xbb1   :  { %v1228_v60 = vmul.f32 %v1226_v48, %v1226_v48 }
 0xbb3   :  { %v1232_v12 = vsel %vm94_vm0, %v1228_v60, 0.0 }
 0xbb4   :  { %1233 = vadd.xlane.f32.xlu2 %v1232_v12 }
 0xc1f   :  { %v1231_v6 = vpop.xlane.xlu1 %1230 }
 0xc20   :  { %v1235_v49 = vmul.f32 %v1231_v6, %v2060_v4 }
 0xc22   :  { %v1237_v61 = vadd.f32 1e-05, %v1235_v49 }
 0xc24   :  { %1643 = vrsqrt.f32 %v1237_v61  ;;  %vm1245_vm1 = vweird.f32 %v1237_v61 }
 0xc27   :  { %v1234_v13 = vpop.xlane.xlu2 %1233 }
 0xc28   :  { %v1236_v14 = vmul.f32 %v1234_v13, %v2060_v4 }
 0xc2a   :  { %v1644_v15 = vpop.eup %1643  ;;  %v1238_v16 = vadd.f32 1e-05, %v1236_v14 }
 0xc2b   :  { %v1240_v35 = vmul.f32 %v1644_v15, %v1237_v61  ;;  %vm1246_vm15 = vweird.f32 %v1644_v15 }
 0xc2c   :  { %1645 = vrsqrt.f32 %v1238_v16  ;;  %vm1247_vm2 = vmor %vm1245_vm1, %vm1246_vm15  ;;  %vm1255_vm4 = vweird.f32 %v1238_v16 }
 0xc2d   :  { %v1241_v17 = vmul.f32 %v1644_v15, %v1240_v35 }
 0xc2f   :  { %v1242_v18 = vmul.f32 0.5, %v1241_v17 }
 0xc31   :  { %v1243_v19 = vsub.f32 1.5, %v1242_v18 }
 0xc32   :  { %v1646_v20 = vpop.eup %1645 }
 0xc33   :  { %v1244_v38 = vmul.f32 %v1644_v15, %v1243_v19  ;;  %v1250_v21 = vmul.f32 %v1646_v20, %v1238_v16  ;;  %vm1256_vm3 = vweird.f32 %v1646_v20 }
 0xc34   :  { %vm1257_vm5 = vmor %vm1255_vm4, %vm1256_vm3 }
 0xc35   :  { %v1251_v23 = vmul.f32 %v1646_v20, %v1250_v21  ;;  %v1248_v24 = vsel %vm1247_vm2, %v1644_v15, %v1244_v38 }
 0xc36   :  { %v1259_v25 = vmul.f32 %v1248_v24, %v1225_v9 }
 0xc37   :  { %v1252_v27 = vmul.f32 0.5, %v1251_v23 }
 0xc38   :  { %v1264_v28 = vmul.f32 %v1601_v22, %v1259_v25 }
 0xc39   :  { %v1253_v29 = vsub.f32 1.5, %v1252_v27 }
 0xc3a   :  { %v1269_v30 = vadd.f32 %v1602_v26, %v1264_v28 }
 0xc3b   :  { %v1254_v31 = vmul.f32 %v1646_v20, %v1253_v29 }
 0xc3c   :  { %v1273_v32 = vsel %vm94_vm0, %v1269_v30, 0.0 }
 0xc3d   :  { %1274 = vadd.xlane.f32.xlu0 %v1273_v32  ;;  %v1258_v33 = vsel %vm1257_vm5, %v1646_v20, %v1254_v31 }
 0xc3e   :  { %v1260_v34 = vmul.f32 %v1258_v33, %v1226_v48 }
 0xc40   :  { %v1265_v36 = vmul.f32 %v1601_v22, %v1260_v34 }
 0xc42   :  { %v1270_v37 = vadd.f32 %v1602_v26, %v1265_v36 }
 0xc44   :  { %v1276_v39 = vsel %vm94_vm0, %v1270_v37, 0.0 }
 0xc45   :  { %1277 = vadd.xlane.f32.xlu1 %v1276_v39 }
 0xcb0   :  { %v1275_v40 = vpop.xlane.xlu0 %1274 }
 0xcb1   :  { %v1279_v41 = vmul.f32 %v1275_v40, %v2060_v4 }
 0xcb3   :  { %v1281_v42 = vsub.f32 %v1269_v30, %v1279_v41 }
 0xcb5   :  { %v1283_v43 = vmul.f32 %v1281_v42, %v1281_v42 }
 0xcb7   :  { %v1285_v44 = vsel %vm94_vm0, %v1283_v43, 0.0 }
 0xcb8   :  { %1286 = vadd.xlane.f32.xlu2 %v1285_v44  ;;  %v1278_v45 = vpop.xlane.xlu1 %1277 }
 0xcb9   :  { %v1280_v46 = vmul.f32 %v1278_v45, %v2060_v4 }
 0xcbb   :  { %v1282_v47 = vsub.f32 %v1270_v37, %v1280_v46 }
 0xcbd   :  { %v1284_v50 = vmul.f32 %v1282_v47, %v1282_v47 }
 0xcbf   :  { %v1288_v51 = vsel %vm94_vm0, %v1284_v50, 0.0 }
 0xcc0   :  { %1289 = vadd.xlane.f32.xlu0 %v1288_v51 }
 0xd2b   :  { %v1287_v52 = vpop.xlane.xlu2 %1286 }
 0xd2c   :  { %v1291_v53 = vmul.f32 %v1287_v52, %v2060_v4 }
 0xd2e   :  { %v1293_v54 = vadd.f32 1e-05, %v1291_v53 }
 0xd30   :  { %1647 = vrsqrt.f32 %v1293_v54  ;;  %vm1301_vm7 = vweird.f32 %v1293_v54 }
 0xd33   :  { %v1290_v55 = vpop.xlane.xlu0 %1289 }
 0xd34   :  { %v1292_v56 = vmul.f32 %v1290_v55, %v2060_v4 }
 0xd36   :  { %v1648_v57 = vpop.eup %1647  ;;  %v1294_v58 = vadd.f32 1e-05, %v1292_v56 }
 0xd37   :  { %v1296_v59 = vmul.f32 %v1648_v57, %v1293_v54  ;;  %vm1302_vm6 = vweird.f32 %v1648_v57 }
 0xd38   :  { %1649 = vrsqrt.f32 %v1294_v58  ;;  %vm1303_vm8 = vmor %vm1301_vm7, %vm1302_vm6  ;;  %vm1311_vm10 = vweird.f32 %v1294_v58 }
 0xd39   :  { %v1297_v62 = vmul.f32 %v1648_v57, %v1296_v59 }
 0xd3b   :  { %v1298_v63 = vmul.f32 0.5, %v1297_v62 }
 0xd3d   :  { %v1299_v0 = vsub.f32 1.5, %v1298_v63 }
 0xd3e   :  { %v1650_v1 = vpop.eup %1649 }
 0xd3f   :  { %v1300_v2 = vmul.f32 %v1648_v57, %v1299_v0  ;;  %v1306_v3 = vmul.f32 %v1650_v1, %v1294_v58  ;;  %vm1312_vm9 = vweird.f32 %v1650_v1 }
 0xd40   :  { %vm1313_vm11 = vmor %vm1311_vm10, %vm1312_vm9 }
 0xd41   :  { %v1304_v9 = vsel %vm1303_vm8, %v1648_v57, %v1300_v2  ;;  %v1307_v7 = vmul.f32 %v1650_v1, %v1306_v3 }
 0xd42   :  { %v1315_v4 = vmul.f32 %v1304_v9, %v1281_v42 }
 0xd43   :  { %v1308_v5 = vmul.f32 0.5, %v1307_v7 }
 0xd44   :  { %v1320_v11 = vmul.f32 %v1603_v8, %v1315_v4 }
 0xd45   :  { %v1309_v48 = vsub.f32 1.5, %v1308_v5 }
 0xd46   :  { %v1325_v60 = vadd.f32 %v1604_v10, %v1320_v11 }
 0xd47   :  { %v1310_v12 = vmul.f32 %v1650_v1, %v1309_v48 }
 0xd48   :  { %1327 = vst.msk [vmem:[#allocation2] sm:$0xff] %vm94_vm0, %v1325_v60 }
 0xd49   :  { %v1314_v6 = vsel %vm1313_vm11, %v1650_v1, %v1310_v12 }
 0xd4a   :  { %v1316_v49 = vmul.f32 %v1314_v6, %v1282_v47 }
 0xd4c   :  { %v1321_v61 = vmul.f32 %v1603_v8, %v1316_v49 }
 0xd4e   :  { %v1326_v13 = vadd.f32 %v1604_v10, %v1321_v61 }
 0xd50   :  { %1328 = vst.msk [vmem:[#allocation2 + $0x8] sm:$0xff] %vm94_vm0, %v1326_v13 }
 0xd51   :  { %1341 = dma.vmem_to_hbm [thread:$0]  %s1334_s9, 256, %s1336_s10, [#allocation3], %s1680_s19, %s1680_s19, %s1681_s4  }
 0xd52   :  { %1675 = dma.done.wait [#allocation3], 256  }
 0xd53   :  { %1676 = vsyncadd [#allocation3], 4294967040 }
 0xd54   :  { %1346 = vsyncpa [#allocation3], 1 }

// kernel: encoder_fwd.2
= control target key start
LH: loop header
LB: loop body
LE: loop exit
PB: predicated region body
PF: predicated region fallthrough
CT: control target
= control target key end

     0   :  { %vm93_vm0 = vcmask 261120   ;;  %vm183_vm1 = vcmask 64512   ;;  %v1571_v29 = vmov 0   ;;  %vm261_vm6 = vcmask 1043456   ;;  %s2012_s2 = inlined_call_operand.vmem [shape: bf16[4,32,8], index: 2, kind: input, shape index: {}]   ;;  %s2013_s18 = inlined_call_operand.vmem [shape: f32[1,32], index: 18, kind: input, shape index: {}]   ;;  %s2014_s19 = inlined_call_operand.vmem [shape: f32[1,32], index: 19, kind: input, shape index: {}]   ;;  %s2015_s3 = inlined_call_operand.vmem [shape: bf16[4,32,8], index: 3, kind: input, shape index: {}]   ;;  %s2016_s0 = inlined_call_operand.vmem [shape: f32[2,8,32], index: 0, kind: input, shape index: {}]   ;;  %s2017_s5 = inlined_call_operand.vmem [shape: f32[4,1,8], index: 5, kind: input, shape index: {}]   ;;  %s2018_s6 = inlined_call_operand.vmem [shape: f32[4,1,8], index: 6, kind: input, shape index: {}]   ;;  %s2019_s1 = inlined_call_operand.vmem [shape: s32[2,1,8], index: 1, kind: input, shape index: {}]   ;;  %s2020_s4 = inlined_call_operand.vmem [shape: bf16[4,32,8], index: 4, kind: input, shape index: {}]   ;;  %s2021_s7 = inlined_call_operand.vmem [shape: f32[4,1,8], index: 7, kind: input, shape index: {}]   ;;  %s2022_s8 = inlined_call_operand.vmem [shape: bf16[4,8,32], index: 8, kind: input, shape index: {}]   ;;  %s2023_s9 = inlined_call_operand.vmem [shape: f32[1,32], index: 9, kind: input, shape index: {}]   ;;  %s2024_s14 = inlined_call_operand.vmem [shape: f32[1,32], index: 14, kind: input, shape index: {}]   ;;  %s2025_s15 = inlined_call_operand.vmem [shape: f32[1,32], index: 15, kind: input, shape index: {}]   ;;  %s2026_s11 = inlined_call_operand.vmem [shape: f32[1,64], index: 11, kind: input, shape index: {}]   ;;  %s2027_s10 = inlined_call_operand.vmem [shape: bf16[32,64], index: 10, kind: input, shape index: {}]   ;;  %s2028_s13 = inlined_call_operand.vmem [shape: f32[1,32], index: 13, kind: input, shape index: {}]   ;;  %s2029_s12 = inlined_call_operand.vmem [shape: bf16[64,32], index: 12, kind: input, shape index: {}]   ;;  %s2030_s16 = inlined_call_operand.vmem [shape: f32[1,32], index: 16, kind: input, shape index: {}]   ;;  %s2031_s17 = inlined_call_operand.vmem [shape: f32[1,32], index: 17, kind: input, shape index: {}]   ;;  %s2032_s20 = inlined_call_operand.vmem [shape: f32[2,8,32], index: 20, kind: output, shape index: {}]  }
   0x1   :  { %2036 = sst [smem:[#allocation2_spill]] %s2012_s2  ;;  %v1511_v7 = vld [vmem:[%s2018_s6] ss:$0 sm:$0xff]  ;;  %v70_v28 = vld [vmem:[%s2019_s1 + $0x1] sm:$0x1]  ;;  %v1483_v44 = vld [vmem:[%s2020_s4 + $0x8] sm:$0xff] }
   0x2   :  { %2037 = sst [smem:[#allocation3_spill]] %s2015_s3  ;;  %v1510_v9 = vld [vmem:[%s2017_s5] ss:$0 sm:$0xff]  ;;  %vm72_vm3 = vcmp.ne.s32.totalorder %v70_v28, 0  ;;  %171 = vmatpush.bf16.msra.mxu2 %v1483_v44  ;;  %v1513_v48 = vld [vmem:[%s2017_s5 + $0x1] ss:$0 sm:$0xff] }
   0x3   :  { %2038 = sst [smem:[#allocation4_spill]] %s2016_s0  ;;  %v69_v27 = vld [vmem:[%s2019_s1] sm:$0x1]  ;;  %v225_v31 = vsel %vm72_vm3, 1, %v1571_v29  ;;  %v1512_v50 = vld [vmem:[%s2018_s6 + $0x1] ss:$0 sm:$0xff] }
   0x4   :  { %2039 = sst [smem:[#allocation5_spill]] %s2026_s11  ;;  %vm71_vm2 = vcmp.ne.s32.totalorder %v69_v27, 0  ;;  %v227_v33 = vperm.slane %v225_v31, 0  ;;  %v1482_v46 = vld [vmem:[%s2020_s4] sm:$0xff]  ;;  %v1488_v28 = vld [vmem:[%s2020_s4 + $0x10] sm:$0xff]  ;;  %vm1194_vm14 = vcmask 523264  }
   0x5   :  { %s2040_s23 = sld [smem:[#allocation2_spill]]  ;;  %v224_v30 = vsel %vm71_vm2, 1, %v1571_v29  ;;  %v298_v44 = vld [vmem:[%s2022_s8] sm:$0xf] }
   0x6   :  { %s2041_s11 = sld [smem:[#allocation3_spill]]  ;;  %v226_v32 = vperm.slane %v224_v30, 0  ;;  %vm1744_vm5 = vcmp.eq.s32.totalorder %v227_v33, 1  ;;  %172 = vmatpush.bf16.msra.mxu2 %v1482_v46 }
   0x7   :  { %s2042_s29 = sld [smem:[#allocation4_spill]] }
   0x8   :  { %vm1740_vm4 = vcmp.eq.s32.totalorder %v226_v32, 1  ;;  %s2047_s3 = sld [smem:[#allocation5_spill]] }
   0xb   :  { %v1479_v0 = vld [vmem:[%s2040_s23 + $0x8] sm:$0xff]  ;;  %v1478_v2 = vld [vmem:[%s2040_s23] sm:$0xff]  ;;  %v1485_v13 = vld [vmem:[%s2040_s23 + $0x18] sm:$0xff] }
   0xc   :  { %v1481_v1 = vld [vmem:[%s2041_s11 + $0x8] sm:$0xff]  ;;  %v1480_v3 = vld [vmem:[%s2041_s11] sm:$0xff]  ;;  %103 = vmatpush.bf16.msra.mxu0 %v1479_v0  ;;  %v1484_v16 = vld [vmem:[%s2040_s23 + $0x10] sm:$0xff] }
   0xd   :  { %v1693_v4 = vld [vmem:[%s2042_s29] sm:$0xff]  ;;  %137 = vmatpush.bf16.msra.mxu1 %v1481_v1  ;;  %v1698_v5 = vld [vmem:[%s2042_s29 + $0x8] sm:$0xff]  ;;  %v1487_v21 = vld [vmem:[%s2041_s11 + $0x18] sm:$0xff] }
   0xe   :  { %v1702_v6 = vpack.c.bf16 %v1698_v5, %v1693_v4  ;;  %v1486_v25 = vld [vmem:[%s2041_s11 + $0x10] sm:$0xff] }
  0x10   :  { %104 = vmatpush.bf16.msra.mxu0 %v1478_v2  ;;  %1302 = vmatmul.msk.bf16.vlgmr.msra.gmra.mxu2 %vm93_vm0, %v1702_v6 }
  0x11   :  { %138 = vmatpush.bf16.msra.mxu1 %v1480_v3 }
  0x13   :  { %1284 = vmatmul.msk.bf16.vlgmr.msra.gmra.mxu0 %vm93_vm0, %v1702_v6 }
  0x14   :  { %1293 = vmatmul.msk.bf16.vlgmr.msra.gmra.mxu1 %vm93_vm0, %v1702_v6 }
  0x90   :  { %v106_v11 = vpop.f32.mrf.mxu0 }
  0x91   :  { %v140_v8 = vpop.f32.mrf.mxu1  ;;  %v107_v14 = vadd.f32 %v1510_v9, %v106_v11 }
  0x92   :  { %v141_v10 = vadd.f32 %v1511_v7, %v140_v8 }
  0x93   :  { %v179_v18 = vpack.c.bf16 %v107_v14, %v107_v14  ;;  %v174_v11 = vpop.f32.mrf.mxu2 }
  0x94   :  { %v181_v12 = vpack.c.bf16 %v141_v10, %v141_v10  ;;  %v1514_v10 = vld [vmem:[%s2021_s7] ss:$0 sm:$0xff] }
  0x96   :  { %v188_v15 = vsel %vm183_vm1, %v181_v12, 0  ;;  %v175_v12 = vadd.f32 %v1514_v10, %v174_v11 }
  0x97   :  { %197 = vmatpush.bf16.xpose.msra.mxu3 %v188_v15 }
  0x98   :  { %v108_v22 = vpop.f32.mrf.mxu0 }
  0x99   :  { %v142_v17 = vpop.f32.mrf.mxu1  ;;  %v109_v24 = vadd.f32 %v1510_v9, %v108_v22 }
  0x9a   :  { %v143_v19 = vadd.f32 %v1511_v7, %v142_v17 }
  0x9b   :  { %v180_v26 = vpack.c.bf16 %v109_v24, %v109_v24 }
  0x9c   :  { %v182_v20 = vpack.c.bf16 %v143_v19, %v143_v19 }
  0x9e   :  { %1303 = vmatmul.msk.bf16.vlgmr.msra.gmra.mxu3 %vm183_vm1, %v179_v18  ;;  %v207_v23 = vsel %vm183_vm1, %v182_v20, 0 }
  0x9f   :  { %327 = vmatpush.bf16.msrb.mxu3 %v1485_v13  ;;  %216 = vmatpush.bf16.xpose.msrb.mxu0 %v207_v23  ;;  %v256_v13 = vpack.c.bf16 %v175_v12, %v175_v12 }
  0xa1   :  { %v263_v14 = vsel %vm261_vm6, %v256_v13, 0 }
  0xa2   :  { %272 = vmatpush.bf16.msrb.mxu1 %v263_v14 }
  0xa3   :  { %328 = vmatpush.bf16.msrb.mxu3 %v1484_v16  ;;  %v176_v16 = vpop.f32.mrf.mxu2 }
  0xa4   :  { %v177_v17 = vadd.f32 %v1514_v10, %v176_v16  ;;  %v1492_v16 = vld [vmem:[%s2041_s11 + $0x20] sm:$0xff] }
  0xa6   :  { %1304 = vmatmul.msk.bf16.vlgmr.msrb.gmra.mxu0 %vm183_vm1, %v180_v26  ;;  %v257_v18 = vpack.c.bf16 %v177_v17, %v177_v17  ;;  %v1489_v26 = vld [vmem:[%s2020_s4 + $0x18] sm:$0xff]  ;;  %v1491_v17 = vld [vmem:[%s2040_s23 + $0x28] sm:$0xff] }
  0xa7   :  { %363 = vmatpush.bf16.msra.mxu0 %v1487_v21  ;;  %399 = vmatpush.bf16.msra.mxu1 %v1489_v26  ;;  %v1516_v26 = vld [vmem:[%s2018_s6 + $0x2] ss:$0 sm:$0xff] }
  0xa8   :  { %v282_v20 = vsel %vm261_vm6, %v257_v18, 0  ;;  %v1490_v18 = vld [vmem:[%s2040_s23 + $0x20] sm:$0xff] }
  0xa9   :  { %291 = vmatpush.bf16.msrb.mxu2 %v282_v20 }
  0xab   :  { %364 = vmatpush.bf16.msra.mxu0 %v1486_v25  ;;  %400 = vmatpush.bf16.msra.mxu1 %v1488_v28 }
  0xae   :  { %1320 = vmatmul.msk.bf16.vlgmr.msrb.gmra.mxu3 %vm93_vm0, %v1702_v6 }
  0xb6   :  { %1334 = vmatmul.msk.bf16.vlgmr.msra.gmra.mxu0 %vm93_vm0, %v1702_v6 }
 0x121   :  { %v199_v34 = vpop.f32.mrf.mxu3 }
 0x122   :  { %v222_v36 = vmul.f32 0.35355338, %v199_v34 }
 0x123   :  { %v218_v37 = vpop.f32.mrf.mxu0 }
 0x124   :  { %v223_v39 = vmul.f32 0.35355338, %v218_v37  ;;  %v230_v40 = vsel %vm1740_vm4, %v222_v36, -1e+30 }
 0x125   :  { %v232_v41 = vsel %vm183_vm1, %v230_v40, -inf }
 0x126   :  { %233 = vmax.xlane.f32.xlu1 %v232_v41  ;;  %v231_v42 = vsel %vm1744_vm5, %v223_v39, -1e+30 }
 0x127   :  { %v235_v43 = vsel %vm183_vm1, %v231_v42, -inf }
 0x128   :  { %236 = vmax.xlane.f32.xlu0 %v235_v43 }
 0x129   :  { %v201_v45 = vpop.f32.mrf.mxu3 }
 0x12a   :  { %v544_v45 = vsel %vm261_vm6, %v298_v44, 0 }
 0x12b   :  { %v220_v47 = vpop.f32.mrf.mxu0 }
 0x131   :  { %v330_v49 = vpop.f32.mrf.mxu3 }
 0x132   :  { %v1768_v51 = vadd.f32 %v1513_v48, %v330_v49 }
 0x133   :  { %v366_v52 = vpop.f32.mrf.mxu0 }
 0x134   :  { %v367_v53 = vadd.f32 %v1512_v50, %v366_v52  ;;  %v407_v37 = vpack.c.bf16 %v1768_v51, %v1768_v51 }
 0x136   :  { %v409_v15 = vpack.c.bf16 %v367_v53, %v367_v53 }
 0x138   :  { %v415_v19 = vsel %vm183_vm1, %v409_v15, 0  ;;  %v1493_v15 = vld [vmem:[%s2041_s11 + $0x28] sm:$0xff] }
 0x139   :  { %v332_v56 = vpop.f32.mrf.mxu3  ;;  %424 = vmatpush.bf16.xpose.msra.mxu2 %v415_v19 }
 0x13a   :  { %v333_v59 = vadd.f32 %v1513_v48, %v332_v56 }
 0x13b   :  { %v368_v54 = vpop.f32.mrf.mxu0 }
 0x13c   :  { %v369_v55 = vadd.f32 %v1512_v50, %v368_v54  ;;  %v408_v60 = vpack.c.bf16 %v333_v59, %v333_v59  ;;  %v1515_v50 = vld [vmem:[%s2021_s7 + $0x1] ss:$0 sm:$0xff] }
 0x13e   :  { %v410_v57 = vpack.c.bf16 %v369_v55, %v369_v55 }
 0x140   :  { %v434_v58 = vsel %vm183_vm1, %v410_v57, 0 }
 0x141   :  { %443 = vmatpush.bf16.xpose.msra.mxu3 %v434_v58 }
 0x148   :  { %1350 = vmatmul.msk.bf16.vlgmr.msra.gmra.mxu3 %vm183_vm1, %v408_v60 }
 0x149   :  { %553 = vmatpush.bf16.msrb.mxu3 %v544_v45 }
 0x199   :  { %v234_v61 = vpop.xlane.xlu1 %233 }
 0x19a   :  { %v238_v62 = vsub.f32 %v230_v40, %v234_v61 }
 0x19b   :  { %v237_v63 = vpop.xlane.xlu0 %236 }
 0x19c   :  { %v240_v0 = vmul.f32 1.442695, %v238_v62  ;;  %v239_v1 = vsub.f32 %v231_v42, %v237_v63 }
 0x19e   :  { %1529 = vpow2.f32 %v240_v0  ;;  %v242_v2 = vmul.f32 1.442695, %v239_v1 }
 0x1a0   :  { %1531 = vpow2.f32 %v242_v2 }
 0x1a4   :  { %v1530_v3 = vpop.eup %1529 }
 0x1a5   :  { %v244_v7 = vsel %vm183_vm1, %v1530_v3, 0.0 }
 0x1a6   :  { %v1532_v8 = vpop.eup %1531  ;;  %245 = vadd.xlane.f32.xlu1 %v244_v7 }
 0x1a7   :  { %v247_v9 = vsel %vm183_vm1, %v1532_v8, 0.0 }
 0x1a8   :  { %248 = vadd.xlane.f32.xlu0 %v247_v9 }
 0x1cb   :  { %v445_v21 = vpop.f32.mrf.mxu3 }
 0x1cc   :  { %v450_v22 = vmul.f32 0.35355338, %v445_v21 }
 0x1ce   :  { %v452_v23 = vsel %vm1744_vm5, %v450_v22, -1e+30 }
 0x1cf   :  { %v456_v24 = vsel %vm183_vm1, %v452_v23, -inf }
 0x1d0   :  { %457 = vmax.xlane.f32.xlu2 %v456_v24 }
 0x1d3   :  { %v447_v25 = vpop.f32.mrf.mxu3 }
 0x219   :  { %v246_v27 = vpop.xlane.xlu1 %245 }
 0x21a   :  { %1533 = vrcp.f32 %v246_v27 }
 0x21b   :  { %v249_v29 = vpop.xlane.xlu0 %248 }
 0x21c   :  { %1535 = vrcp.f32 %v249_v29 }
 0x220   :  { %v1534_v30 = vpop.eup %1533 }
 0x221   :  { %v252_v31 = vmul.f32 %v1534_v30, %v1530_v3 }
 0x222   :  { %v1536_v32 = vpop.eup %1535 }
 0x223   :  { %v253_v33 = vmul.f32 %v1536_v32, %v1532_v8  ;;  %v254_v34 = vpack.c.bf16 %v252_v31, %v252_v31 }
 0x225   :  { %1305 = vmatmul.msk.bf16.vlgmr.msrb.gmra.mxu1 %vm183_vm1, %v254_v34  ;;  %v255_v36 = vpack.c.bf16 %v253_v33, %v253_v33 }
 0x227   :  { %1306 = vmatmul.msk.bf16.vlgmr.msrb.gmra.mxu2 %vm183_vm1, %v255_v36 }
 0x235   :  { %1348 = vmatmul.msk.bf16.vlgmr.msra.gmra.mxu1 %vm93_vm0, %v1702_v6 }
 0x237   :  { %1349 = vmatmul.msk.bf16.vlgmr.msra.gmra.mxu2 %vm183_vm1, %v407_v37 }
 0x243   :  { %v458_v39 = vpop.xlane.xlu2 %457 }
 0x244   :  { %v460_v40 = vsub.f32 %v452_v23, %v458_v39  ;;  %v1353_v23 = vld [vmem:[%s2022_s8 + $0x4] sm:$0xf]  ;;  %v1517_v39 = vld [vmem:[%s2017_s5 + $0x2] ss:$0 sm:$0xff] }
 0x245   :  { %v524_v24 = vsel %vm261_vm6, %v1353_v23, 0  ;;  %v1496_v23 = vld [vmem:[%s2040_s23 + $0x30] sm:$0xff] }
 0x246   :  { %v463_v41 = vmul.f32 1.442695, %v460_v40  ;;  %533 = vmatpush.bf16.msrb.mxu2 %v524_v24 }
 0x248   :  { %1537 = vpow2.f32 %v463_v41 }
 0x24e   :  { %v1538_v42 = vpop.eup %1537 }
 0x24f   :  { %v468_v43 = vsel %vm183_vm1, %v1538_v42, 0.0 }
 0x250   :  { %469 = vadd.xlane.f32.xlu0 %v468_v43 }
 0x2a2   :  { %v274_v46 = vpop.f32.mrf.mxu1 }
 0x2aa   :  { %v276_v47 = vpop.f32.mrf.mxu1  ;;  %v293_v48 = vpop.f32.mrf.mxu2 }
 0x2ab   :  { %v297_v49 = vpack.c.bf16 %v293_v48, %v274_v46  ;;  %v1495_v46 = vld [vmem:[%s2020_s4 + $0x28] sm:$0xff]  ;;  %v1494_v47 = vld [vmem:[%s2020_s4 + $0x20] sm:$0xff] }
 0x2ac   :  { %660 = vmatpush.bf16.msra.mxu2 %v1495_v46 }
 0x2ad   :  { %1355 = vmatmul.msk.bf16.vlgmr.msrb.gmra.mxu3 %vm183_vm1, %v297_v49 }
 0x2b0   :  { %661 = vmatpush.bf16.msra.mxu2 %v1494_v47 }
 0x2b2   :  { %v295_v51 = vpop.f32.mrf.mxu2  ;;  %v402_v52 = vpop.f32.mrf.mxu1 }
 0x2b3   :  { %v403_v53 = vadd.f32 %v1515_v50, %v402_v52 }
 0x2b5   :  { %v477_v54 = vpack.c.bf16 %v403_v53, %v403_v53 }
 0x2b7   :  { %v483_v55 = vsel %vm261_vm6, %v477_v54, 0 }
 0x2b8   :  { %492 = vmatpush.bf16.msrb.mxu0 %v483_v55 }
 0x2ba   :  { %v426_v56 = vpop.f32.mrf.mxu2  ;;  %v404_v57 = vpop.f32.mrf.mxu1 }
 0x2bb   :  { %v449_v58 = vmul.f32 0.35355338, %v426_v56  ;;  %v405_v59 = vadd.f32 %v1515_v50, %v404_v57 }
 0x2bc   :  { %588 = vmatpush.bf16.msra.mxu0 %v1491_v17 }
 0x2bd   :  { %v451_v60 = vsel %vm1740_vm4, %v449_v58, -1e+30  ;;  %v478_v61 = vpack.c.bf16 %v405_v59, %v405_v59 }
 0x2be   :  { %v453_v62 = vsel %vm183_vm1, %v451_v60, -inf }
 0x2bf   :  { %454 = vmax.xlane.f32.xlu2 %v453_v62  ;;  %v502_v63 = vsel %vm261_vm6, %v478_v61, 0  ;;  %v1518_v62 = vld [vmem:[%s2021_s7 + $0x2] ss:$0 sm:$0xff] }
 0x2c0   :  { %511 = vmatpush.bf16.msrb.mxu1 %v502_v63  ;;  %589 = vmatpush.bf16.msra.mxu0 %v1490_v18 }
 0x2c2   :  { %v428_v0 = vpop.f32.mrf.mxu2 }
 0x2c3   :  { %v470_v1 = vpop.xlane.xlu0 %469 }
 0x2c4   :  { %1539 = vrcp.f32 %v470_v1  ;;  %624 = vmatpush.bf16.msra.mxu1 %v1493_v15 }
 0x2c8   :  { %625 = vmatpush.bf16.msra.mxu1 %v1492_v16 }
 0x2ca   :  { %v1540_v2 = vpop.eup %1539 }
 0x2cb   :  { %v474_v3 = vmul.f32 %v1540_v2, %v1538_v42 }
 0x2cd   :  { %v476_v7 = vpack.c.bf16 %v474_v3, %v474_v3 }
 0x2cf   :  { %1352 = vmatmul.msk.bf16.vlgmr.msrb.gmra.mxu1 %vm183_vm1, %v476_v7 }
 0x2df   :  { %1383 = vmatmul.msk.bf16.vlgmr.msra.gmra.mxu1 %vm93_vm0, %v1702_v6 }
 0x330   :  { %v1850_v48 = vpop.f32.mrf.mxu3 }
 0x332   :  { %v455_v8 = vpop.xlane.xlu2 %454 }
 0x333   :  { %v459_v9 = vsub.f32 %v451_v60, %v455_v8 }
 0x335   :  { %v461_v10 = vmul.f32 1.442695, %v459_v9 }
 0x337   :  { %1541 = vpow2.f32 %v461_v10 }
 0x338   :  { %v1854_v49 = vpop.f32.mrf.mxu3 }
 0x33d   :  { %v1542_v11 = vpop.eup %1541 }
 0x33e   :  { %v465_v12 = vsel %vm183_vm1, %v1542_v11, 0.0 }
 0x33f   :  { %466 = vadd.xlane.f32.xlu1 %v465_v12 }
 0x34c   :  { %v513_v13 = vpop.f32.mrf.mxu1 }
 0x354   :  { %v515_v14 = vpop.f32.mrf.mxu1 }
 0x35c   :  { %v627_v25 = vpop.f32.mrf.mxu1 }
 0x35d   :  { %v628_v27 = vadd.f32 %v1516_v26, %v627_v25 }
 0x35f   :  { %v670_v28 = vpack.c.bf16 %v628_v27, %v628_v27 }
 0x361   :  { %v676_v29 = vsel %vm183_vm1, %v670_v28, 0 }
 0x362   :  { %685 = vmatpush.bf16.xpose.msra.mxu3 %v676_v29 }
 0x364   :  { %v629_v30 = vpop.f32.mrf.mxu1 }
 0x365   :  { %v630_v31 = vadd.f32 %v1516_v26, %v629_v30 }
 0x367   :  { %v671_v32 = vpack.c.bf16 %v630_v31, %v630_v31 }
 0x369   :  { %v695_v33 = vsel %vm183_vm1, %v671_v32, 0  ;;  %v1402_v32 = vld [vmem:[%s2022_s8 + $0x8] sm:$0xf] }
 0x3b2   :  { %v467_v19 = vpop.xlane.xlu1 %466 }
 0x3b3   :  { %1543 = vrcp.f32 %v467_v19 }
 0x3b9   :  { %v1544_v20 = vpop.eup %1543 }
 0x3ba   :  { %v473_v21 = vmul.f32 %v1544_v20, %v1542_v11  ;;  %v1499_v20 = vld [vmem:[%s2041_s11 + $0x38] sm:$0xff] }
 0x3bc   :  { %v475_v22 = vpack.c.bf16 %v473_v21, %v473_v21  ;;  %v1498_v21 = vld [vmem:[%s2041_s11 + $0x30] sm:$0xff] }
 0x3be   :  { %1351 = vmatmul.msk.bf16.vlgmr.msrb.gmra.mxu0 %vm183_vm1, %v475_v22  ;;  %v1497_v22 = vld [vmem:[%s2040_s23 + $0x38] sm:$0xff] }
 0x3bf   :  { %704 = vmatpush.bf16.xpose.msrb.mxu0 %v695_v33  ;;  %v785_v33 = vsel %vm261_vm6, %v1402_v32, 0 }
 0x3c0   :  { %794 = vmatpush.bf16.msrb.mxu3 %v785_v33 }
 0x3ce   :  { %1369 = vmatmul.msk.bf16.vlgmr.msra.gmra.mxu0 %vm93_vm0, %v1702_v6 }
 0x3cf   :  { %831 = vmatpush.bf16.msra.mxu0 %v1497_v22 }
 0x3d3   :  { %832 = vmatpush.bf16.msra.mxu0 %v1496_v23 }
 0x43b   :  { %v494_v34 = vpop.f32.mrf.mxu0 }
 0x43c   :  { %v517_v36 = vpack.c.bf16 %v513_v13, %v494_v34 }
 0x43e   :  { %1354 = vmatmul.msk.bf16.vlgmr.msrb.gmra.mxu2 %vm183_vm1, %v517_v36 }
 0x443   :  { %v496_v37 = vpop.f32.mrf.mxu0 }
 0x44b   :  { %v591_v40 = vpop.f32.mrf.mxu0 }
 0x44c   :  { %v592_v41 = vadd.f32 %v1517_v39, %v591_v40  ;;  %v1519_v40 = vld [vmem:[%s2018_s6 + $0x3] ss:$0 sm:$0xff] }
 0x44e   :  { %v668_v42 = vpack.c.bf16 %v592_v41, %v592_v41  ;;  %1397 = vmatmul.msk.bf16.vlgmr.msra.gmra.mxu2 %vm93_vm0, %v1702_v6 }
 0x450   :  { %1398 = vmatmul.msk.bf16.vlgmr.msra.gmra.mxu3 %vm183_vm1, %v668_v42 }
 0x453   :  { %v593_v43 = vpop.f32.mrf.mxu0 }
 0x454   :  { %v594_v44 = vadd.f32 %v1517_v39, %v593_v43 }
 0x456   :  { %v669_v45 = vpack.c.bf16 %v594_v44, %v594_v44  ;;  %v1520_v44 = vld [vmem:[%s2017_s5 + $0x3] ss:$0 sm:$0xff] }
 0x458   :  { %1399 = vmatmul.msk.bf16.vlgmr.msrb.gmra.mxu0 %vm183_vm1, %v669_v45 }
 0x468   :  { %1417 = vmatmul.msk.bf16.vlgmr.msra.gmra.mxu0 %vm93_vm0, %v1702_v6 }
 0x4c1   :  { %v1862_v60 = vpop.f32.mrf.mxu2 }
 0x4c9   :  { %v1864_v61 = vpop.f32.mrf.mxu2 }
 0x4d1   :  { %v663_v63 = vpop.f32.mrf.mxu2 }
 0x4d2   :  { %v664_v0 = vadd.f32 %v1518_v62, %v663_v63  ;;  %v556_v63 = vadd.f32 %v1850_v48, %v1862_v60 }
 0x4d3   :  { %v687_v50 = vpop.f32.mrf.mxu3 }
 0x4d4   :  { %v710_v51 = vmul.f32 0.35355338, %v687_v50  ;;  %v738_v3 = vpack.c.bf16 %v664_v0, %v664_v0 }
 0x4d5   :  { %v706_v52 = vpop.f32.mrf.mxu0 }
 0x4d6   :  { %v711_v53 = vmul.f32 0.35355338, %v706_v52  ;;  %v712_v54 = vsel %vm1740_vm4, %v710_v51, -1e+30  ;;  %v744_v10 = vsel %vm261_vm6, %v738_v3, 0 }
 0x4d7   :  { %v714_v55 = vsel %vm183_vm1, %v712_v54, -inf  ;;  %753 = vmatpush.bf16.msrb.mxu1 %v744_v10 }
 0x4d8   :  { %715 = vmax.xlane.f32.xlu2 %v714_v55  ;;  %v713_v56 = vsel %vm1744_vm5, %v711_v53, -1e+30 }
 0x4d9   :  { %v717_v57 = vsel %vm183_vm1, %v713_v56, -inf  ;;  %v665_v12 = vpop.f32.mrf.mxu2 }
 0x4da   :  { %718 = vmax.xlane.f32.xlu0 %v717_v57  ;;  %v666_v13 = vadd.f32 %v1518_v62, %v665_v12  ;;  %v1500_v62 = vld [vmem:[%s2020_s4 + $0x30] sm:$0xff] }
 0x4db   :  { %v689_v58 = vpop.f32.mrf.mxu3  ;;  %867 = vmatpush.bf16.msra.mxu1 %v1499_v20 }
 0x4dc   :  { %v739_v14 = vpack.c.bf16 %v666_v13, %v666_v13  ;;  %v1521_v13 = vld [vmem:[%s2021_s7 + $0x3] ss:$0 sm:$0xff] }
 0x4dd   :  { %v708_v59 = vpop.f32.mrf.mxu0 }
 0x4de   :  { %v763_v16 = vsel %vm261_vm6, %v739_v14, 0  ;;  %v1501_v59 = vld [vmem:[%s2020_s4 + $0x38] sm:$0xff] }
 0x4df   :  { %772 = vmatpush.bf16.msrb.mxu2 %v763_v16  ;;  %868 = vmatpush.bf16.msra.mxu1 %v1498_v21 }
 0x4e3   :  { %903 = vmatpush.bf16.msra.mxu2 %v1501_v59 }
 0x4e5   :  { %v834_v45 = vpop.f32.mrf.mxu0 }
 0x4e6   :  { %v835_v50 = vadd.f32 %v1520_v44, %v834_v45 }
 0x4e7   :  { %904 = vmatpush.bf16.msra.mxu2 %v1500_v62  ;;  %v1572_v62 = vmov 32.0  }
 0x4e8   :  { %v911_v52 = vpack.c.bf16 %v835_v50, %v835_v50 }
 0x4ed   :  { %v836_v55 = vpop.f32.mrf.mxu0 }
 0x4ee   :  { %v837_v57 = vadd.f32 %v1520_v44, %v836_v55 }
 0x4f0   :  { %v912_v58 = vpack.c.bf16 %v837_v57, %v837_v57 }
 0x54b   :  { %v716_v1 = vpop.xlane.xlu2 %715 }
 0x54c   :  { %v720_v2 = vsub.f32 %v712_v54, %v716_v1 }
 0x54d   :  { %v719_v7 = vpop.xlane.xlu0 %718 }
 0x54e   :  { %v722_v8 = vmul.f32 1.442695, %v720_v2  ;;  %v721_v9 = vsub.f32 %v713_v56, %v719_v7  ;;  %v558_v2 = vadd.f32 %v1854_v49, %v1864_v61 }
 0x550   :  { %1545 = vpow2.f32 %v722_v8  ;;  %v724_v11 = vmul.f32 1.442695, %v721_v9 }
 0x552   :  { %1547 = vpow2.f32 %v724_v11 }
 0x556   :  { %v1546_v15 = vpop.eup %1545 }
 0x557   :  { %v726_v17 = vsel %vm183_vm1, %v1546_v15, 0.0 }
 0x558   :  { %v1548_v18 = vpop.eup %1547  ;;  %727 = vadd.xlane.f32.xlu1 %v726_v17 }
 0x559   :  { %v729_v19 = vsel %vm183_vm1, %v1548_v18, 0.0 }
 0x55a   :  { %730 = vadd.xlane.f32.xlu2 %v729_v19 }
 0x5cb   :  { %v728_v24 = vpop.xlane.xlu1 %727 }
 0x5cc   :  { %1549 = vrcp.f32 %v728_v24 }
 0x5cd   :  { %v731_v25 = vpop.xlane.xlu2 %730 }
 0x5ce   :  { %1551 = vrcp.f32 %v731_v25 }
 0x5d2   :  { %v1550_v26 = vpop.eup %1549 }
 0x5d3   :  { %v734_v27 = vmul.f32 %v1550_v26, %v1546_v15 }
 0x5d4   :  { %v1552_v28 = vpop.eup %1551 }
 0x5d5   :  { %v736_v29 = vpack.c.bf16 %v734_v27, %v734_v27  ;;  %v735_v30 = vmul.f32 %v1552_v28, %v1548_v18 }
 0x5d7   :  { %v737_v31 = vpack.c.bf16 %v735_v30, %v735_v30  ;;  %1400 = vmatmul.msk.bf16.vlgmr.msrb.gmra.mxu1 %vm183_vm1, %v736_v29 }
 0x5d9   :  { %1401 = vmatmul.msk.bf16.vlgmr.msrb.gmra.mxu2 %vm183_vm1, %v737_v31 }
 0x5e7   :  { %1431 = vmatmul.msk.bf16.vlgmr.msra.gmra.mxu1 %vm93_vm0, %v1702_v6 }
 0x5e9   :  { %1445 = vmatmul.msk.bf16.vlgmr.msra.gmra.mxu2 %vm93_vm0, %v1702_v6 }
 0x654   :  { %v755_v34 = vpop.f32.mrf.mxu1 }
 0x65c   :  { %v757_v36 = vpop.f32.mrf.mxu1  ;;  %v774_v37 = vpop.f32.mrf.mxu2 }
 0x65d   :  { %v778_v39 = vpack.c.bf16 %v774_v37, %v755_v34 }
 0x65f   :  { %1403 = vmatmul.msk.bf16.vlgmr.msrb.gmra.mxu3 %vm183_vm1, %v778_v39 }
 0x664   :  { %v776_v41 = vpop.f32.mrf.mxu2  ;;  %v870_v42 = vpop.f32.mrf.mxu1 }
 0x665   :  { %v871_v43 = vadd.f32 %v1519_v40, %v870_v42 }
 0x667   :  { %v913_v46 = vpack.c.bf16 %v871_v43, %v871_v43 }
 0x669   :  { %v919_v47 = vsel %vm183_vm1, %v913_v46, 0 }
 0x66a   :  { %928 = vmatpush.bf16.xpose.msra.mxu3 %v919_v47  ;;  %v1522_v47 = vld [vmem:[%s2023_s9] ss:$0 sm:$0xff] }
 0x66c   :  { %v872_v51 = vpop.f32.mrf.mxu1  ;;  %v906_v14 = vpop.f32.mrf.mxu2 }
 0x66d   :  { %v873_v53 = vadd.f32 %v1519_v40, %v872_v51  ;;  %v907_v15 = vadd.f32 %v1521_v13, %v906_v14  ;;  %v1450_v40 = vld [vmem:[%s2022_s8 + $0xc] sm:$0xf]  ;;  %v1502_v14 = vld [vmem:[%s2027_s10] sm:$0xff] }
 0x66e   :  { %v1028_v41 = vsel %vm261_vm6, %v1450_v40, 0 }
 0x66f   :  { %v914_v54 = vpack.c.bf16 %v873_v53, %v873_v53  ;;  %v981_v17 = vpack.c.bf16 %v907_v15, %v907_v15 }
 0x671   :  { %v938_v56 = vsel %vm183_vm1, %v914_v54, 0  ;;  %1446 = vmatmul.msk.bf16.vlgmr.msra.gmra.mxu3 %vm183_vm1, %v911_v52  ;;  %v987_v38 = vsel %vm261_vm6, %v981_v17, 0 }
 0x672   :  { %947 = vmatpush.bf16.xpose.msrb.mxu0 %v938_v56  ;;  %996 = vmatpush.bf16.msrb.mxu1 %v987_v38 }
 0x673   :  { %1037 = vmatpush.bf16.msrb.mxu3 %v1028_v41 }
 0x674   :  { %v908_v22 = vpop.f32.mrf.mxu2 }
 0x675   :  { %v909_v23 = vadd.f32 %v1521_v13, %v908_v22 }
 0x677   :  { %v982_v24 = vpack.c.bf16 %v909_v23, %v909_v23 }
 0x679   :  { %1447 = vmatmul.msk.bf16.vlgmr.msrb.gmra.mxu0 %vm183_vm1, %v912_v58  ;;  %v1006_v26 = vsel %vm261_vm6, %v982_v24, 0 }
 0x67a   :  { %1015 = vmatpush.bf16.msrb.mxu2 %v1006_v26 }
 0x6e2   :  { %v796_v0 = vpop.f32.mrf.mxu3 }
 0x6e3   :  { %v1914_v1 = vadd.f32 %v796_v0, %v556_v63 }
 0x6ea   :  { %v798_v3 = vpop.f32.mrf.mxu3 }
 0x6eb   :  { %v1920_v7 = vadd.f32 %v798_v3, %v558_v2 }
 0x6f4   :  { %v930_v8 = vpop.f32.mrf.mxu3 }
 0x6f5   :  { %v953_v9 = vmul.f32 0.35355338, %v930_v8 }
 0x6f6   :  { %v949_v10 = vpop.f32.mrf.mxu0 }
 0x6f7   :  { %v954_v11 = vmul.f32 0.35355338, %v949_v10  ;;  %v955_v48 = vsel %vm1740_vm4, %v953_v9, -1e+30 }
 0x6f8   :  { %v957_v60 = vsel %vm183_vm1, %v955_v48, -inf }
 0x6f9   :  { %958 = vmax.xlane.f32.xlu1 %v957_v60  ;;  %v956_v12 = vsel %vm1744_vm5, %v954_v11, -1e+30 }
 0x6fa   :  { %v960_v6 = vsel %vm183_vm1, %v956_v12, -inf }
 0x6fb   :  { %961 = vmax.xlane.f32.xlu0 %v960_v6 }
 0x6fc   :  { %v932_v49 = vpop.f32.mrf.mxu3 }
 0x6fd   :  { %v1503_v49 = vld [vmem:[%s2027_s10 + $0x8] sm:$0xff] }
 0x6fe   :  { %v951_v61 = vpop.f32.mrf.mxu0  ;;  %1147 = vmatpush.bf16.msra.mxu0 %v1503_v49 }
 0x702   :  { %1148 = vmatpush.bf16.msra.mxu0 %v1502_v14 }
 0x76c   :  { %v959_v16 = vpop.xlane.xlu1 %958 }
 0x76d   :  { %v963_v35 = vsub.f32 %v955_v48, %v959_v16 }
 0x76e   :  { %v962_v18 = vpop.xlane.xlu0 %961 }
 0x76f   :  { %v965_v19 = vmul.f32 1.442695, %v963_v35  ;;  %v964_v20 = vsub.f32 %v956_v12, %v962_v18 }
 0x771   :  { %1553 = vpow2.f32 %v965_v19  ;;  %v967_v21 = vmul.f32 1.442695, %v964_v20 }
 0x773   :  { %1555 = vpow2.f32 %v967_v21 }
 0x777   :  { %v1554_v25 = vpop.eup %1553 }
 0x778   :  { %v969_v27 = vsel %vm183_vm1, %v1554_v25, 0.0 }
 0x779   :  { %v1556_v28 = vpop.eup %1555  ;;  %970 = vadd.xlane.f32.xlu0 %v969_v27 }
 0x77a   :  { %v972_v29 = vsel %vm183_vm1, %v1556_v28, 0.0 }
 0x77b   :  { %973 = vadd.xlane.f32.xlu2 %v972_v29  ;;  %v1523_v29 = vld [vmem:[%s2024_s14] ss:$0 sm:$0xff] }
 0x7ec   :  { %v971_v30 = vpop.xlane.xlu0 %970 }
 0x7ed   :  { %1557 = vrcp.f32 %v971_v30 }
 0x7ee   :  { %v974_v31 = vpop.xlane.xlu2 %973 }
 0x7ef   :  { %1559 = vrcp.f32 %v974_v31 }
 0x7f0   :  { %1561 = vrcp.f32 %v1572_v62 }
 0x7f3   :  { %v1558_v32 = vpop.eup %1557 }
 0x7f4   :  { %v977_v33 = vmul.f32 %v1558_v32, %v1554_v25 }
 0x7f5   :  { %v1560_v34 = vpop.eup %1559 }
 0x7f6   :  { %v979_v36 = vpack.c.bf16 %v977_v33, %v977_v33  ;;  %v978_v37 = vmul.f32 %v1560_v34, %v1556_v28  ;;  %v1562_v63 = vpop.eup %1561  ;;  %v1524_v33 = vld [vmem:[%s2025_s15] ss:$0 sm:$0xff] }
 0x7f7   :  { %v1063_v0 = vmul.f32 32.0, %v1562_v63  ;;  %vm1067_vm7 = vweird.f32 %v1562_v63 }
 0x7f8   :  { %v980_v39 = vpack.c.bf16 %v978_v37, %v978_v37  ;;  %1448 = vmatmul.msk.bf16.vlgmr.msrb.gmra.mxu1 %vm183_vm1, %v979_v36 }
 0x7fa   :  { %1449 = vmatmul.msk.bf16.vlgmr.msrb.gmra.mxu2 %vm183_vm1, %v980_v39 }
 0x875   :  { %v998_v42 = vpop.f32.mrf.mxu1 }
 0x87d   :  { %v1000_v43 = vpop.f32.mrf.mxu1  ;;  %v1017_v44 = vpop.f32.mrf.mxu2 }
 0x87e   :  { %v1021_v45 = vpack.c.bf16 %v1017_v44, %v998_v42  ;;  %v1507_v42 = vld [vmem:[%s2029_s12 + $0x18] sm:$0xff]  ;;  %v1506_v43 = vld [vmem:[%s2029_s12 + $0x10] sm:$0xff]  ;;  %v1505_v44 = vld [vmem:[%s2029_s12 + $0x8] sm:$0xff] }
 0x87f   :  { %1202 = vmatpush.bf16.msra.mxu1 %v1507_v42 }
 0x880   :  { %1451 = vmatmul.msk.bf16.vlgmr.msrb.gmra.mxu3 %vm183_vm1, %v1021_v45  ;;  %v1504_v45 = vld [vmem:[%s2029_s12] sm:$0xff] }
 0x883   :  { %1203 = vmatpush.bf16.msra.mxu1 %v1506_v43 }
 0x885   :  { %v1019_v46 = vpop.f32.mrf.mxu2 }
 0x887   :  { %1204 = vmatpush.bf16.msra.mxu1 %v1505_v44 }
 0x88b   :  { %1205 = vmatpush.bf16.msra.mxu1 %v1504_v45 }
 0x903   :  { %v1039_v50 = vpop.f32.mrf.mxu3 }
 0x904   :  { %v1044_v51 = vadd.f32 %v1039_v50, %v1914_v1  ;;  %v1064_v1 = vsub.f32 1.0, %v1063_v0 }
 0x906   :  { %v1050_v52 = vadd.f32 %v1522_v47, %v1044_v51  ;;  %v1065_v2 = vmul.f32 %v1562_v63, %v1064_v1 }
 0x908   :  { %v1052_v53 = vadd.f32 %v1050_v52, %v1693_v4  ;;  %v1066_v3 = vadd.f32 %v1562_v63, %v1065_v2 }
 0x90a   :  { %v1056_v54 = vsel %vm93_vm0, %v1052_v53, 0.0  ;;  %v1951_v4 = vsel %vm1067_vm7, %v1562_v63, %v1066_v3 }
 0x90b   :  { %1057 = vadd.xlane.f32.xlu1 %v1056_v54  ;;  %v1041_v55 = vpop.f32.mrf.mxu3 }
 0x90c   :  { %v1045_v56 = vadd.f32 %v1041_v55, %v1920_v7 }
 0x90e   :  { %v1051_v57 = vadd.f32 %v1522_v47, %v1045_v56  ;;  %v1525_v47 = vld [vmem:[%s2047_s3] ss:$0 sm:$0xff] }
 0x90f   :  { %v1526_v56 = vld [vmem:[%s2028_s13] ss:$0 sm:$0xff] }
 0x910   :  { %v1053_v58 = vadd.f32 %v1051_v57, %v1698_v5 }
 0x912   :  { %v1059_v59 = vsel %vm93_vm0, %v1053_v58, 0.0 }
 0x913   :  { %1060 = vadd.xlane.f32.xlu2 %v1059_v59 }
 0x97e   :  { %v1058_v8 = vpop.xlane.xlu1 %1057 }
 0x97f   :  { %v1069_v9 = vmul.f32 %v1951_v4, %v1058_v8 }
 0x981   :  { %v1071_v7 = vsub.f32 %v1052_v53, %v1069_v9 }
 0x983   :  { %v1073_v10 = vmul.f32 %v1071_v7, %v1071_v7 }
 0x985   :  { %v1075_v5 = vsel %vm93_vm0, %v1073_v10, 0.0 }
 0x986   :  { %1076 = vadd.xlane.f32.xlu0 %v1075_v5  ;;  %v1061_v11 = vpop.xlane.xlu2 %1060 }
 0x987   :  { %v1070_v48 = vmul.f32 %v1951_v4, %v1061_v11 }
 0x989   :  { %v1072_v60 = vsub.f32 %v1053_v58, %v1070_v48 }
 0x98b   :  { %v1074_v12 = vmul.f32 %v1072_v60, %v1072_v60 }
 0x98d   :  { %v1078_v6 = vsel %vm93_vm0, %v1074_v12, 0.0 }
 0x98e   :  { %1079 = vadd.xlane.f32.xlu1 %v1078_v6 }
 0x9f9   :  { %v1077_v61 = vpop.xlane.xlu0 %1076 }
 0x9fa   :  { %v1081_v13 = vmul.f32 %v1077_v61, %v1951_v4 }
 0x9fc   :  { %v1083_v15 = vadd.f32 1e-05, %v1081_v13 }
 0x9fe   :  { %1563 = vrsqrt.f32 %v1083_v15  ;;  %vm1091_vm9 = vweird.f32 %v1083_v15 }
 0xa01   :  { %v1080_v16 = vpop.xlane.xlu1 %1079 }
 0xa02   :  { %v1082_v35 = vmul.f32 %v1080_v16, %v1951_v4 }
 0xa04   :  { %v1564_v17 = vpop.eup %1563  ;;  %v1084_v18 = vadd.f32 1e-05, %v1082_v35 }
 0xa05   :  { %v1086_v19 = vmul.f32 %v1564_v17, %v1083_v15  ;;  %vm1092_vm8 = vweird.f32 %v1564_v17 }
 0xa06   :  { %1565 = vrsqrt.f32 %v1084_v18  ;;  %vm1093_vm10 = vmor %vm1091_vm9, %vm1092_vm8  ;;  %vm1101_vm12 = vweird.f32 %v1084_v18 }
 0xa07   :  { %v1087_v20 = vmul.f32 %v1564_v17, %v1086_v19 }
 0xa09   :  { %v1088_v38 = vmul.f32 0.5, %v1087_v20 }
 0xa0b   :  { %v1089_v21 = vsub.f32 1.5, %v1088_v38 }
 0xa0c   :  { %v1566_v22 = vpop.eup %1565 }
 0xa0d   :  { %v1090_v23 = vmul.f32 %v1564_v17, %v1089_v21  ;;  %v1096_v24 = vmul.f32 %v1566_v22, %v1084_v18  ;;  %vm1102_vm11 = vweird.f32 %v1566_v22 }
 0xa0e   :  { %vm1103_vm13 = vmor %vm1101_vm12, %vm1102_vm11 }
 0xa0f   :  { %v1097_v25 = vmul.f32 %v1566_v22, %v1096_v24  ;;  %v1094_v26 = vsel %vm1093_vm10, %v1564_v17, %v1090_v23 }
 0xa10   :  { %v1105_v30 = vmul.f32 %v1094_v26, %v1071_v7 }
 0xa11   :  { %v1098_v27 = vmul.f32 0.5, %v1097_v25 }
 0xa12   :  { %v1110_v34 = vmul.f32 %v1523_v29, %v1105_v30 }
 0xa13   :  { %v1099_v28 = vsub.f32 1.5, %v1098_v27 }
 0xa14   :  { %v1115_v39 = vadd.f32 %v1524_v33, %v1110_v34 }
 0xa15   :  { %v1100_v31 = vmul.f32 %v1566_v22, %v1099_v28 }
 0xa17   :  { %v1104_v32 = vsel %vm1103_vm13, %v1566_v22, %v1100_v31  ;;  %v1527_v22 = vld [vmem:[%s2030_s16] ss:$0 sm:$0xff] }
 0xa18   :  { %v1106_v36 = vmul.f32 %v1104_v32, %v1072_v60 }
 0xa1a   :  { %v1111_v37 = vmul.f32 %v1523_v29, %v1106_v36 }
 0xa1c   :  { %v1116_v40 = vadd.f32 %v1524_v33, %v1111_v37 }
 0xa1e   :  { %v1117_v41 = vpack.c.bf16 %v1116_v40, %v1115_v39 }
 0xa20   :  { %1460 = vmatmul.msk.bf16.vlgmr.msra.gmra.mxu0 %vm93_vm0, %v1117_v41 }
 0xa9d   :  { %v1150_v46 = vpop.f32.mrf.mxu0 }
 0xa9e   :  { %v1151_v50 = vadd.f32 %v1525_v47, %v1150_v46 }
 0xaa0   :  { %v1155_v53 = vmax.f32 %v1151_v50, 0.0 }
 0xaa5   :  { %v1152_v51 = vpop.f32.mrf.mxu0 }
 0xaa6   :  { %v1153_v52 = vadd.f32 %v1525_v47, %v1152_v51 }
 0xaa8   :  { %v1156_v54 = vmax.f32 %v1153_v52, 0.0 }
 0xaaa   :  { %v1157_v55 = vpack.c.bf16 %v1156_v54, %v1155_v53 }
 0xaac   :  { %1477 = vmatmul.msk.bf16.vlgmr.msra.gmra.mxu1 %vm1194_vm14, %v1157_v55 }
 0xb29   :  { %v1207_v57 = vpop.f32.mrf.mxu1 }
 0xb2a   :  { %v1208_v58 = vadd.f32 %v1526_v56, %v1207_v57 }
 0xb2c   :  { %v1212_v59 = vadd.f32 %v1208_v58, %v1115_v39 }
 0xb2e   :  { %v1216_v62 = vsel %vm93_vm0, %v1212_v59, 0.0 }
 0xb2f   :  { %1217 = vadd.xlane.f32.xlu2 %v1216_v62 }
 0xb31   :  { %v1209_v63 = vpop.f32.mrf.mxu1 }
 0xb32   :  { %v1210_v0 = vadd.f32 %v1526_v56, %v1209_v63 }
 0xb34   :  { %v1213_v1 = vadd.f32 %v1210_v0, %v1116_v40 }
 0xb36   :  { %v1219_v2 = vsel %vm93_vm0, %v1213_v1, 0.0 }
 0xb37   :  { %1220 = vadd.xlane.f32.xlu0 %v1219_v2 }
 0xba2   :  { %v1218_v3 = vpop.xlane.xlu2 %1217 }
 0xba3   :  { %v1222_v8 = vmul.f32 %v1218_v3, %v1951_v4 }
 0xba5   :  { %v1224_v9 = vsub.f32 %v1212_v59, %v1222_v8 }
 0xba7   :  { %v1226_v7 = vmul.f32 %v1224_v9, %v1224_v9 }
 0xba9   :  { %v1228_v10 = vsel %vm93_vm0, %v1226_v7, 0.0 }
 0xbaa   :  { %v1221_v5 = vpop.xlane.xlu0 %1220  ;;  %1229 = vadd.xlane.f32.xlu1 %v1228_v10 }
 0xbab   :  { %v1223_v11 = vmul.f32 %v1221_v5, %v1951_v4 }
 0xbad   :  { %v1225_v48 = vsub.f32 %v1213_v1, %v1223_v11 }
 0xbaf   :  { %v1227_v60 = vmul.f32 %v1225_v48, %v1225_v48 }
 0xbb1   :  { %v1231_v12 = vsel %vm93_vm0, %v1227_v60, 0.0 }
 0xbb2   :  { %1232 = vadd.xlane.f32.xlu2 %v1231_v12 }
 0xc1d   :  { %v1230_v6 = vpop.xlane.xlu1 %1229 }
 0xc1e   :  { %v1234_v49 = vmul.f32 %v1230_v6, %v1951_v4 }
 0xc20   :  { %v1236_v61 = vadd.f32 1e-05, %v1234_v49 }
 0xc22   :  { %1567 = vrsqrt.f32 %v1236_v61  ;;  %vm1244_vm1 = vweird.f32 %v1236_v61 }
 0xc25   :  { %v1233_v13 = vpop.xlane.xlu2 %1232 }
 0xc26   :  { %v1235_v14 = vmul.f32 %v1233_v13, %v1951_v4  ;;  %v1528_v4 = vld [vmem:[%s2031_s17] ss:$0 sm:$0xff] }
 0xc28   :  { %v1568_v15 = vpop.eup %1567  ;;  %v1237_v16 = vadd.f32 1e-05, %v1235_v14 }
 0xc29   :  { %v1239_v35 = vmul.f32 %v1568_v15, %v1236_v61  ;;  %vm1245_vm15 = vweird.f32 %v1568_v15 }
 0xc2a   :  { %1569 = vrsqrt.f32 %v1237_v16  ;;  %vm1246_vm2 = vmor %vm1244_vm1, %vm1245_vm15  ;;  %vm1254_vm4 = vweird.f32 %v1237_v16 }
 0xc2b   :  { %v1240_v17 = vmul.f32 %v1568_v15, %v1239_v35 }
 0xc2d   :  { %v1241_v18 = vmul.f32 0.5, %v1240_v17 }
 0xc2f   :  { %v1242_v19 = vsub.f32 1.5, %v1241_v18 }
 0xc30   :  { %v1570_v20 = vpop.eup %1569 }
 0xc31   :  { %v1243_v38 = vmul.f32 %v1568_v15, %v1242_v19  ;;  %v1249_v21 = vmul.f32 %v1570_v20, %v1237_v16  ;;  %vm1255_vm3 = vweird.f32 %v1570_v20 }
 0xc32   :  { %vm1256_vm5 = vmor %vm1254_vm4, %vm1255_vm3 }
 0xc33   :  { %v1247_v23 = vsel %vm1246_vm2, %v1568_v15, %v1243_v38  ;;  %v1250_v24 = vmul.f32 %v1570_v20, %v1249_v21 }
 0xc34   :  { %v1258_v25 = vmul.f32 %v1247_v23, %v1224_v9 }
 0xc35   :  { %v1251_v26 = vmul.f32 0.5, %v1250_v24 }
 0xc36   :  { %v1263_v27 = vmul.f32 %v1527_v22, %v1258_v25 }
 0xc37   :  { %v1252_v28 = vsub.f32 1.5, %v1251_v26 }
 0xc38   :  { %v1268_v29 = vadd.f32 %v1528_v4, %v1263_v27 }
 0xc39   :  { %v1253_v30 = vmul.f32 %v1570_v20, %v1252_v28 }
 0xc3a   :  { %1270 = vst.msk [vmem:[%s2032_s20] sm:$0xff] %vm93_vm0, %v1268_v29 }
 0xc3b   :  { %v1257_v31 = vsel %vm1256_vm5, %v1570_v20, %v1253_v30 }
 0xc3c   :  { %v1259_v32 = vmul.f32 %v1257_v31, %v1225_v48 }
 0xc3e   :  { %v1264_v33 = vmul.f32 %v1527_v22, %v1259_v32 }
 0xc40   :  { %v1269_v34 = vadd.f32 %v1528_v4, %v1264_v33 }
 0xc42   :  { %1271 = vst.msk [vmem:[%s2032_s20 + $0x8] sm:$0xff] %vm93_vm0, %v1269_v34 }

</bundles_post_ra>
